<compile_context>
chip_gen: v5e
topology: v5e:2x2
jax: 0.10.0
libtpu: 0.0.40
codegen_flags: <defaults>
</compile_context>

<pallas_src>
import math

import jax
import jax.numpy as jnp
from jax.experimental import pallas as pl
from jax.experimental.pallas import tpu as pltpu

TWO_PI = 2.0 * math.pi
HALF_PI = 0.5 * math.pi


def _round_up(a, b):
    return (a + b - 1) // b * b


def fourier_kernel(x_ref, b_ref, phase_ref, o_ref):
    # Single fused pass: sin(x @ [2piB | 2piB] + [0 | pi/2]) == [sin, cos].
    proj = jnp.dot(x_ref[...], b_ref[...], preferred_element_type=jnp.float32)
    proj = proj + phase_ref[...]          # (1, 2F) broadcast over sublanes
    o_ref[...] = jnp.sin(proj).astype(o_ref.dtype)


def _vmem_capacity_bytes():
    try:
        cap = getattr(pltpu.get_tpu_info(), "vmem_capacity_bytes", None)
        if cap:
            return int(cap)
    except Exception:
        pass
    return 64 << 20  # conservative fallback: v7x per-TensorCore capacity


def fourier_layer(x, B, *, target_block_bytes=4 << 20, out_dtype=None):
    """x: (..., K), B: (K, F) -> (..., 2F) = concat([sin(2*pi*x@B), cos(2*pi*x@B)], -1).

    out_dtype: optional narrower output dtype (e.g. jnp.bfloat16) to halve the
    dominant HBM writeback traffic; defaults to x.dtype (matches PyTorch).
    """
    in_features, out_features = B.shape
    assert x.shape[-1] == in_features
    out_dtype = jnp.dtype(x.dtype if out_dtype is None else out_dtype)

    lead = x.shape[:-1]
    M = int(math.prod(lead)) if lead else 1
    N2 = 2 * out_features
    x2d = x.reshape(M, in_features)

    # Fold the constant 2*pi into the fixed weight, duplicate it for the cos
    # half, and carry the pi/2 phase as a 1-row vector (done once, outside).
    B32 = B.astype(jnp.float32) * TWO_PI
    B_fused = jnp.concatenate([B32, B32], axis=1)                       # (K, 2F)
    phase = jnp.concatenate(
        [jnp.zeros((1, out_features), jnp.float32),
         jnp.full((1, out_features), HALF_PI, jnp.float32)], axis=1)    # (1, 2F)

    x_itemsize = jnp.dtype(x.dtype).itemsize
    o_itemsize = out_dtype.itemsize

    def working_set_bytes(tm):
        x_blk = tm * in_features * x_itemsize
        b_blk = in_features * N2 * 4
        ph_blk = N2 * 4
        o_blk = tm * N2 * o_itemsize
        interm = 3 * tm * N2 * 4          # f32 projection + sin/cast temporaries
        scratch = 1 << 20                 # Mosaic internal scratch headroom
        return 2 * (x_blk + o_blk) + 2 * (b_blk + ph_blk) + interm + scratch

    # --- generation-aware VMEM budget ---------------------------------------
    vmem_cap = _vmem_capacity_bytes()
    if vmem_cap >= (100 << 20):           # v5e / v6e: 128 MiB per TensorCore
        vmem_budget = 48 << 20
        vmem_limit_cap = 64 << 20
    else:                                  # v7x: 64 MiB per TensorCore
        vmem_budget = 20 << 20
        vmem_limit_cap = 36 << 20

    # --- tile-size selection: ~target_block_bytes of output per grid step ----
    rows_for_target = max(1, target_block_bytes // max(1, N2 * o_itemsize))
    tm = _round_up(int(rows_for_target), 8)
    # Keep at least 2 grid steps when M allows (feeds both v7x TensorCores).
    tm = min(tm, _round_up(pl.cdiv(M, 2), 8))
    tm = max(tm, 8)
    # Shrink monotonically until the full working set fits the VMEM budget.
    while tm > 8 and working_set_bytes(tm) > vmem_budget:
        tm = max(8, (tm // 2) // 8 * 8)
    # TODO(synk): extremely wide out_features pinned at tm=8 would need an
    # F-tiling grid axis; not needed for practical Fourier-feature sizes.

    # Prefer an even number of grid steps (balanced across v7x's two cores).
    steps = pl.cdiv(M, tm)
    if steps > 1 and steps % 2 == 1:
        tm = min(tm, max(8, _round_up(pl.cdiv(M, steps + 1), 8)))
        steps = pl.cdiv(M, tm)

    # Pad M so the grid covers it exactly (padding rows are sliced off below).
    M_pad = _round_up(M, tm)
    if M_pad != M:
        x2d = jnp.pad(x2d, ((0, M_pad - M), (0, 0)))
    grid = (M_pad // tm,)

    vmem_limit = int(min(vmem_limit_cap,
                         max(32 << 20, working_set_bytes(tm) + (8 << 20))))

    cost = pl.CostEstimate(
        flops=2 * M_pad * in_features * N2 + M_pad * N2,
        transcendentals=M_pad * N2,
        bytes_accessed=(M_pad * in_features * x_itemsize
                        + in_features * N2 * 4 + N2 * 4
                        + M_pad * N2 * o_itemsize),
    )

    out2d = pl.pallas_call(
        fourier_kernel,
        out_shape=jax.ShapeDtypeStruct((M_pad, N2), out_dtype),
        grid_spec=pltpu.PrefetchScalarGridSpec(
            num_scalar_prefetch=0,
            grid=grid,
            in_specs=[
                pl.BlockSpec((tm, in_features), lambda i: (i, 0)),
                # Constant index maps: Pallas does not re-DMA these per step.
                pl.BlockSpec((in_features, N2), lambda i: (0, 0)),
                pl.BlockSpec((1, N2), lambda i: (0, 0)),
            ],
            out_specs=pl.BlockSpec((tm, N2), lambda i: (i, 0)),
        ),
        compiler_params=pltpu.CompilerParams(
            dimension_semantics=("parallel",),
            vmem_limit_bytes=vmem_limit,
        ),
        cost_estimate=cost,
    )(x2d, B_fused, phase)

    # Drop the M padding; the feature layout already matches
    # torch.cat([sin, cos], dim=-1) exactly (no F padding, no second HBM pass).
    out2d = out2d[:M]
    return out2d.reshape(*lead, N2)


def fourier_layer_ref(x, B):
    x_proj = jnp.matmul(TWO_PI * x, B)
    return jnp.concatenate([jnp.sin(x_proj), jnp.cos(x_proj)], axis=-1)


if __name__ == "__main__":
    key = jax.random.PRNGKey(0)
    kx, kb, kx2, kb2 = jax.random.split(key, 4)

    # Main config: in_features=8, out_features=128, k=1.0; x: (2, 64, 8).
    in_features, out_features, k = 8, 128, 1.0
    B = jax.random.normal(kb, (in_features, out_features), dtype=jnp.float32) * k
    x = jax.random.normal(kx, (2, 64, in_features), dtype=jnp.float32)

    out = jax.block_until_ready(fourier_layer(x, B))
    ref = fourier_layer_ref(x, B)
    assert out.shape == (2, 64, 2 * out_features), out.shape
    assert jnp.allclose(out, ref, atol=1e-4, rtol=1e-4), float(
        jnp.max(jnp.abs(out - ref))
    )

    # Ragged config: 2*out_features=144 is not a lane multiple (masked stores,
    # no epilogue pass) and M=30 is not a tile multiple (M padding path).
    B2 = jax.random.normal(kb2, (4, 72), dtype=jnp.float32) * 2.0
    x2 = jax.random.normal(kx2, (3, 10, 4), dtype=jnp.float32)
    out2 = jax.block_until_ready(fourier_layer(x2, B2))
    ref2 = fourier_layer_ref(x2, B2)
    assert out2.shape == (3, 10, 144), out2.shape
    assert jnp.allclose(out2, ref2, atol=1e-4, rtol=1e-4), float(
        jnp.max(jnp.abs(out2 - ref2))
    )

    # Optional bf16 writeback path (halves dominant HBM store traffic; the
    # single biggest lever on v5e).
    out_bf16 = jax.block_until_ready(fourier_layer(x, B, out_dtype=jnp.bfloat16))
    assert out_bf16.dtype == jnp.bfloat16
    assert jnp.allclose(out_bf16.astype(jnp.float32), ref, atol=2e-2, rtol=2e-2)

    print("KERNEL_OK")
</pallas_src>

<mosaic_0001>
module attributes {stable_mosaic.version = 11 : i64} {
  func.func @fourier_kernel(%arg0: i32, %arg1: memref<64x8xf32, #tpu.memory_space<vmem>>, %arg2: memref<8x256xf32, #tpu.memory_space<vmem>>, %arg3: memref<1x256xf32, #tpu.memory_space<vmem>>, %arg4: memref<64x256xf32, #tpu.memory_space<vmem>>) attributes {dimension_semantics = [#tpu.dimension_semantics<parallel>], iteration_bounds = array<i64: 2>, scalar_prefetch = 0 : i64, scratch_operands = 0 : i64, tpu.core_type = #tpu.core_type<tc>, window_params = [{transform_indices = @transform_0, window_bounds = array<i64: 64, 8>}, {pipeline_mode = #tpu.pipeline_mode<synchronous>, transform_indices = @transform_1, window_bounds = array<i64: 8, 256>}, {pipeline_mode = #tpu.pipeline_mode<synchronous>, transform_indices = @transform_2, window_bounds = array<i64: 1, 256>}, {transform_indices = @transform_3, window_bounds = array<i64: 64, 256>}]} {
    %c0 = arith.constant 0 : index
    %c0_0 = arith.constant 0 : index
    %0 = vector.load %arg1[%c0, %c0_0] : memref<64x8xf32, #tpu.memory_space<vmem>>, vector<64x8xf32>
    %c0_1 = arith.constant 0 : index
    %c0_2 = arith.constant 0 : index
    %1 = vector.load %arg2[%c0_1, %c0_2] : memref<8x256xf32, #tpu.memory_space<vmem>>, vector<8x256xf32>
    %cst = arith.constant dense<0.000000e+00> : vector<64x256xf32>
    %2 = tpu.matmul %0, %1, %cst {dimension_numbers = #tpu.dot_dimension_numbers<[1], [0], [0], [1], [0, 0, 1, 1], [], []>} : vector<64x8xf32>, vector<8x256xf32>, vector<64x256xf32> -> vector<64x256xf32>
    %c0_3 = arith.constant 0 : index
    %c0_4 = arith.constant 0 : index
    %3 = vector.load %arg3[%c0_3, %c0_4] : memref<1x256xf32, #tpu.memory_space<vmem>>, vector<1x256xf32>
    %4 = vector.broadcast %3 : vector<1x256xf32> to vector<64x256xf32>
    %5 = arith.addf %2, %4 : vector<64x256xf32>
    %6 = math.sin %5 : vector<64x256xf32>
    %c0_5 = arith.constant 0 : index
    %c0_6 = arith.constant 0 : index
    %7 = vector.load %arg4[%c0_5, %c0_6] : memref<64x256xf32, #tpu.memory_space<vmem>>, vector<64x256xf32>
    tpu.vector_store %arg4[%c0_5, %c0_6], %6 {strides = array<i32>} : memref<64x256xf32, #tpu.memory_space<vmem>>, vector<64x256xf32>,
    return
  }
  func.func @transform_0(%arg0: i32) -> (i32, i32) {
    %c0_i32 = arith.constant 0 : i32
    %c0_i32_0 = arith.constant 0 : i32
    return %arg0, %c0_i32 : i32, i32
  }
  func.func @transform_1(%arg0: i32) -> (i32, i32) {
    %c0_i32 = arith.constant 0 : i32
    %c0_i32_0 = arith.constant 0 : i32
    %c0_i32_1 = arith.constant 0 : i32
    return %c0_i32, %c0_i32_0 : i32, i32
  }
  func.func @transform_2(%arg0: i32) -> (i32, i32) {
    %c0_i32 = arith.constant 0 : i32
    %c0_i32_0 = arith.constant 0 : i32
    %c0_i32_1 = arith.constant 0 : i32
    return %c0_i32, %c0_i32_0 : i32, i32
  }
  func.func @transform_3(%arg0: i32) -> (i32, i32) {
    %c0_i32 = arith.constant 0 : i32
    %c0_i32_0 = arith.constant 0 : i32
    return %arg0, %c0_i32 : i32, i32
  }
}

</mosaic_0001>

<bundles_post_ra>
// kernel: tpu_custom_call.1
= control target key start
LH: loop header
LB: loop body
LE: loop exit
PB: predicated region body
PF: predicated region fallthrough
CT: control target
= control target key end

     0   :  { %8 = vsyncpa [#allocation3], 0  ;;  %s5041_s0 = inlined_call_operand.vmem [shape: f32[128,8], index: 0, kind: input, shape index: {}]   ;;  %s5042_s1 = inlined_call_operand.vmem [shape: f32[8,256], index: 1, kind: input, shape index: {}]   ;;  %s5043_s2 = inlined_call_operand.vmem [shape: f32[1,256], index: 2, kind: input, shape index: {}]   ;;  %s5044_s3 = inlined_call_operand.hbm [shape: f32[128,256], index: 3, kind: output, shape index: {}]  }
   0x1   :  { %10 = vsyncpa [#allocation3 + $0x1], 0  ;;  %s3092_s12 = smov 0   ;;  %s3094_s13 = smov 0  }
   0x2   :  { %s3096_s14 = smov 0   ;;  %s3098_s15 = smov 0  }
   0x3 LB: > { %s3113_s16 = sadd.s32 4294967295, %s3061_s15   ;;  %s2870_s17 = sadd.s32 4294967294, %s3061_s15   ;;  %s3061_s15 = sphi %s3098_s15, %s5076_s15   ;;  %s3057_s14 = sphi %s3096_s14, %s5075_s14   ;;  %s3053_s13 = sphi %s3094_s13, %s5074_s13   ;;  %s3049_s12 = sphi %s3092_s12, %s5073_s12  }
   0x4   : > { %s3117_s18 = sadd.s32 1, %s3061_s15   ;;  %s91_s19 = sadd.s32 1, %s3057_s14 }
   0x5   : > { %s88_s20 = ssub.s32 %s3061_s15, %s3117_s18  ;;  %p101_p0 = scmp.ne.s32.totalorder %s3057_s14, %s3053_s13 }
   0x6   : > { %p89_p1 = scmp.eq.s32.totalorder %s88_s20, 0  ;;  %p102_p2 = scmp.eq.s32.totalorder %s3113_s16, 1 }
   0x7   : > { %p107_p3 = scmp.ne.s32.totalorder %s3053_s13, %s3049_s12  ;;  %p108_p4 = scmp.eq.s32.totalorder %s2870_s17, 1 }
   0x8   : > { %s3128_s21 = scalar_select %p89_p1, %s3057_s14, %s91_s19  }
   0x9   : > { %p3130_p5 = por %p102_p2, %p101_p0  ;;  %p3134_p6 = por %p108_p4, %p107_p3 }
   0xa   : > { %p2873_p7 = scmp.ge.s32.totalorder %s3061_s15, 1  ;;  %p141_p8 = scmp.lt.s32.totalorder %s3061_s15, 3 }
   0xc   : > { %p142_p9 = pnand %p2873_p7, %p141_p8 }
   0xd   : > { %s2875_s24 = sshll.u32 (!%p142_p9), %s3113_s16, 3  ;;  %s162_s8 = sand.u32 (!%p142_p9), 1, %s3053_s13  }
   0xe   : > { %145 = sbr.rel (%p142_p9) target bundleno = 795 (0x31b), region = 32  ;;  %p166_p10 = scmp.lt.s32.totalorder (!%p142_p9), %s2875_s24, 15 }
   0xf   : > { %s2874_s9 = sshll.u32 (!%p142_p9), %s162_s8, 7  ;;  %s2948_s11 = sshll.u32 (!%p142_p9), %s3113_s16, 7 }
  0x10   : > { %s3480_s10 = scalar_lea.vmem (!%p142_p9), [#allocation2], %s2874_s9  ;;  %s2804_s20 = scalar_lea.hbm (!%p142_p9), %s5044_s3, %s2948_s11 }
  0x11   : > { %s2807_s25 = sshll.u32 (!%p142_p9), %s2804_s20, 4  ;;  %s2792_s16 = scalar_lea.sflag (!%p142_p9), [#allocation3], %s162_s8  ;;  %s2808_s25 = int_to_ptr.hbm [resolvable:$true] %s2807_s25 }
  0x12   : > { %s3013_s26 = sshra.s32 (!%p142_p9), %s2808_s25, 4  ;;  %s3019_s30 = scalar_lea.hbm (!%p142_p9), %s5044_s3, 256  ;;  %s3014_s26 = int_to_ptr.hbm [resolvable:$true] %s3013_s26 }
  0x13   : > { %v180_v0 = vld [vmem:[%s5042_s1] sm:$0xff]  ;;  %v181_v1 = vld [vmem:[%s5042_s1 + $0x8] sm:$0xff]  ;;  %s5078_s24 = smov (!%p166_p10, %s2875_s24), 15  ;;  %vm188_vm0 = vcmask 64512   ;;  %v3063_v35 = vmov 683565275   ;;  %p3020_p0 = scmp.lt.s32.totalorder %s3014_s26, %s5044_s3 }
  0x14   : > { %228 = vmatpush.msra.mxu0 %v180_v0  ;;  %2949 = vmatpush.msra.mxu2 %v180_v0  ;;  %s2876_s29 = sshll.u32 %s5078_s24, 3  ;;  %v182_v10 = vld [vmem:[%s5043_s2] sm:$0x3]  ;;  %v3064_v37 = vmov 2475754826   ;;  %s2805_s24 = sshll.u32 %s3480_s10, 4  ;;  %s2806_s24 = int_to_ptr.vmem [resolvable:$true] %s2805_s24 }
  0x15   : > { %269 = vmatpush.msra.mxu1 %v181_v1  ;;  %2950 = vmatpush.msra.mxu3 %v181_v1  ;;  %s169_s5 = scalar_lea.vmem %s5041_s0, %s2876_s29  ;;  %v3169_v11 = vperm.slane %v182_v10, 0  ;;  %v3171_v12 = vperm.slane %v182_v10, 1  ;;  %v3065_v39 = vmov 2131351028   ;;  %v3066_v41 = vmov 2102212464  }
  0x16   : > { %v172_v2 = vld [vmem:[%s169_s5] sm:$0xff]  ;;  %v173_v4 = vld [vmem:[%s169_s5 + $0x8] sm:$0xff]  ;;  %v174_v6 = vld [vmem:[%s169_s5 + $0x10] sm:$0xff]  ;;  %v3067_v43 = vmov 920167782   ;;  %s3015_s27 = scalar_lea.hbm %s3014_s26, 128 }
  0x17   : > { %v176_v3 = vld [vmem:[%s169_s5 + $0x20] sm:$0xff]  ;;  %2877 = vmatmul.msk.f32.vlgmr.msra.gmra.mxu0 %vm188_vm0, %v172_v2  ;;  %2885 = vmatmul.msk.f32.vlgmr.msra.gmra.mxu1 %vm188_vm0, %v172_v2  ;;  %v177_v5 = vld [vmem:[%s169_s5 + $0x28] sm:$0xff]  ;;  %v178_v7 = vld [vmem:[%s169_s5 + $0x30] sm:$0xff]  ;;  %v3068_v51 = vmov 1326507024   ;;  %p3016_p11 = scmp.ne.s32.totalorder %s3014_s26, %s3015_s27  ;;  %p3021_p1 = scmp.lt.s32.totalorder %s3019_s30, %s3015_s27 }
  0x18   : > { %2881 = vmatmul.msk.f32.vlgmr.msra.gmra.mxu2 %vm188_vm0, %v176_v3  ;;  %2889 = vmatmul.msk.f32.vlgmr.msra.gmra.mxu3 %vm188_vm0, %v176_v3  ;;  %v175_v8 = vld [vmem:[%s169_s5 + $0x18] sm:$0xff] }
  0x19   : > { %v179_v9 = vld [vmem:[%s169_s5 + $0x38] sm:$0xff]  ;;  %p3017_p12 = pnand %p3016_p11, %p3130_p5  ;;  %p3022_p2 = por %p3021_p1, %p3020_p0 }
  0x1b   : > { %p3018_p13 = pneg %p3017_p12 }
  0x1d   : > { %p3023_p3 = pnand %p3022_p2, %p3018_p13 }
  0x1f   : > { %2878 = vmatmul.msk.f32.gmra.mxu0 %vm188_vm0, %v173_v4  ;;  %2886 = vmatmul.msk.f32.gmra.mxu1 %vm188_vm0, %v173_v4 }
  0x20   : > { %2882 = vmatmul.msk.f32.gmra.mxu2 %vm188_vm0, %v177_v5  ;;  %2890 = vmatmul.msk.f32.gmra.mxu3 %vm188_vm0, %v177_v5 }
  0x27   : > { %2879 = vmatmul.msk.f32.gmra.mxu0 %vm188_vm0, %v174_v6  ;;  %2887 = vmatmul.msk.f32.gmra.mxu1 %vm188_vm0, %v174_v6 }
  0x28   : > { %2883 = vmatmul.msk.f32.gmra.mxu2 %vm188_vm0, %v178_v7  ;;  %2891 = vmatmul.msk.f32.gmra.mxu3 %vm188_vm0, %v178_v7 }
  0x2f   : > { %2880 = vmatmul.msk.f32.gmra.mxu0 %vm188_vm0, %v175_v8  ;;  %2888 = vmatmul.msk.f32.gmra.mxu1 %vm188_vm0, %v175_v8 }
  0x30   : > { %2884 = vmatmul.msk.f32.gmra.mxu2 %vm188_vm0, %v179_v9  ;;  %2892 = vmatmul.msk.f32.gmra.mxu3 %vm188_vm0, %v179_v9 }
  0x94   : > { %v230_v13 = vpop.f32.mrf.mxu0  ;;  %v271_v14 = vpop.f32.mrf.mxu1 }
  0x95   : > { %v3174_v15 = vadd.f32 %v230_v13, %v3169_v11  ;;  %v3177_v16 = vadd.f32 %v271_v14, %v3171_v12 }
  0x97   : > { %v298_v17 = vand.u32 2139095040, %v3174_v15  ;;  %v453_v18 = vand.u32 2139095040, %v3177_v16  ;;  %v295_v21 = vand.u32 2147483647, %v3174_v15  ;;  %v450_v25 = vand.u32 2147483647, %v3177_v16 }
  0x98   : > { %vm297_vm0 = vcmp.lt.s32.totalorder %v3174_v15, 0 }
  0x99   : > { %v299_v19 = vshrl.u32 %v298_v17, 23  ;;  %v454_v20 = vshrl.u32 %v453_v18, 23  ;;  %v302_v27 = vand.u32 8388607, %v295_v21  ;;  %v457_v30 = vand.u32 8388607, %v450_v25 }
  0x9b   : > { %v2893_v22 = vadd.s32 4294967169, %v299_v19  ;;  %v2896_v23 = vadd.s32 4294967169, %v454_v20  ;;  %v303_v32 = vor.u32 8388608, %v302_v27  ;;  %v458_v46 = vor.u32 8388608, %v457_v30 }
  0x9c   : > { %v233_v59 = vpop.f32.mrf.mxu0 }
  0x9d   : > { %v305_v24 = vadd.s32 1, %v2893_v22  ;;  %v460_v26 = vadd.s32 1, %v2896_v23  ;;  %v3203_v54 = vshll.u32 %v303_v32, 8  ;;  %v3211_v63 = vshll.u32 %v458_v46, 8 }
  0x9e   : > { %v3219_v3 = vadd.f32 %v233_v59, %v3169_v11 }
  0x9f   : > { %vm306_vm1 = vcmp.gt.s32.totalorder %v305_v24, 0  ;;  %vm461_vm2 = vcmp.gt.s32.totalorder %v460_v26, 0  ;;  %v344_v6 = vand.u32 65535, %v3203_v54  ;;  %v345_v9 = vshrl.u32 %v3203_v54, 16 }
  0xa0   : > { %v307_v28 = vsel %vm306_vm1, %v305_v24, 0  ;;  %v462_v31 = vsel %vm461_vm2, %v460_v26, 0  ;;  %v3235_v23 = vand.u32 65535, %v3211_v63 }
  0xa1   : > { %v309_v29 = vand.u32 31, %v307_v28  ;;  %v3187_v33 = vshrl.u32 %v307_v28, 5  ;;  %v3195_v47 = vand.u32 31, %v462_v31  ;;  %v3241_v28 = vshrl.u32 %v462_v31, 5 }
  0xa3   : > { %v310_v34 = vsub.s32 32, %v309_v29  ;;  %v312_v36 = vshll.u32 %v3063_v35, %v309_v29  ;;  %v315_v38 = vshll.u32 %v3064_v37, %v309_v29  ;;  %v318_v40 = vshll.u32 %v3065_v39, %v309_v29 }
  0xa4   : > { %v321_v42 = vshll.u32 %v3066_v41, %v309_v29  ;;  %v324_v44 = vshll.u32 %v3067_v43, %v309_v29  ;;  %vm327_vm3 = vcmp.lt.s32.totalorder %v3187_v33, 1  ;;  %vm329_vm4 = vcmp.lt.s32.totalorder %v3187_v33, 3 }
  0xa5   : > { %v313_v45 = vshrl.u32 %v3064_v37, %v310_v34  ;;  %v316_v48 = vshrl.u32 %v3065_v39, %v310_v34  ;;  %v319_v49 = vshrl.u32 %v3066_v41, %v310_v34  ;;  %v322_v50 = vshrl.u32 %v3067_v43, %v310_v34 }
  0xa6   : > { %v325_v52 = vshrl.u32 %v3068_v51, %v310_v34  ;;  %vm330_vm5 = vcmp.lt.s32.totalorder %v3187_v33, 4  ;;  %v3209_v62 = vsub.s32 32, %v3195_v47  ;;  %vm328_vm6 = vcmp.lt.s32.totalorder %v3187_v33, 2 }
  0xa7   : > { %v314_v53 = vor.u32 %v313_v45, %v312_v36  ;;  %v317_v55 = vor.u32 %v316_v48, %v315_v38  ;;  %v320_v56 = vor.u32 %v319_v49, %v318_v40  ;;  %v323_v57 = vor.u32 %v322_v50, %v321_v42 }
  0xa8   : > { %v326_v58 = vor.u32 %v325_v52, %v324_v44  ;;  %v311_v4 = vshrl.u32 %v3063_v35, %v310_v34  ;;  %v467_v17 = vshll.u32 %v3063_v35, %v3195_v47  ;;  %v468_v18 = vshrl.u32 %v3064_v37, %v3209_v62 }
  0xa9   : > { %v335_v60 = vsel %vm327_vm3, %v314_v53, %v317_v55  ;;  %v336_v61 = vsel %vm330_vm5, %v323_v57, 920167782  ;;  %v339_v1 = vsel %vm327_vm3, %v317_v55, %v320_v56  ;;  %v332_v7 = vsel %vm330_vm5, %v320_v56, 2102212464 }
  0xaa   : > { %v337_v0 = vsel %vm329_vm4, %v320_v56, %v336_v61  ;;  %v340_v2 = vsel %vm330_vm5, %v326_v58, 1326507024  ;;  %v331_v24 = vsel %vm327_vm3, %v311_v4, %v314_v53  ;;  %v333_v26 = vsel %vm329_vm4, %v317_v55, %v332_v7 }
  0xab   : > { %v338_v5 = vsel %vm328_vm6, %v335_v60, %v337_v0  ;;  %v341_v8 = vsel %vm329_vm4, %v323_v57, %v340_v2  ;;  %v3243_v40 = vor.u32 %v468_v18, %v467_v17  ;;  %v470_v42 = vshll.u32 %v3064_v37, %v3195_v47 }
  0xac   : > { %v368_v10 = vand.u32 65535, %v338_v5  ;;  %v342_v13 = vsel %vm328_vm6, %v339_v1, %v341_v8  ;;  %v369_v14 = vshrl.u32 %v338_v5, 16  ;;  %v3069_v53 = vmov 0  }
  0xad   : > { %v346_v19 = vand.u32 65535, %v342_v13  ;;  %v347_v20 = vshrl.u32 %v342_v13, 16  ;;  %v471_v56 = vshrl.u32 %v3065_v39, %v3209_v62  ;;  %v473_v4 = vshll.u32 %v3065_v39, %v3195_v47 }
  0xae   : > { %v372_v22 = vmul.u32 %v368_v10, %v345_v9  ;;  %v371_v27 = vmul.u32 %v369_v14, %v344_v6  ;;  %v370_v32 = vmul.u32 %v368_v10, %v344_v6  ;;  %v373_v34 = vmul.u32 %v369_v14, %v345_v9 }
  0xaf   : > { %v349_v29 = vmul.u32 %v347_v20, %v344_v6  ;;  %v350_v30 = vmul.u32 %v346_v19, %v345_v9  ;;  %v348_v36 = vmul.u32 %v346_v19, %v344_v6  ;;  %v351_v44 = vmul.u32 %v347_v20, %v345_v9 }
  0xb0   : > { %v374_v38 = vshll.u32 %v371_v27, 16  ;;  %v375_v46 = vshrl.u32 %v371_v27, 16  ;;  %v376_v48 = vshll.u32 %v372_v22, 16  ;;  %v377_v50 = vshrl.u32 %v372_v22, 16 }
  0xb1   : > { %v352_v45 = vshll.u32 %v349_v29, 16  ;;  %v354_v49 = vshll.u32 %v350_v30, 16  ;;  %v353_v57 = vshrl.u32 %v349_v29, 16  ;;  %v3252_v0 = vor.u32 %v471_v56, %v470_v42 }
  0xb2   : > { %vm378_vm7 = vc.u32 %v370_v32, %v374_v38  ;;  %v380_v31 = vadd.s32 %v374_v38, %v370_v32  ;;  %v474_v5 = vshrl.u32 %v3066_v41, %v3209_v62  ;;  %v476_v7 = vshll.u32 %v3066_v41, %v3195_v47 }
  0xb3   : > { %vm356_vm8 = vc.u32 %v348_v36, %v352_v45  ;;  %v358_v52 = vadd.s32 %v352_v45, %v348_v36  ;;  %v379_v55 = vsel %vm378_vm7, 1, %v3069_v53  ;;  %v477_v8 = vshrl.u32 %v3067_v43, %v3209_v62 }
  0xb4   : > { %v357_v58 = vsel %vm356_vm8, 1, %v3069_v53  ;;  %v381_v59 = vadd.s32 %v379_v55, %v373_v34  ;;  %vm382_vm9 = vc.u32 %v380_v31, %v376_v48  ;;  %v479_v9 = vshll.u32 %v3067_v43, %v3195_v47 }
  0xb5   : > { %v359_v60 = vadd.s32 %v357_v58, %v351_v44  ;;  %vm360_vm10 = vc.u32 %v358_v52, %v354_v49  ;;  %v383_v61 = vsel %vm382_vm9, 1, %v3069_v53  ;;  %v475_v13 = vor.u32 %v474_v5, %v473_v4 }
  0xb6   : > { %v361_v1 = vsel %vm360_vm10, 1, %v3069_v53  ;;  %v385_v2 = vadd.s32 %v383_v61, %v381_v59  ;;  %v480_v14 = vshrl.u32 %v3068_v51, %v3209_v62  ;;  %vm482_vm11 = vcmp.lt.s32.totalorder %v3241_v28, 1 }
  0xb7   : > { %v363_v6 = vadd.s32 %v361_v1, %v359_v60  ;;  %v355_v17 = vshrl.u32 %v350_v30, 16  ;;  %v478_v19 = vor.u32 %v477_v8, %v476_v7  ;;  %vm484_vm12 = vcmp.lt.s32.totalorder %v3241_v28, 3 }
  0xb8   : > { %v386_v10 = vadd.s32 %v385_v2, %v375_v46  ;;  %v334_v20 = vsel %vm328_vm6, %v331_v24, %v333_v26  ;;  %v481_v27 = vor.u32 %v480_v14, %v479_v9  ;;  %vm485_vm13 = vcmp.lt.s32.totalorder %v3241_v28, 4 }
  0xb9   : > { %v364_v18 = vadd.s32 %v363_v6, %v353_v57  ;;  %v3274_v29 = vadd.s32 %v380_v31, %v376_v48  ;;  %v490_v30 = vsel %vm482_vm11, %v3243_v40, %v3252_v0  ;;  %v491_v32 = vsel %vm485_vm13, %v478_v19, 920167782 }
  0xba   : > { %v387_v22 = vadd.s32 %v386_v10, %v377_v50  ;;  %vm483_vm14 = vcmp.lt.s32.totalorder %v3241_v28, 2  ;;  %v492_v33 = vsel %vm484_vm12, %v475_v13, %v491_v32  ;;  %v500_v24 = vshrl.u32 %v3211_v63, 16 }
  0xbb   : > { %v3272_v47 = vadd.s32 %v364_v18, %v355_v17  ;;  %v388_v26 = vmul.u32 %v3203_v54, %v334_v20  ;;  %v493_v36 = vsel %vm483_vm14, %v490_v30, %v492_v33  ;;  %v494_v38 = vsel %vm482_vm11, %v3252_v0, %v475_v13 }
  0xbc   : > { %v391_v34 = vadd.s32 1, %v387_v22  ;;  %v495_v44 = vsel %vm485_vm13, %v481_v27, 1326507024  ;;  %v523_v45 = vand.u32 65535, %v493_v36  ;;  %v524_v46 = vshrl.u32 %v493_v36, 16 }
  0xbd   : > { %vm390_vm15 = vc.u32 %v3272_v47, %v3274_v29  ;;  %v466_v54 = vshrl.u32 %v3063_v35, %v3209_v62  ;;  %v496_v49 = vsel %vm484_vm12, %v478_v19, %v495_v44  ;;  %v608_v50 = vand.u32 2139095040, %v3219_v3 }
  0xbe   : > { %v392_v42 = vsel %vm390_vm15, %v391_v34, %v387_v22  ;;  %v497_v31 = vsel %vm483_vm14, %v494_v38, %v496_v49  ;;  %v526_v52 = vmul.u32 %v524_v46, %v3235_v23  ;;  %v3304_v55 = vmul.u32 %v523_v45, %v500_v24 }
  0xbf   : > { %v393_v48 = vadd.s32 %v392_v42, %v388_v26  ;;  %v501_v57 = vand.u32 65535, %v497_v31  ;;  %v502_v58 = vshrl.u32 %v497_v31, 16  ;;  %v525_v59 = vmul.u32 %v523_v45, %v3235_v23 }
  0xc0   : > { %v529_v60 = vshll.u32 %v526_v52, 16  ;;  %v605_v62 = vand.u32 2147483647, %v3219_v3  ;;  %v486_v1 = vsel %vm482_vm11, %v466_v54, %v3243_v40  ;;  %v609_v4 = vshrl.u32 %v608_v50, 23 }
  0xc1   : > { %v394_v56 = vadd.s32 536870912, %v393_v48  ;;  %v504_v2 = vmul.u32 %v502_v58, %v3235_v23  ;;  %v505_v5 = vmul.u32 %v501_v57, %v500_v24  ;;  %v531_v6 = vshll.u32 %v3304_v55, 16 }
  0xc2   : > { %vm533_vm1 = vc.u32 %v525_v59, %v529_v60  ;;  %v535_v7 = vadd.s32 %v529_v60, %v525_v59  ;;  %v487_v9 = vsel %vm485_vm13, %v475_v13, 2102212464  ;;  %v503_v10 = vmul.u32 %v501_v57, %v3235_v23 }
  0xc3   : > { %v395_v61 = vshrl.u32 %v394_v56, 30  ;;  %v507_v14 = vshll.u32 %v504_v2, 16  ;;  %v506_v17 = vmul.u32 %v502_v58, %v500_v24  ;;  %v528_v18 = vmul.u32 %v524_v46, %v500_v24 }
  0xc4   : > { %v534_v40 = vsel %vm533_vm1, 1, %v3069_v53  ;;  %vm537_vm2 = vc.u32 %v535_v7, %v531_v6  ;;  %v2899_v22 = vadd.s32 4294967169, %v609_v4  ;;  %v509_v27 = vshll.u32 %v505_v5, 16 }
  0xc5   : > { %v396_v8 = vshll.u32 %v395_v61, 30  ;;  %vm511_vm3 = vc.u32 %v503_v10, %v507_v14  ;;  %v513_v20 = vadd.s32 %v507_v14, %v503_v10  ;;  %v536_v32 = vadd.s32 %v534_v40, %v528_v18 }
  0xc6   : > { %v512_v30 = vsel %vm511_vm3, 1, %v3069_v53  ;;  %v538_v34 = vsel %vm537_vm2, 1, %v3069_v53  ;;  %v419_v33 = vsub.s32 4, %v395_v61  ;;  %v488_v24 = vsel %vm484_vm12, %v3252_v0, %v487_v9 }
  0xc7   : > { %v397_v19 = vsub.s32 %v393_v48, %v396_v8  ;;  %v514_v23 = vadd.s32 %v512_v30, %v506_v17  ;;  %vm515_vm5 = vc.u32 %v513_v20, %v509_v27  ;;  %v530_v26 = vshrl.u32 %v526_v52, 16 }
  0xc8   : > { %v540_v36 = vadd.s32 %v538_v34, %v536_v32  ;;  %v516_v42 = vsel %vm515_vm5, 1, %v3069_v53  ;;  %v532_v44 = vshrl.u32 %v3304_v55, 16  ;;  %v615_v45 = vadd.s32 1, %v2899_v22 }
  0xc9   : > { %vm398_vm4 = vcmp.lt.s32.totalorder %v397_v19, 0  ;;  %v399_v13 = vsub.s32 0, %v397_v19  ;;  %v508_v48 = vshrl.u32 %v504_v2, 16  ;;  %v518_v54 = vadd.s32 %v516_v42, %v514_v23 }
  0xca   : > { %v541_v49 = vadd.s32 %v540_v36, %v530_v26  ;;  %v420_v50 = vsel %vm297_vm0, %v419_v33, %v395_v61  ;;  %v489_v31 = vsel %vm483_vm14, %v486_v1, %v488_v24  ;;  %v510_v0 = vshrl.u32 %v505_v5, 16 }
  0xcb   : > { %v400_v38 = vsel %vm398_vm4, %v399_v13, %v397_v19  ;;  %vm616_vm6 = vcmp.gt.s32.totalorder %v615_v45, 0  ;;  %v519_v56 = vadd.s32 %v518_v54, %v508_v48  ;;  %vm3331_vm7 = vcmp.le.f32.partialorder %v295_v21, 0.7853982 }
  0xcc   : > { %v401_v46 = vclz %v400_v38  ;;  %v542_v57 = vadd.s32 %v541_v49, %v532_v44  ;;  %v617_v58 = vsel %vm616_vm6, %v615_v45, 0  ;;  %v389_v59 = vadd.s32 %v3274_v29, %v3272_v47  ;;  %v274_v44 = vpop.f32.mrf.mxu1 }
  0xcd   : > { %v619_v60 = vand.u32 31, %v617_v58  ;;  %v3337_v61 = vadd.s32 %v519_v56, %v510_v0  ;;  %v543_v28 = vmul.u32 %v3211_v63, %v489_v31  ;;  %v422_v4 = vsel %vm3331_vm7, 0, %v420_v50 }
  0xce   : > { %v2894_v52 = vadd.s32 4294967294, %v401_v46  ;;  %v546_v1 = vadd.s32 1, %v542_v57  ;;  %v3342_v5 = vadd.s32 %v535_v7, %v531_v6  ;;  %v612_v10 = vand.u32 8388607, %v605_v62 }
  0xcf   : > { %v620_v21 = vsub.s32 32, %v619_v60  ;;  %v622_v47 = vshll.u32 %v3063_v35, %v619_v60  ;;  %v625_v14 = vshll.u32 %v3064_v37, %v619_v60  ;;  %v3352_v20 = vshrl.u32 %v617_v58, 5 }
  0xd0   : > { %vm2895_vm8 = vcmp.lt.s32.totalorder %v2894_v52, 0  ;;  %vm545_vm9 = vc.u32 %v3337_v61, %v3342_v5  ;;  %v628_v22 = vshll.u32 %v3065_v39, %v619_v60  ;;  %v631_v32 = vshll.u32 %v3066_v41, %v619_v60 }
  0xd1   : > { %v404_v2 = vsel %vm2895_vm8, 0, %v2894_v52  ;;  %v623_v63 = vshrl.u32 %v3064_v37, %v620_v21  ;;  %v547_v6 = vsel %vm545_vm9, %v546_v1, %v542_v57  ;;  %v626_v7 = vshrl.u32 %v3065_v39, %v620_v21  ;;  %v236_v57 = vpop.f32.mrf.mxu0 }
  0xd2   : > { %v405_v8 = vsub.s32 32, %v404_v2  ;;  %v409_v9 = vsub.s32 4294967266, %v404_v2  ;;  %v406_v29 = vshll.u32 %v397_v19, %v404_v2  ;;  %v548_v40 = vadd.s32 %v547_v6, %v543_v28 }
  0xd3   : > { %v629_v27 = vshrl.u32 %v3066_v41, %v620_v21  ;;  %v632_v34 = vshrl.u32 %v3067_v43, %v620_v21  ;;  %v613_v33 = vor.u32 8388608, %v612_v10  ;;  %v634_v23 = vshll.u32 %v3067_v43, %v619_v60 }
  0xd4   : > { %v407_v17 = vshrl.u32 %v389_v59, %v405_v8  ;;  %v410_v18 = vadd.s32 127, %v409_v9  ;;  %v549_v13 = vadd.s32 536870912, %v548_v40  ;;  %v635_v24 = vshrl.u32 %v3068_v51, %v620_v21 }
  0xd5   : > { %v624_v36 = vor.u32 %v623_v63, %v622_v47  ;;  %v3360_v38 = vor.u32 %v626_v7, %v625_v14  ;;  %v633_v42 = vor.u32 %v632_v34, %v631_v32  ;;  %v630_v48 = vor.u32 %v629_v27, %v628_v22 }
  0xd6   : > { %v408_v19 = vor.u32 %v407_v17, %v406_v29  ;;  %v411_v30 = vshll.u32 %v410_v18, 23  ;;  %v3362_v46 = vshrl.u32 %v549_v13, 30  ;;  %vm637_vm10 = vcmp.lt.s32.totalorder %v3352_v20, 1 }
  0xd7   : > { %v636_v49 = vor.u32 %v635_v24, %v634_v23  ;;  %vm639_vm11 = vcmp.lt.s32.totalorder %v3352_v20, 3  ;;  %vm640_vm12 = vcmp.lt.s32.totalorder %v3352_v20, 4  ;;  %v3371_v0 = vadd.f32 %v274_v44, %v3171_v12 }
  0xd8   : > { %v412_v26 = vor.u32 4788187, %v411_v30  ;;  %v415_v45 = vcvt.s32.f32 %v408_v19  ;;  %v551_v50 = vshll.u32 %v3362_v46, 30  ;;  %v646_v31 = vsel %vm640_vm12, %v633_v42, 920167782 }
  0xd9   : > { %v439_v56 = vadd.s32 3, %v422_v4  ;;  %v645_v59 = vsel %vm637_vm10, %v624_v36, %v3360_v38  ;;  %v647_v60 = vsel %vm639_vm11, %v630_v48, %v646_v31  ;;  %v649_v28 = vsel %vm637_vm10, %v3360_v38, %v630_v48 }
  0xda   : > { %v413_v54 = vand.u32 2147483647, %v412_v26  ;;  %v3373_v58 = vsub.s32 %v548_v40, %v551_v50  ;;  %v621_v2 = vshrl.u32 %v3063_v35, %v620_v21  ;;  %v650_v4 = vsel %vm640_vm12, %v636_v49, 1326507024 }
  0xdb   : > { %v3386_v8 = vshll.u32 %v613_v33, 8  ;;  %vm638_vm14 = vcmp.lt.s32.totalorder %v3352_v20, 2  ;;  %v651_v10 = vsel %vm639_vm11, %v633_v42, %v650_v4  ;;  %v3394_v47 = vadd.f32 %v236_v57, %v3169_v11 }
  0xdc   : > { %v416_v52 = vmul.f32 %v415_v45, %v413_v54  ;;  %vm553_vm13 = vcmp.lt.s32.totalorder %v3373_v58, 0  ;;  %v554_v9 = vsub.s32 0, %v3373_v58  ;;  %v3400_v29 = vsel %vm638_vm14, %v645_v59, %v647_v60 }
  0xdd   : > { %v652_v63 = vsel %vm638_vm14, %v649_v28, %v651_v10  ;;  %v3409_v17 = vand.u32 3, %v439_v56  ;;  %v654_v22 = vand.u32 65535, %v3386_v8  ;;  %v544_v19 = vadd.s32 %v3342_v5, %v3337_v61 }
  0xde   : > { %v417_v1 = vxor.u32 2147483648, %v416_v52  ;;  %v555_v18 = vsel %vm553_vm13, %v554_v9, %v3373_v58  ;;  %v656_v6 = vand.u32 65535, %v652_v63  ;;  %v657_v27 = vshrl.u32 %v652_v63, 16 }
  0xdf   : > { %v556_v40 = vclz %v555_v18  ;;  %v3419_v55 = vsel %vm637_vm10, %v621_v2, %v624_v36  ;;  %v655_v30 = vshrl.u32 %v3386_v8, 16  ;;  %v679_v32 = vshrl.u32 %v3400_v29, 16 }
  0xe0   : > { %v418_v21 = vsel %vm297_vm0, %v417_v1, %v416_v52  ;;  %v659_v23 = vmul.u32 %v657_v27, %v654_v22  ;;  %v574_v24 = vsub.s32 4, %v3362_v46  ;;  %v642_v26 = vsel %vm640_vm12, %v630_v48, 2102212464 }
  0xe1   : > { %v3407_v14 = vsel %vm3331_vm7, %v3174_v15, %v418_v21  ;;  %v2897_v33 = vadd.s32 4294967294, %v556_v40  ;;  %v3426_v42 = vmul.u32 %v656_v6, %v655_v30  ;;  %v678_v61 = vand.u32 65535, %v3400_v29 }
  0xe2   : > { %v423_v7 = vmul.f32 %v3407_v14, %v3407_v14  ;;  %v662_v44 = vshll.u32 %v659_v23, 16  ;;  %v658_v54 = vmul.u32 %v656_v6, %v654_v22  ;;  %v661_v49 = vmul.u32 %v657_v27, %v655_v30 }
  0xe3   : > { %vm2898_vm15 = vcmp.lt.s32.totalorder %v2897_v33, 0  ;;  %v3429_v50 = vmul.u32 %v679_v32, %v654_v22  ;;  %v664_v57 = vshll.u32 %v3426_v42, 16  ;;  %vm452_vm0 = vcmp.lt.s32.totalorder %v3177_v16, 0 }
  0xe4   : > { %v424_v34 = vmul.f32 -0.001358992, %v423_v7  ;;  %v431_v13 = vmul.f32 -0.00019511016, %v423_v7  ;;  %v559_v45 = vsel %vm2898_vm15, 0, %v2897_v33  ;;  %vm666_vm1 = vc.u32 %v658_v54, %v662_v44 }
  0xe5   : > { %v560_v56 = vsub.s32 32, %v559_v45  ;;  %v561_v48 = vshll.u32 %v3373_v58, %v559_v45  ;;  %v564_v59 = vsub.s32 4294967266, %v559_v45  ;;  %v668_v60 = vadd.s32 %v662_v44, %v658_v54 }
  0xe6   : > { %v425_v5 = vadd.f32 0.041655596, %v424_v34  ;;  %v432_v36 = vadd.f32 0.008332121, %v431_v13  ;;  %v667_v4 = vsel %vm666_vm1, 1, %v3069_v53  ;;  %vm442_vm2 = vcmp.eq.s32.totalorder %v3409_v17, 0 }
  0xe7   : > { %v562_v2 = vshrl.u32 %v544_v19, %v560_v56  ;;  %vm445_vm3 = vcmp.eq.s32.totalorder %v3409_v17, 2  ;;  %v565_v9 = vadd.s32 127, %v564_v59  ;;  %v669_v10 = vadd.s32 %v667_v4, %v661_v49 }
  0xe8   : > { %v426_v31 = vmul.f32 %v425_v5, %v423_v7  ;;  %v433_v52 = vmul.f32 %v432_v36, %v423_v7  ;;  %vm670_vm4 = vc.u32 %v668_v60, %v664_v57  ;;  %v682_v21 = vmul.u32 %v678_v61, %v655_v30 }
  0xe9   : > { %vm441_vm5 = vcmp.lt.s32.totalorder %v3409_v17, 2  ;;  %v671_v58 = vsel %vm670_vm4, 1, %v3069_v53  ;;  %v680_v18 = vmul.u32 %v678_v61, %v654_v22  ;;  %vm438_vm6 = vweird.f32 %v3174_v15 }
  0xea   : > { %v427_v28 = vadd.f32 -0.4999988, %v426_v31  ;;  %v434_v1 = vadd.f32 -0.16666654, %v433_v52  ;;  %vm3442_vm7 = vcmp.le.f32.partialorder %v450_v25, 0.7853982  ;;  %v563_v40 = vor.u32 %v562_v2, %v561_v48 }
  0xeb   : > { %v566_v27 = vshll.u32 %v565_v9, 23  ;;  %v673_v19 = vadd.s32 %v671_v58, %v669_v10  ;;  %v684_v34 = vshll.u32 %v3429_v50, 16  ;;  %v643_v22 = vsel %vm639_vm11, %v3360_v38, %v642_v26 }
  0xec   : > { %v428_v29 = vmul.f32 %v427_v28, %v423_v7  ;;  %v435_v63 = vmul.f32 %v434_v1, %v423_v7  ;;  %v663_v33 = vshrl.u32 %v659_v23, 16  ;;  %v683_v5 = vmul.u32 %v679_v32, %v655_v30 }
  0xed   : > { %v567_v61 = vor.u32 4788187, %v566_v27  ;;  %v686_v25 = vshll.u32 %v682_v21, 16  ;;  %vm688_vm8 = vc.u32 %v680_v18, %v684_v34  ;;  %v690_v54 = vadd.s32 %v684_v34, %v680_v18 }
  0xee   : > { %v429_v7 = vadd.f32 1.0, %v428_v29  ;;  %v436_v13 = vadd.f32 1.0, %v435_v63  ;;  %v689_v45 = vsel %vm688_vm8, 1, %v3069_v53  ;;  %v570_v31 = vcvt.s32.f32 %v563_v40 }
  0xef   : > { %v568_v49 = vand.u32 2147483647, %v567_v61  ;;  %v674_v52 = vadd.s32 %v673_v19, %v663_v33  ;;  %v691_v56 = vadd.s32 %v689_v45, %v683_v5  ;;  %v575_v38 = vsel %vm452_vm0, %v574_v24, %v3362_v46 }
  0xf0   : > { %v437_v36 = vmul.f32 %v436_v13, %v3407_v14  ;;  %v446_v44 = vxor.u32 2147483648, %v429_v7  ;;  %vm692_vm9 = vc.u32 %v690_v54, %v686_v25  ;;  %v760_v30 = vand.u32 2147483647, %v3371_v0 }
  0xf1   : > { %v571_v32 = vmul.f32 %v570_v31, %v568_v49  ;;  %v644_v14 = vsel %vm638_vm14, %v3419_v55, %v643_v22  ;;  %v665_v23 = vshrl.u32 %v3426_v42, 16  ;;  %v693_v26 = vsel %vm692_vm9, 1, %v3069_v53 }
  0xf2   : > { %v443_v57 = vxor.u32 2147483648, %v437_v36  ;;  %v447_v59 = vsel %vm445_vm3, %v446_v44, %v437_v36  ;;  %v685_v46 = vshrl.u32 %v3429_v50, 16  ;;  %v695_v24 = vadd.s32 %v693_v26, %v691_v56 }
  0xf3   : > { %v572_v28 = vxor.u32 2147483648, %v571_v32  ;;  %v675_v1 = vadd.s32 %v674_v52, %v665_v23  ;;  %v763_v20 = vand.u32 2139095040, %v3371_v0  ;;  %v577_v42 = vsel %vm3442_vm7, 0, %v575_v38 }
  0xf4   : > { %v444_v48 = vsel %vm442_vm2, %v429_v7, %v443_v57  ;;  %v687_v2 = vshrl.u32 %v682_v21, 16  ;;  %v696_v4 = vadd.s32 %v695_v24, %v685_v46  ;;  %v694_v50 = vadd.s32 %v690_v54, %v686_v25 }
  0xf5   : > { %v448_v60 = vsel %vm441_vm5, %v444_v48, %v447_v59  ;;  %v573_v9 = vsel %vm452_vm0, %v572_v28, %v571_v32  ;;  %v764_v10 = vshrl.u32 %v763_v20, 23  ;;  %v767_v17 = vand.u32 8388607, %v760_v30 }
  0xf6   : > { %v449_v55 = vsel %vm438_vm6, nan, %v448_v60  ;;  %v576_v15 = vsel %vm3442_vm7, %v3177_v16, %v573_v9  ;;  %v697_v29 = vadd.s32 %v696_v4, %v687_v2  ;;  %v918_v21 = vand.u32 2139095040, %v3394_v47 }
  0xf7   : > { %2775 = vst [vmem:[%s3480_s10] sm:$0xff] %v449_v55  ;;  %v578_v63 = vmul.f32 %v576_v15, %v576_v15  ;;  %vm700_vm10 = vc.u32 %v675_v1, %v694_v50  ;;  %v2902_v58 = vadd.s32 4294967169, %v764_v10  ;;  %v594_v18 = vadd.s32 3, %v577_v42 }
  0xf8   : > { %v698_v40 = vmul.u32 %v3386_v8, %v644_v14  ;;  %v701_v27 = vadd.s32 1, %v697_v29  ;;  %v768_v7 = vor.u32 8388608, %v767_v17  ;;  %v919_v33 = vshrl.u32 %v918_v21, 23 }
  0xf9   : > { %v579_v19 = vmul.f32 -0.001358992, %v578_v63  ;;  %v586_v34 = vmul.f32 -0.00019511016, %v578_v63  ;;  %v770_v13 = vadd.s32 1, %v2902_v58  ;;  %v595_v25 = vand.u32 3, %v594_v18 }
  0xfa   : > { %v702_v22 = vsel %vm700_vm10, %v701_v27, %v697_v29  ;;  %v915_v44 = vand.u32 2147483647, %v3394_v47  ;;  %v3489_v31 = vshll.u32 %v768_v7, 8  ;;  %v2905_v52 = vadd.s32 4294967169, %v919_v33 }
  0xfb   : > { %v580_v61 = vadd.f32 0.041655596, %v579_v19  ;;  %v587_v5 = vadd.f32 0.008332121, %v586_v34  ;;  %v703_v6 = vadd.s32 %v702_v22, %v698_v40  ;;  %vm771_vm11 = vcmp.gt.s32.totalorder %v770_v13, 0 }
  0xfc   : > { %v772_v36 = vsel %vm771_vm11, %v770_v13, 0  ;;  %vm597_vm12 = vcmp.eq.s32.totalorder %v595_v25, 0  ;;  %vm600_vm13 = vcmp.eq.s32.totalorder %v595_v25, 2  ;;  %v3491_v32 = vadd.s32 %v694_v50, %v675_v1 }
  0xfd   : > { %v581_v45 = vmul.f32 %v580_v61, %v578_v63  ;;  %v588_v54 = vmul.f32 %v587_v5, %v578_v63  ;;  %v704_v49 = vadd.s32 536870912, %v703_v6  ;;  %v774_v8 = vand.u32 31, %v772_v36 }
  0xfe   : > { %v3495_v23 = vand.u32 8388607, %v915_v44  ;;  %vm596_vm14 = vcmp.lt.s32.totalorder %v595_v25, 2  ;;  %v3498_v46 = vand.u32 65535, %v3489_v31  ;;  %vm593_vm15 = vweird.f32 %v3177_v16 }
  0xff   : > { %v582_v56 = vadd.f32 -0.4999988, %v581_v45  ;;  %v589_v57 = vadd.f32 -0.16666654, %v588_v54  ;;  %v705_v38 = vshrl.u32 %v704_v49, 30  ;;  %v775_v14 = vsub.s32 32, %v774_v8 }
 0x100   : > { %v3501_v24 = vshrl.u32 %v772_v36, 5  ;;  %v777_v60 = vshll.u32 %v3063_v35, %v774_v8  ;;  %v3505_v28 = vshrl.u32 %v3489_v31, 16  ;;  %v3507_v1 = vadd.s32 1, %v2905_v52 }
 0x101   : > { %v583_v26 = vmul.f32 %v582_v56, %v578_v63  ;;  %v590_v48 = vmul.f32 %v589_v57, %v578_v63  ;;  %v706_v59 = vshll.u32 %v705_v38, 30  ;;  %vm607_vm0 = vcmp.lt.s32.totalorder %v3219_v3, 0 }
 0x102   : > { %v780_v2 = vshll.u32 %v3064_v37, %v774_v8  ;;  %v778_v4 = vshrl.u32 %v3064_v37, %v775_v14  ;;  %v781_v9 = vshrl.u32 %v3065_v39, %v775_v14  ;;  %v783_v50 = vshll.u32 %v3065_v39, %v774_v8 }
 0x103   : > { %v584_v20 = vadd.f32 1.0, %v583_v26  ;;  %v591_v55 = vadd.f32 1.0, %v590_v48  ;;  %v707_v42 = vsub.s32 %v703_v6, %v706_v59  ;;  %v784_v10 = vshrl.u32 %v3066_v41, %v775_v14 }
 0x104   : > { %vm3517_vm2 = vcmp.le.f32.partialorder %v605_v62, 0.7853982  ;;  %v729_v58 = vsub.s32 4, %v705_v38  ;;  %v786_v18 = vshll.u32 %v3066_v41, %v774_v8  ;;  %v787_v40 = vshrl.u32 %v3067_v43, %v775_v14 }
 0x105   : > { %v592_v17 = vmul.f32 %v591_v55, %v576_v15  ;;  %v601_v29 = vxor.u32 2147483648, %v584_v20  ;;  %vm708_vm1 = vcmp.lt.s32.totalorder %v707_v42, 0  ;;  %v709_v21 = vsub.s32 0, %v707_v42 }
 0x106   : > { %vm792_vm3 = vcmp.lt.s32.totalorder %v3501_v24, 1  ;;  %v789_v15 = vshll.u32 %v3067_v43, %v774_v8  ;;  %v790_v34 = vshrl.u32 %v3068_v51, %v775_v14  ;;  %v779_v13 = vor.u32 %v778_v4, %v777_v60 }
 0x107   : > { %v598_v27 = vxor.u32 2147483648, %v592_v17  ;;  %v710_v19 = vsel %vm708_vm1, %v709_v21, %v707_v42  ;;  %v782_v22 = vor.u32 %v781_v9, %v780_v2  ;;  %v788_v62 = vor.u32 %v787_v40, %v786_v18 }
 0x108   : > { %v711_v7 = vclz %v710_v19  ;;  %v602_v61 = vsel %vm600_vm13, %v601_v29, %v592_v17  ;;  %v785_v5 = vor.u32 %v784_v10, %v783_v50  ;;  %vm795_vm4 = vcmp.lt.s32.totalorder %v3501_v24, 4 }
 0x109   : > { %v599_v33 = vsel %vm597_vm12, %v584_v20, %v598_v27  ;;  %vm794_vm5 = vcmp.lt.s32.totalorder %v3501_v24, 3  ;;  %v923_v45 = vor.u32 8388608, %v3495_v23  ;;  %v776_v49 = vshrl.u32 %v3063_v35, %v775_v14 }
 0x10a   : > { %v603_v6 = vsel %vm596_vm14, %v599_v33, %v602_v61  ;;  %v2900_v36 = vadd.s32 4294967294, %v711_v7  ;;  %v791_v8 = vor.u32 %v790_v34, %v789_v15  ;;  %vm926_vm6 = vcmp.gt.s32.totalorder %v3507_v1, 0 }
 0x10b   : > { %v604_v54 = vsel %vm593_vm15, nan, %v603_v6  ;;  %v730_v52 = vsel %vm607_vm0, %v729_v58, %v705_v38  ;;  %v800_v25 = vsel %vm792_vm3, %v779_v13, %v782_v22  ;;  %v801_v56 = vsel %vm795_vm4, %v788_v62, 920167782 }
 0x10c   : > { %vm2901_vm7 = vcmp.lt.s32.totalorder %v2900_v36, 0  ;;  %2776 = vst [vmem:[%s3480_s10 + $0x8] sm:$0xff] %v604_v54  ;;  %vm793_vm8 = vcmp.lt.s32.totalorder %v3501_v24, 2  ;;  %v797_v16 = vsel %vm795_vm4, %v785_v5, 2102212464  ;;  %v802_v14 = vsel %vm794_vm5, %v785_v5, %v801_v56 }
 0x10d   : > { %v714_v57 = vsel %vm2901_vm7, 0, %v2900_v36  ;;  %v803_v38 = vsel %vm793_vm8, %v800_v25, %v802_v14  ;;  %v804_v59 = vsel %vm792_vm3, %v782_v22, %v785_v5  ;;  %v732_v60 = vsel %vm3517_vm2, 0, %v730_v52 }
 0x10e   : > { %v715_v26 = vsub.s32 32, %v714_v57  ;;  %v719_v48 = vsub.s32 4294967266, %v714_v57  ;;  %v805_v20 = vsel %vm795_vm4, %v791_v8, 1326507024  ;;  %v833_v55 = vand.u32 65535, %v803_v38 }
 0x10f   : > { %v834_v2 = vshrl.u32 %v803_v38, 16  ;;  %v716_v4 = vshll.u32 %v707_v42, %v714_v57  ;;  %v806_v10 = vsel %vm794_vm5, %v788_v62, %v805_v20  ;;  %v796_v17 = vsel %vm792_vm3, %v776_v49, %v779_v13 }
 0x110   : > { %v717_v9 = vshrl.u32 %v3491_v32, %v715_v26  ;;  %v720_v50 = vadd.s32 127, %v719_v48  ;;  %v798_v29 = vsel %vm794_vm5, %v782_v22, %v797_v16  ;;  %v807_v21 = vsel %vm793_vm8, %v804_v59, %v806_v10 }
 0x111   : > { %v836_v58 = vmul.u32 %v834_v2, %v3498_v46  ;;  %v811_v42 = vand.u32 65535, %v807_v21  ;;  %v812_v27 = vshrl.u32 %v807_v21, 16  ;;  %v3566_v32 = vadd.s32 3, %v732_v60 }
 0x112   : > { %v718_v18 = vor.u32 %v717_v9, %v716_v4  ;;  %v721_v40 = vshll.u32 %v720_v50, 23  ;;  %v835_v19 = vmul.u32 %v833_v55, %v3498_v46  ;;  %v837_v15 = vmul.u32 %v833_v55, %v3505_v28 }
 0x113   : > { %v839_v34 = vshll.u32 %v836_v58, 16  ;;  %v3572_v13 = vsel %vm793_vm8, %v796_v17, %v798_v29  ;;  %v814_v22 = vmul.u32 %v812_v27, %v3498_v46  ;;  %v927_v62 = vsel %vm926_vm6, %v3507_v1, 0 }
 0x114   : > { %v722_v7 = vor.u32 4788187, %v721_v40  ;;  %v725_v33 = vcvt.s32.f32 %v718_v18  ;;  %v815_v61 = vmul.u32 %v811_v42, %v3505_v28  ;;  %v838_v5 = vmul.u32 %v834_v2, %v3505_v28 }
 0x115   : > { %vm843_vm9 = vc.u32 %v835_v19, %v839_v34  ;;  %v813_v36 = vmul.u32 %v811_v42, %v3498_v46  ;;  %v817_v54 = vshll.u32 %v814_v22, 16  ;;  %v816_v49 = vmul.u32 %v812_v27, %v3505_v28 }
 0x116   : > { %v723_v6 = vand.u32 2147483647, %v722_v7  ;;  %v844_v24 = vsel %vm843_vm9, 1, %v3069_v53  ;;  %v841_v8 = vshll.u32 %v837_v15, 16  ;;  %v845_v52 = vadd.s32 %v839_v34, %v835_v19 }
 0x117   : > { %v846_v25 = vadd.s32 %v844_v24, %v838_v5  ;;  %v819_v57 = vshll.u32 %v815_v61, 16  ;;  %vm821_vm10 = vc.u32 %v813_v36, %v817_v54  ;;  %v823_v1 = vadd.s32 %v817_v54, %v813_v36 }
 0x118   : > { %v726_v56 = vmul.f32 %v725_v33, %v723_v6  ;;  %v822_v16 = vsel %vm821_vm10, 1, %v3069_v53  ;;  %v840_v14 = vshrl.u32 %v836_v58, 16  ;;  %vm847_vm11 = vc.u32 %v845_v52, %v841_v8 }
 0x119   : > { %v929_v26 = vand.u32 31, %v927_v62  ;;  %v824_v38 = vadd.s32 %v822_v16, %v816_v49  ;;  %vm825_vm12 = vc.u32 %v823_v1, %v819_v57  ;;  %v848_v46 = vsel %vm847_vm11, 1, %v3069_v53 }
 0x11a   : > { %v727_v48 = vxor.u32 2147483648, %v726_v56  ;;  %v826_v59 = vsel %vm825_vm12, 1, %v3069_v53  ;;  %v842_v28 = vshrl.u32 %v837_v15, 16  ;;  %v850_v60 = vadd.s32 %v848_v46, %v846_v25 }
 0x11b   : > { %v3586_v20 = vsub.s32 32, %v929_v26  ;;  %v818_v2 = vshrl.u32 %v814_v22, 16  ;;  %v820_v4 = vshrl.u32 %v815_v61, 16  ;;  %v828_v9 = vadd.s32 %v826_v59, %v824_v38  ;;  %v277_v59 = vpop.f32.mrf.mxu1 }
 0x11c   : > { %v728_v55 = vsel %vm607_vm0, %v727_v48, %v726_v56  ;;  %v3593_v10 = vadd.s32 %v845_v52, %v841_v8  ;;  %v851_v17 = vadd.s32 %v850_v60, %v840_v14  ;;  %v3595_v29 = vshrl.u32 %v927_v62, 5 }
 0x11d   : > { %v731_v50 = vsel %vm3517_vm2, %v3219_v3, %v728_v55  ;;  %v829_v58 = vadd.s32 %v828_v9, %v818_v2  ;;  %v935_v18 = vshll.u32 %v3064_v37, %v929_v26  ;;  %v938_v40 = vshll.u32 %v3065_v39, %v929_v26 }
 0x11e   : > { %v733_v21 = vmul.f32 %v731_v50, %v731_v50  ;;  %v852_v42 = vadd.s32 %v851_v17, %v842_v28  ;;  %v936_v27 = vshrl.u32 %v3065_v39, %v3586_v20  ;;  %v941_v19 = vshll.u32 %v3066_v41, %v929_v26 }
 0x11f   : > { %v942_v63 = vshrl.u32 %v3067_v43, %v3586_v20  ;;  %v3604_v7 = vadd.s32 %v829_v58, %v820_v4  ;;  %v939_v22 = vshrl.u32 %v3066_v41, %v3586_v20  ;;  %v932_v33 = vshll.u32 %v3063_v35, %v929_v26 }
 0x120   : > { %v734_v15 = vmul.f32 -0.001358992, %v733_v21  ;;  %v741_v34 = vmul.f32 -0.00019511016, %v733_v21  ;;  %v856_v62 = vadd.s32 1, %v852_v42  ;;  %v933_v61 = vshrl.u32 %v3064_v37, %v3586_v20 }
 0x121   : > { %v944_v5 = vshll.u32 %v3067_v43, %v929_v26  ;;  %v853_v54 = vmul.u32 %v3489_v31, %v3572_v13  ;;  %vm855_vm13 = vc.u32 %v3604_v7, %v3593_v10  ;;  %v3616_v49 = vor.u32 %v936_v27, %v935_v18 }
 0x122   : > { %v735_v6 = vadd.f32 0.041655596, %v734_v15  ;;  %v742_v36 = vadd.f32 0.008332121, %v741_v34  ;;  %v857_v24 = vsel %vm855_vm13, %v856_v62, %v852_v42  ;;  %v943_v8 = vor.u32 %v942_v63, %v941_v19 }
 0x123   : > { %v945_v52 = vshrl.u32 %v3068_v51, %v3586_v20  ;;  %v858_v57 = vadd.s32 %v857_v24, %v853_v54  ;;  %v940_v1 = vor.u32 %v939_v22, %v938_v40  ;;  %v3620_v16 = vor.u32 %v933_v61, %v932_v33  ;;  %v239_v61 = vpop.f32.mrf.mxu0 }
 0x124   : > { %v736_v25 = vmul.f32 %v735_v6, %v733_v21  ;;  %v743_v56 = vmul.f32 %v742_v36, %v733_v21  ;;  %vm947_vm14 = vcmp.lt.s32.totalorder %v3595_v29, 1  ;;  %vm950_vm15 = vcmp.lt.s32.totalorder %v3595_v29, 4 }
 0x125   : > { %v946_v14 = vor.u32 %v945_v52, %v944_v5  ;;  %v859_v26 = vadd.s32 536870912, %v858_v57  ;;  %vm949_vm0 = vcmp.lt.s32.totalorder %v3595_v29, 3  ;;  %v750_v48 = vand.u32 3, %v3566_v32 }
 0x126   : > { %v737_v31 = vadd.f32 -0.4999988, %v736_v25  ;;  %v744_v13 = vadd.f32 -0.16666654, %v743_v56  ;;  %v956_v38 = vsel %vm950_vm15, %v943_v8, 920167782  ;;  %v959_v2 = vsel %vm947_vm14, %v3616_v49, %v940_v1 }
 0x127   : > { %v960_v46 = vsel %vm950_vm15, %v946_v14, 1326507024  ;;  %v3630_v55 = vshrl.u32 %v859_v26, 30  ;;  %vm948_vm1 = vcmp.lt.s32.totalorder %v3595_v29, 2  ;;  %v955_v32 = vsel %vm947_vm14, %v3620_v16, %v3616_v49 }
 0x128   : > { %v738_v28 = vmul.f32 %v737_v31, %v733_v21  ;;  %v745_v60 = vmul.f32 %v744_v13, %v733_v21  ;;  %v961_v4 = vsel %vm949_vm0, %v943_v8, %v960_v46  ;;  %v3644_v9 = vshll.u32 %v923_v45, 8 }
 0x129   : > { %v861_v58 = vshll.u32 %v3630_v55, 30  ;;  %v957_v18 = vsel %vm949_vm0, %v940_v1, %v956_v38  ;;  %v3650_v40 = vadd.f32 %v277_v59, %v3171_v12  ;;  %vm748_vm2 = vweird.f32 %v3219_v3 }
 0x12a   : > { %v739_v17 = vadd.f32 1.0, %v738_v28  ;;  %v746_v21 = vadd.f32 1.0, %v745_v60  ;;  %v962_v42 = vsel %vm948_vm1, %v959_v2, %v961_v4  ;;  %vm755_vm3 = vcmp.eq.s32.totalorder %v750_v48, 2 }
 0x12b   : > { %v862_v45 = vsub.s32 %v858_v57, %v861_v58  ;;  %v958_v19 = vsel %vm948_vm1, %v955_v32, %v957_v18  ;;  %v964_v63 = vand.u32 65535, %v3644_v9  ;;  %v966_v15 = vand.u32 65535, %v962_v42 }
 0x12c   : > { %v747_v27 = vmul.f32 %v746_v21, %v731_v50  ;;  %v756_v23 = vxor.u32 2147483648, %v739_v17  ;;  %v967_v34 = vshrl.u32 %v962_v42, 16  ;;  %v965_v33 = vshrl.u32 %v3644_v9, 16 }
 0x12d   : > { %vm863_vm4 = vcmp.lt.s32.totalorder %v862_v45, 0  ;;  %v864_v62 = vsub.s32 0, %v862_v45  ;;  %vm751_vm5 = vcmp.lt.s32.totalorder %v750_v48, 2  ;;  %vm752_vm6 = vcmp.eq.s32.totalorder %v750_v48, 0 }
 0x12e   : > { %v753_v22 = vxor.u32 2147483648, %v747_v27  ;;  %v757_v5 = vsel %vm755_vm3, %v756_v23, %v747_v27  ;;  %v969_v50 = vmul.u32 %v967_v34, %v964_v63  ;;  %v970_v54 = vmul.u32 %v966_v15, %v965_v33 }
 0x12f   : > { %v865_v36 = vsel %vm863_vm4, %v864_v62, %v862_v45  ;;  %v989_v24 = vshrl.u32 %v958_v19, 16  ;;  %v988_v56 = vand.u32 65535, %v958_v19  ;;  %v3660_v57 = vadd.f32 %v239_v61, %v3169_v11 }
 0x130   : > { %v754_v6 = vsel %vm752_vm6, %v739_v17, %v753_v22  ;;  %v866_v52 = vclz %v865_v36  ;;  %v972_v25 = vshll.u32 %v969_v50, 16  ;;  %v931_v31 = vshrl.u32 %v3063_v35, %v3586_v20 }
 0x131   : > { %v758_v8 = vsel %vm751_vm5, %v754_v6, %v757_v5  ;;  %v968_v13 = vmul.u32 %v966_v15, %v964_v63  ;;  %v854_v26 = vadd.s32 %v3593_v10, %v3604_v7  ;;  %v952_v38 = vsel %vm950_vm15, %v940_v1, 2102212464 }
 0x132   : > { %v759_v14 = vsel %vm748_vm2, nan, %v758_v8  ;;  %v2903_v48 = vadd.s32 4294967294, %v866_v52  ;;  %v971_v46 = vmul.u32 %v967_v34, %v965_v33  ;;  %v974_v59 = vshll.u32 %v970_v54, 16 }
 0x133   : > { %2777 = vst [vmem:[%s3480_s10 + $0x10] sm:$0xff] %v759_v14  ;;  %vm976_vm7 = vc.u32 %v968_v13, %v972_v25  ;;  %v978_v28 = vadd.s32 %v972_v25, %v968_v13  ;;  %v991_v60 = vmul.u32 %v989_v24, %v964_v63  ;;  %v973_v3 = vshrl.u32 %v969_v50, 16 }
 0x134   : > { %vm2904_vm8 = vcmp.lt.s32.totalorder %v2903_v48, 0  ;;  %v977_v2 = vsel %vm976_vm7, 1, %v3069_v53  ;;  %v992_v32 = vmul.u32 %v988_v56, %v965_v33  ;;  %v990_v1 = vmul.u32 %v988_v56, %v964_v63 }
 0x135   : > { %v869_v20 = vsel %vm2904_vm8, 0, %v2903_v48  ;;  %v979_v4 = vadd.s32 %v977_v2, %v971_v46  ;;  %vm980_vm9 = vc.u32 %v978_v28, %v974_v59  ;;  %v994_v17 = vshll.u32 %v991_v60, 16 }
 0x136   : > { %v870_v10 = vsub.s32 32, %v869_v20  ;;  %v874_v7 = vsub.s32 4294967266, %v869_v20  ;;  %v981_v21 = vsel %vm980_vm9, 1, %v3069_v53  ;;  %v871_v58 = vshll.u32 %v862_v45, %v869_v20 }
 0x137   : > { %v983_v18 = vadd.s32 %v981_v21, %v979_v4  ;;  %v993_v42 = vmul.u32 %v989_v24, %v965_v33  ;;  %v996_v27 = vshll.u32 %v992_v32, 16  ;;  %vm998_vm10 = vc.u32 %v990_v1, %v994_v17 }
 0x138   : > { %v872_v23 = vshrl.u32 %v854_v26, %v870_v10  ;;  %v875_v19 = vadd.s32 127, %v874_v7  ;;  %v1000_v15 = vadd.s32 %v994_v17, %v990_v1  ;;  %v884_v34 = vsub.s32 4, %v3630_v55 }
 0x139   : > { %v984_v22 = vadd.s32 %v983_v18, %v973_v3  ;;  %v999_v62 = vsel %vm998_vm10, 1, %v3069_v53  ;;  %v1070_v61 = vand.u32 2147483647, %v3650_v40  ;;  %vm762_vm12 = vcmp.lt.s32.totalorder %v3371_v0, 0 }
 0x13a   : > { %v873_v5 = vor.u32 %v872_v23, %v871_v58  ;;  %v876_v50 = vshll.u32 %v875_v19, 23  ;;  %v1001_v6 = vadd.s32 %v999_v62, %v993_v42  ;;  %vm1002_vm11 = vc.u32 %v1000_v15, %v996_v27 }
 0x13b   : > { %v951_v45 = vsel %vm947_vm14, %v931_v31, %v3620_v16  ;;  %v975_v63 = vshrl.u32 %v970_v54, 16  ;;  %v1003_v33 = vsel %vm1002_vm11, 1, %v3069_v53  ;;  %v953_v24 = vsel %vm949_vm0, %v3616_v49, %v952_v38 }
 0x13c   : > { %v877_v36 = vor.u32 4788187, %v876_v50  ;;  %v995_v8 = vshrl.u32 %v991_v60, 16  ;;  %v1005_v52 = vadd.s32 %v1003_v33, %v1001_v6  ;;  %v885_v25 = vsel %vm762_vm12, %v884_v34, %v3630_v55 }
 0x13d   : > { %v985_v56 = vadd.s32 %v984_v22, %v975_v63  ;;  %v997_v14 = vshrl.u32 %v992_v32, 16  ;;  %v1073_v13 = vand.u32 2139095040, %v3650_v40  ;;  %v880_v16 = vcvt.s32.f32 %v873_v5 }
 0x13e   : > { %v878_v26 = vand.u32 2147483647, %v877_v36  ;;  %v1006_v54 = vadd.s32 %v1005_v52, %v995_v8  ;;  %v1077_v31 = vand.u32 8388607, %v1070_v61  ;;  %v1004_v48 = vadd.s32 %v1000_v15, %v996_v27 }
 0x13f   : > { %v1074_v46 = vshrl.u32 %v1073_v13, 23  ;;  %v1228_v49 = vand.u32 2139095040, %v3660_v57  ;;  %vm3693_vm13 = vcmp.le.f32.partialorder %v760_v30, 0.7853982  ;;  %v954_v59 = vsel %vm948_vm1, %v951_v45, %v953_v24 }
 0x140   : > { %v881_v55 = vmul.f32 %v880_v16, %v878_v26  ;;  %v1007_v28 = vadd.s32 %v1006_v54, %v997_v14  ;;  %v887_v60 = vsel %vm3693_vm13, 0, %v885_v25  ;;  %vm1010_vm14 = vc.u32 %v985_v56, %v1004_v48 }
 0x141   : > { %v2908_v3 = vadd.s32 4294967169, %v1074_v46  ;;  %v1225_v2 = vand.u32 2147483647, %v3660_v57  ;;  %v1078_v4 = vor.u32 8388608, %v1077_v31  ;;  %v1229_v17 = vshrl.u32 %v1228_v49, 23 }
 0x142   : > { %v882_v32 = vxor.u32 2147483648, %v881_v55  ;;  %v1011_v20 = vadd.s32 1, %v1007_v28  ;;  %v1008_v30 = vmul.u32 %v3644_v9, %v954_v59  ;;  %v904_v29 = vadd.s32 3, %v887_v60 }
 0x143   : > { %v1080_v10 = vadd.s32 1, %v2908_v3  ;;  %v3712_v18 = vand.u32 8388607, %v1225_v2  ;;  %v3716_v27 = vshll.u32 %v1078_v4, 8  ;;  %v2911_v23 = vadd.s32 4294967169, %v1229_v17 }
 0x144   : > { %v883_v7 = vsel %vm762_vm12, %v882_v32, %v881_v55  ;;  %v1012_v21 = vsel %vm1010_vm14, %v1011_v20, %v1007_v28  ;;  %v3718_v62 = vand.u32 3, %v904_v29  ;;  %vm917_vm0 = vcmp.lt.s32.totalorder %v3394_v47, 0 }
 0x145   : > { %v3708_v1 = vsel %vm3693_vm13, %v3371_v0, %v883_v7  ;;  %v1013_v58 = vadd.s32 %v1012_v21, %v1008_v30  ;;  %vm1081_vm15 = vcmp.gt.s32.totalorder %v1080_v10, 0  ;;  %v3721_v5 = vadd.s32 %v1004_v48, %v985_v56 }
 0x146   : > { %v888_v9 = vmul.f32 %v3708_v1, %v3708_v1  ;;  %v1082_v42 = vsel %vm1081_vm15, %v1080_v10, 0  ;;  %v1233_v45 = vor.u32 8388608, %v3712_v18  ;;  %vm3726_vm1 = vcmp.le.f32.partialorder %v915_v44, 0.7853982 }
 0x147   : > { %v1014_v19 = vadd.s32 536870912, %v1013_v58  ;;  %v1084_v15 = vand.u32 31, %v1082_v42  ;;  %v3731_v24 = vand.u32 65535, %v3716_v27  ;;  %v3733_v8 = vadd.s32 1, %v2911_v23 }
 0x148   : > { %v889_v34 = vmul.f32 -0.001358992, %v888_v9  ;;  %v896_v22 = vmul.f32 -0.00019511016, %v888_v9  ;;  %v3735_v56 = vshrl.u32 %v1082_v42, 5  ;;  %vm910_vm2 = vcmp.eq.s32.totalorder %v3718_v62, 2 }
 0x149   : > { %v1015_v50 = vshrl.u32 %v1014_v19, 30  ;;  %v1085_v6 = vsub.s32 32, %v1084_v15  ;;  %v1087_v14 = vshll.u32 %v3063_v35, %v1084_v15  ;;  %v1090_v44 = vshll.u32 %v3064_v37, %v1084_v15 }
 0x14a   : > { %v890_v63 = vadd.f32 0.041655596, %v889_v34  ;;  %v897_v33 = vadd.f32 0.008332121, %v896_v22  ;;  %v1093_v48 = vshll.u32 %v3065_v39, %v1084_v15  ;;  %v1096_v59 = vshll.u32 %v3066_v41, %v1084_v15 }
 0x14b   : > { %v1016_v52 = vshll.u32 %v1015_v50, 30  ;;  %v1039_v25 = vsub.s32 4, %v1015_v50  ;;  %v1088_v16 = vshrl.u32 %v3064_v37, %v1085_v6  ;;  %v1091_v31 = vshrl.u32 %v3065_v39, %v1085_v6 }
 0x14c   : > { %v891_v13 = vmul.f32 %v890_v63, %v888_v9  ;;  %v898_v26 = vmul.f32 %v897_v33, %v888_v9  ;;  %v1094_v46 = vshrl.u32 %v3066_v41, %v1085_v6  ;;  %v1086_v55 = vshrl.u32 %v3063_v35, %v1085_v6 }
 0x14d   : > { %v3740_v54 = vsub.s32 %v1013_v58, %v1016_v52  ;;  %vm907_vm3 = vcmp.eq.s32.totalorder %v3718_v62, 0  ;;  %v1040_v60 = vsel %vm917_vm0, %v1039_v25, %v1015_v50  ;;  %v1097_v3 = vshrl.u32 %v3067_v43, %v1085_v6 }
 0x14e   : > { %v892_v49 = vadd.f32 -0.4999988, %v891_v13  ;;  %v899_v38 = vadd.f32 -0.16666654, %v898_v26  ;;  %vm906_vm5 = vcmp.lt.s32.totalorder %v3718_v62, 2  ;;  %v1089_v4 = vor.u32 %v1088_v16, %v1087_v14 }
 0x14f   : > { %vm1018_vm4 = vcmp.lt.s32.totalorder %v3740_v54, 0  ;;  %v1019_v28 = vsub.s32 0, %v3740_v54  ;;  %v1099_v17 = vshll.u32 %v3067_v43, %v1084_v15  ;;  %vm903_vm6 = vweird.f32 %v3371_v0 }
 0x150   : > { %v893_v32 = vmul.f32 %v892_v49, %v888_v9  ;;  %v900_v20 = vmul.f32 %v899_v38, %v888_v9  ;;  %v1092_v10 = vor.u32 %v1091_v31, %v1090_v44  ;;  %v1095_v7 = vor.u32 %v1094_v46, %v1093_v48 }
 0x151   : > { %v1020_v30 = vsel %vm1018_vm4, %v1019_v28, %v3740_v54  ;;  %v1100_v29 = vshrl.u32 %v3068_v51, %v1085_v6  ;;  %vm1102_vm7 = vcmp.lt.s32.totalorder %v3735_v56, 1  ;;  %v1042_v9 = vsel %vm3726_vm1, 0, %v1040_v60 }
 0x152   : > { %v894_v21 = vadd.f32 1.0, %v893_v32  ;;  %v901_v58 = vadd.f32 1.0, %v900_v20  ;;  %v1021_v42 = vclz %v1020_v30  ;;  %v1098_v23 = vor.u32 %v1097_v3, %v1096_v59 }
 0x153   : > { %v1101_v19 = vor.u32 %v1100_v29, %v1099_v17  ;;  %vm1236_vm8 = vcmp.gt.s32.totalorder %v3733_v8, 0  ;;  %vm1103_vm9 = vcmp.lt.s32.totalorder %v3735_v56, 2  ;;  %vm1104_vm10 = vcmp.lt.s32.totalorder %v3735_v56, 3 }
 0x154   : > { %v902_v15 = vmul.f32 %v901_v58, %v3708_v1  ;;  %v911_v34 = vxor.u32 2147483648, %v894_v21  ;;  %v2906_v22 = vadd.s32 4294967294, %v1021_v42  ;;  %vm1105_vm11 = vcmp.lt.s32.totalorder %v3735_v56, 4 }
 0x155   : > { %v1106_v50 = vsel %vm1102_vm7, %v1086_v55, %v1089_v4  ;;  %v1110_v6 = vsel %vm1102_vm7, %v1089_v4, %v1092_v10  ;;  %v1107_v33 = vsel %vm1105_vm11, %v1095_v7, 2102212464  ;;  %v1114_v1 = vsel %vm1102_vm7, %v1092_v10, %v1095_v7 }
 0x156   : > { %v908_v63 = vxor.u32 2147483648, %v902_v15  ;;  %vm2907_vm12 = vcmp.lt.s32.totalorder %v2906_v22, 0  ;;  %v912_v52 = vsel %vm910_vm2, %v911_v34, %v902_v15  ;;  %v1111_v14 = vsel %vm1105_vm11, %v1098_v23, 920167782 }
 0x157   : > { %v1024_v25 = vsel %vm2907_vm12, 0, %v2906_v22  ;;  %v1115_v13 = vsel %vm1105_vm11, %v1101_v19, 1326507024  ;;  %v1108_v31 = vsel %vm1104_vm10, %v1092_v10, %v1107_v33  ;;  %v1112_v49 = vsel %vm1104_vm10, %v1095_v7, %v1111_v14 }
 0x158   : > { %v909_v26 = vsel %vm907_vm3, %v894_v21, %v908_v63  ;;  %v1025_v16 = vsub.s32 32, %v1024_v25  ;;  %v1029_v44 = vsub.s32 4294967266, %v1024_v25  ;;  %v1026_v46 = vshll.u32 %v3740_v54, %v1024_v25 }
 0x159   : > { %v913_v48 = vsel %vm906_vm5, %v909_v26, %v912_v52  ;;  %v1116_v38 = vsel %vm1104_vm10, %v1098_v23, %v1115_v13  ;;  %v1113_v60 = vsel %vm1103_vm9, %v1110_v6, %v1112_v49  ;;  %v1120_v54 = vshrl.u32 %v3716_v27, 16 }
 0x15a   : > { %v914_v55 = vsel %vm903_vm6, nan, %v913_v48  ;;  %v1027_v59 = vshrl.u32 %v3721_v5, %v1025_v16  ;;  %v1030_v28 = vadd.s32 127, %v1029_v44  ;;  %v1117_v62 = vsel %vm1103_vm9, %v1114_v1, %v1116_v38 }
 0x15b   : > { %v1143_v3 = vand.u32 65535, %v1113_v60  ;;  %v1144_v32 = vshrl.u32 %v1113_v60, 16  ;;  %2778 = vst [vmem:[%s3480_s10 + $0x18] sm:$0xff] %v914_v55  ;;  %v1121_v17 = vand.u32 65535, %v1117_v62  ;;  %v1122_v30 = vshrl.u32 %v1117_v62, 16 }
 0x15c   : > { %v1028_v20 = vor.u32 %v1027_v59, %v1026_v46  ;;  %v1031_v4 = vshll.u32 %v1030_v28, 23  ;;  %v3795_v0 = vadd.s32 3, %v1042_v9  ;;  %v3799_v5 = vsel %vm1103_vm9, %v1106_v50, %v1108_v31 }
 0x15d   : > { %v1146_v10 = vmul.u32 %v1144_v32, %v3731_v24  ;;  %v1237_v7 = vsel %vm1236_vm8, %v3733_v8, 0  ;;  %v1124_v21 = vmul.u32 %v1122_v30, %v3731_v24  ;;  %v1145_v58 = vmul.u32 %v1143_v3, %v3731_v24 }
 0x15e   : > { %v1032_v29 = vor.u32 4788187, %v1031_v4  ;;  %v1147_v42 = vmul.u32 %v1143_v3, %v1120_v54  ;;  %v1035_v23 = vcvt.s32.f32 %v1028_v20  ;;  %v1125_v19 = vmul.u32 %v1121_v17, %v1120_v54 }
 0x15f   : > { %v1148_v9 = vmul.u32 %v1144_v32, %v1120_v54  ;;  %v1149_v15 = vshll.u32 %v1146_v10, 16  ;;  %v1123_v56 = vmul.u32 %v1121_v17, %v3731_v24  ;;  %v1126_v22 = vmul.u32 %v1122_v30, %v1120_v54 }
 0x160   : > { %v1033_v34 = vand.u32 2147483647, %v1032_v29  ;;  %v1127_v50 = vshll.u32 %v1124_v21, 16  ;;  %v1128_v6 = vshrl.u32 %v1124_v21, 16  ;;  %v1129_v63 = vshll.u32 %v1125_v19, 16 }
 0x161   : > { %v1150_v33 = vshrl.u32 %v1146_v10, 16  ;;  %vm1153_vm13 = vc.u32 %v1145_v58, %v1149_v15  ;;  %v1151_v14 = vshll.u32 %v1147_v42, 16  ;;  %v1155_v13 = vadd.s32 %v1149_v15, %v1145_v58 }
 0x162   : > { %v1036_v8 = vmul.f32 %v1035_v23, %v1033_v34  ;;  %vm1131_vm14 = vc.u32 %v1123_v56, %v1127_v50  ;;  %v1133_v1 = vadd.s32 %v1127_v50, %v1123_v56  ;;  %v1154_v52 = vsel %vm1153_vm13, 1, %v3069_v53 }
 0x163   : > { %v1132_v25 = vsel %vm1131_vm14, 1, %v3069_v53  ;;  %v1156_v26 = vadd.s32 %v1154_v52, %v1148_v9  ;;  %v1239_v24 = vand.u32 31, %v1237_v7  ;;  %v1130_v31 = vshrl.u32 %v1125_v19, 16 }
 0x164   : > { %v1037_v16 = vxor.u32 2147483648, %v1036_v8  ;;  %v1134_v44 = vadd.s32 %v1132_v25, %v1126_v22  ;;  %vm1135_vm15 = vc.u32 %v1133_v1, %v1129_v63  ;;  %v1152_v46 = vshrl.u32 %v1147_v42, 16 }
 0x165   : > { %v1136_v48 = vsel %vm1135_vm15, 1, %v3069_v53  ;;  %vm1157_vm2 = vc.u32 %v1155_v13, %v1151_v14  ;;  %v3814_v59 = vsub.s32 32, %v1239_v24  ;;  %v3819_v60 = vadd.s32 %v1155_v13, %v1151_v14 }
 0x166   : > { %v1038_v49 = vsel %vm917_vm0, %v1037_v16, %v1036_v8  ;;  %v1138_v38 = vadd.s32 %v1136_v48, %v1134_v44  ;;  %v1158_v55 = vsel %vm1157_vm2, 1, %v3069_v53  ;;  %v3821_v54 = vshrl.u32 %v1237_v7, 5 }
 0x167   : > { %v1041_v28 = vsel %vm3726_vm1, %v3394_v47, %v1038_v49  ;;  %v1160_v62 = vadd.s32 %v1158_v55, %v1156_v26  ;;  %v1242_v20 = vshll.u32 %v3063_v35, %v1239_v24  ;;  %v1243_v4 = vshrl.u32 %v3064_v37, %v3814_v59 }
 0x168   : > { %v1043_v3 = vmul.f32 %v1041_v28, %v1041_v28  ;;  %v1139_v32 = vadd.s32 %v1138_v38, %v1128_v6  ;;  %v1245_v30 = vshll.u32 %v3064_v37, %v1239_v24  ;;  %v1246_v10 = vshrl.u32 %v3065_v39, %v3814_v59 }
 0x169   : > { %v1161_v17 = vadd.s32 %v1160_v62, %v1150_v33  ;;  %v1248_v36 = vshll.u32 %v3065_v39, %v1239_v24  ;;  %v1249_v7 = vshrl.u32 %v3066_v41, %v3814_v59  ;;  %v1163_v23 = vmul.u32 %v3716_v27, %v3799_v5 }
 0x16a   : > { %v1044_v29 = vmul.f32 -0.001358992, %v1043_v3  ;;  %v1051_v21 = vmul.f32 -0.00019511016, %v1043_v3  ;;  %v3830_v58 = vadd.s32 %v1139_v32, %v1130_v31  ;;  %v1251_v19 = vshll.u32 %v3066_v41, %v1239_v24 }
 0x16b   : > { %v1162_v42 = vadd.s32 %v1161_v17, %v1152_v46  ;;  %vm1257_vm0 = vcmp.lt.s32.totalorder %v3821_v54, 1  ;;  %v3840_v34 = vor.u32 %v1243_v4, %v1242_v20  ;;  %v1252_v22 = vshrl.u32 %v3067_v43, %v3814_v59 }
 0x16c   : > { %v1045_v9 = vadd.f32 0.041655596, %v1044_v29  ;;  %v1052_v15 = vadd.f32 0.008332121, %v1051_v21  ;;  %vm1165_vm1 = vc.u32 %v3830_v58, %v3819_v60  ;;  %v1254_v50 = vshll.u32 %v3067_v43, %v1239_v24 }
 0x16d   : > { %v1166_v56 = vadd.s32 1, %v1162_v42  ;;  %v1255_v27 = vshrl.u32 %v3068_v51, %v3814_v59  ;;  %v3847_v63 = vor.u32 %v1246_v10, %v1245_v30  ;;  %v3849_v33 = vor.u32 %v1249_v7, %v1248_v36 }
 0x16e   : > { %v1046_v5 = vmul.f32 %v1045_v9, %v1043_v3  ;;  %v1053_v6 = vmul.f32 %v1052_v15, %v1043_v3  ;;  %v1253_v1 = vor.u32 %v1252_v22, %v1251_v19  ;;  %vm1260_vm3 = vcmp.lt.s32.totalorder %v3821_v54, 4  ;;  %v280_v15 = vpop.f32.mrf.mxu1 }
 0x16f   : > { %v1167_v8 = vsel %vm1165_vm1, %v1166_v56, %v1162_v42  ;;  %v1256_v52 = vor.u32 %v1255_v27, %v1254_v50  ;;  %vm1259_vm4 = vcmp.lt.s32.totalorder %v3821_v54, 3  ;;  %v1060_v26 = vand.u32 3, %v3795_v0 }
 0x170   : > { %v1047_v25 = vadd.f32 -0.4999988, %v1046_v5  ;;  %v1054_v14 = vadd.f32 -0.16666654, %v1053_v6  ;;  %v1168_v13 = vadd.s32 %v1167_v8, %v1163_v23  ;;  %v1266_v16 = vsel %vm1260_vm3, %v1253_v1, 920167782 }
 0x171   : > { %v1265_v48 = vsel %vm1257_vm0, %v3840_v34, %v3847_v63  ;;  %vm1258_vm5 = vcmp.lt.s32.totalorder %v3821_v54, 2  ;;  %v1267_v46 = vsel %vm1259_vm4, %v3849_v33, %v1266_v16  ;;  %v1269_v0 = vsel %vm1257_vm0, %v3847_v63, %v3849_v33 }
 0x172   : > { %v1048_v44 = vmul.f32 %v1047_v25, %v1043_v3  ;;  %v1055_v24 = vmul.f32 %v1054_v14, %v1043_v3  ;;  %v1169_v31 = vadd.s32 536870912, %v1168_v13  ;;  %v1270_v49 = vsel %vm1260_vm3, %v1256_v52, 1326507024 }
 0x173   : > { %v3874_v3 = vshll.u32 %v1233_v45, 8  ;;  %v1268_v32 = vsel %vm1258_vm5, %v1265_v48, %v1267_v46  ;;  %v1271_v20 = vsel %vm1259_vm4, %v1253_v1, %v1270_v49  ;;  %vm1061_vm6 = vcmp.lt.s32.totalorder %v1060_v26, 2 }
 0x174   : > { %v1049_v38 = vadd.f32 1.0, %v1048_v44  ;;  %v1056_v55 = vadd.f32 1.0, %v1055_v24  ;;  %v3870_v62 = vshrl.u32 %v1169_v31, 30  ;;  %vm1062_vm7 = vcmp.eq.s32.totalorder %v1060_v26, 0 }
 0x175   : > { %vm1065_vm8 = vcmp.eq.s32.totalorder %v1060_v26, 2  ;;  %v1272_v10 = vsel %vm1258_vm5, %v1269_v0, %v1271_v20  ;;  %v1274_v45 = vand.u32 65535, %v3874_v3  ;;  %v1299_v29 = vshrl.u32 %v1268_v32, 16 }
 0x176   : > { %v1057_v4 = vmul.f32 %v1056_v55, %v1041_v28  ;;  %v1066_v17 = vxor.u32 2147483648, %v1049_v38  ;;  %v1171_v30 = vshll.u32 %v3870_v62, 30  ;;  %v1275_v21 = vshrl.u32 %v3874_v3, 16 }
 0x177   : > { %v1276_v7 = vand.u32 65535, %v1272_v10  ;;  %v1277_v42 = vshrl.u32 %v1272_v10, 16  ;;  %v1298_v28 = vand.u32 65535, %v1268_v32  ;;  %vm1058_vm10 = vweird.f32 %v3394_v47 }
 0x178   : > { %v1063_v36 = vxor.u32 2147483648, %v1057_v4  ;;  %v3883_v18 = vsub.s32 %v1168_v13, %v1171_v30  ;;  %v1067_v19 = vsel %vm1065_vm8, %v1066_v17, %v1057_v4  ;;  %v1301_v6 = vmul.u32 %v1299_v29, %v1274_v45 }
 0x179   : > { %v1279_v22 = vmul.u32 %v1277_v42, %v1274_v45  ;;  %v1280_v50 = vmul.u32 %v1276_v7, %v1275_v21  ;;  %v1278_v1 = vmul.u32 %v1276_v7, %v1274_v45  ;;  %v1302_v25 = vmul.u32 %v1298_v28, %v1275_v21 }
 0x17a   : > { %v1064_v23 = vsel %vm1062_vm7, %v1049_v38, %v1063_v36  ;;  %vm1173_vm9 = vcmp.lt.s32.totalorder %v3883_v18, 0  ;;  %v1174_v9 = vsub.s32 0, %v3883_v18  ;;  %v3894_v14 = vadd.f32 %v280_v15, %v3171_v12 }
 0x17b   : > { %v1068_v56 = vsel %vm1061_vm6, %v1064_v23, %v1067_v19  ;;  %v1282_v52 = vshll.u32 %v1279_v22, 16  ;;  %v1164_v13 = vadd.s32 %v3819_v60, %v3830_v58  ;;  %v1241_v47 = vshrl.u32 %v3063_v35, %v3814_v59 }
 0x17c   : > { %v1069_v27 = vsel %vm1058_vm10, nan, %v1068_v56  ;;  %v1175_v5 = vsel %vm1173_vm9, %v1174_v9, %v3883_v18  ;;  %v1281_v26 = vmul.u32 %v1277_v42, %v1275_v21  ;;  %v1284_v44 = vshll.u32 %v1280_v50, 16 }
 0x17d   : > { %v1176_v8 = vclz %v1175_v5  ;;  %2779 = vst [vmem:[%s3480_s10 + $0x20] sm:$0xff] %v1069_v27  ;;  %vm1286_vm11 = vc.u32 %v1278_v1, %v1282_v52  ;;  %v1288_v24 = vadd.s32 %v1282_v52, %v1278_v1  ;;  %v1283_v31 = vshrl.u32 %v1279_v22, 16 }
 0x17e   : > { %v1287_v48 = vsel %vm1286_vm11, 1, %v3069_v53  ;;  %v1300_v46 = vmul.u32 %v1298_v28, %v1274_v45  ;;  %v1304_v0 = vshll.u32 %v1301_v6, 16  ;;  %vm1072_vm12 = vcmp.lt.s32.totalorder %v3650_v40, 0 }
 0x17f   : > { %v2909_v16 = vadd.s32 4294967294, %v1176_v8  ;;  %v1289_v49 = vadd.s32 %v1287_v48, %v1281_v26  ;;  %vm1290_vm14 = vc.u32 %v1288_v24, %v1284_v44  ;;  %v1306_v38 = vshll.u32 %v1302_v25, 16 }
 0x180   : > { %v1291_v58 = vsel %vm1290_vm14, 1, %v3069_v53  ;;  %vm1308_vm15 = vc.u32 %v1300_v46, %v1304_v0  ;;  %v1310_v59 = vadd.s32 %v1304_v0, %v1300_v46  ;;  %v1303_v4 = vmul.u32 %v1299_v29, %v1275_v21  ;;  %v242_v21 = vpop.f32.mrf.mxu2 }
 0x181   : > { %vm2910_vm13 = vcmp.lt.s32.totalorder %v2909_v16, 0  ;;  %v1293_v20 = vadd.s32 %v1291_v58, %v1289_v49  ;;  %v1262_v30 = vsel %vm1260_vm3, %v3849_v33, 2102212464  ;;  %v1309_v10 = vsel %vm1308_vm15, 1, %v3069_v53 }
 0x182   : > { %v1179_v60 = vsel %vm2910_vm13, 0, %v2909_v16  ;;  %vm1312_vm2 = vc.u32 %v1310_v59, %v1306_v38  ;;  %v1311_v42 = vadd.s32 %v1309_v10, %v1303_v4  ;;  %v1194_v28 = vsub.s32 4, %v3870_v62 }
 0x183   : > { %v1180_v55 = vsub.s32 32, %v1179_v60  ;;  %v1184_v32 = vsub.s32 4294967266, %v1179_v60  ;;  %v1181_v17 = vshll.u32 %v3883_v18, %v1179_v60  ;;  %v1294_v7 = vadd.s32 %v1293_v20, %v1283_v31 }
 0x184   : > { %v1285_v23 = vshrl.u32 %v1280_v50, 16  ;;  %v1313_v19 = vsel %vm1312_vm2, 1, %v3069_v53  ;;  %v1380_v29 = vand.u32 2147483647, %v3894_v14  ;;  %v1305_v15 = vshrl.u32 %v1301_v6, 16 }
 0x185   : > { %v1182_v36 = vshrl.u32 %v1164_v13, %v1180_v55  ;;  %v1185_v45 = vadd.s32 127, %v1184_v32  ;;  %v1315_v56 = vadd.s32 %v1313_v19, %v1311_v42  ;;  %v1261_v33 = vsel %vm1257_vm0, %v1241_v47, %v3840_v34 }
 0x186   : > { %v1263_v22 = vsel %vm1259_vm4, %v3847_v63, %v1262_v30  ;;  %v1295_v27 = vadd.s32 %v1294_v7, %v1285_v23  ;;  %v1383_v50 = vand.u32 2139095040, %v3894_v14  ;;  %v1307_v8 = vshrl.u32 %v1302_v25, 16 }
 0x187   : > { %v1183_v18 = vor.u32 %v1182_v36, %v1181_v17  ;;  %v1186_v9 = vshll.u32 %v1185_v45, 23  ;;  %v1316_v1 = vadd.s32 %v1315_v56, %v1305_v15  ;;  %v1387_v52 = vand.u32 8388607, %v1380_v29 }
 0x188   : > { %v3921_v6 = vadd.f32 %v242_v21, %v3169_v11  ;;  %v1195_v34 = vsel %vm1072_vm12, %v1194_v28, %v3870_v62  ;;  %v1314_v13 = vadd.s32 %v1310_v59, %v1306_v38  ;;  %v1384_v47 = vshrl.u32 %v1383_v50, 23 }
 0x189   : > { %v1187_v5 = vor.u32 4788187, %v1186_v9  ;;  %v1190_v63 = vcvt.s32.f32 %v1183_v18  ;;  %v1264_v16 = vsel %vm1258_vm5, %v1261_v33, %v1263_v22  ;;  %v1317_v44 = vadd.s32 %v1316_v1, %v1307_v8 }
 0x18a   : > { %vm3930_vm0 = vcmp.le.f32.partialorder %v1070_v61, 0.7853982  ;;  %vm1320_vm1 = vc.u32 %v1295_v27, %v1314_v13  ;;  %v2914_v24 = vadd.s32 4294967169, %v1384_v47  ;;  %v1388_v46 = vor.u32 8388608, %v1387_v52 }
 0x18b   : > { %v1188_v26 = vand.u32 2147483647, %v1187_v5  ;;  %v1197_v62 = vsel %vm3930_vm0, 0, %v1195_v34  ;;  %v1321_v48 = vadd.s32 1, %v1317_v44  ;;  %v1318_v0 = vmul.u32 %v3874_v3, %v1264_v16 }
 0x18c   : > { %v1390_v49 = vadd.s32 1, %v2914_v24  ;;  %v1535_v54 = vand.u32 2147483647, %v3921_v6  ;;  %v1214_v58 = vadd.s32 3, %v1197_v62  ;;  %v3940_v32 = vshll.u32 %v1388_v46, 8 }
 0x18d   : > { %v1191_v31 = vmul.f32 %v1190_v63, %v1188_v26  ;;  %v1322_v60 = vsel %vm1320_vm1, %v1321_v48, %v1317_v44  ;;  %v1538_v20 = vand.u32 2139095040, %v3921_v6  ;;  %vm1227_vm4 = vcmp.lt.s32.totalorder %v3660_v57, 0 }
 0x18e   : > { %v1323_v61 = vadd.s32 %v1322_v60, %v1318_v0  ;;  %vm1391_vm3 = vcmp.gt.s32.totalorder %v1390_v49, 0  ;;  %v3950_v30 = vand.u32 8388607, %v1535_v54  ;;  %v3955_v36 = vand.u32 3, %v1214_v58 }
 0x18f   : > { %v1192_v38 = vxor.u32 2147483648, %v1191_v31  ;;  %v1392_v55 = vsel %vm1391_vm3, %v1390_v49, 0  ;;  %v3957_v45 = vadd.s32 %v1314_v13, %v1295_v27  ;;  %v3960_v19 = vand.u32 65535, %v3940_v32 }
 0x190   : > { %v1324_v4 = vadd.s32 536870912, %v1323_v61  ;;  %v1394_v17 = vand.u32 31, %v1392_v55  ;;  %v1539_v21 = vshrl.u32 %v1538_v20, 23  ;;  %v3962_v9 = vshrl.u32 %v1392_v55, 5 }
 0x191   : > { %v1193_v59 = vsel %vm1072_vm12, %v1192_v38, %v1191_v31  ;;  %v3965_v15 = vshrl.u32 %v3940_v32, 16  ;;  %v1543_v56 = vor.u32 8388608, %v3950_v30  ;;  %vm3970_vm5 = vcmp.le.f32.partialorder %v1225_v2, 0.7853982 }
 0x192   : > { %v3946_v3 = vsel %vm3930_vm0, %v3650_v40, %v1193_v59  ;;  %v1325_v7 = vshrl.u32 %v1324_v4, 30  ;;  %v1395_v42 = vsub.s32 32, %v1394_v17  ;;  %v1397_v50 = vshll.u32 %v3063_v35, %v1394_v17 }
 0x193   : > { %v1198_v10 = vmul.f32 %v3946_v3, %v3946_v3  ;;  %v1400_v5 = vshll.u32 %v3064_v37, %v1394_v17  ;;  %v1403_v34 = vshll.u32 %v3065_v39, %v1394_v17  ;;  %v1406_v2 = vshll.u32 %v3066_v41, %v1394_v17 }
 0x194   : > { %v1326_v18 = vshll.u32 %v1325_v7, 30  ;;  %v1349_v1 = vsub.s32 4, %v1325_v7  ;;  %v1398_v52 = vshrl.u32 %v3064_v37, %v1395_v42  ;;  %v1401_v26 = vshrl.u32 %v3065_v39, %v1395_v42 }
 0x195   : > { %v1199_v28 = vmul.f32 -0.001358992, %v1198_v10  ;;  %v1206_v23 = vmul.f32 -0.00019511016, %v1198_v10  ;;  %vm1220_vm6 = vcmp.eq.s32.totalorder %v3955_v36, 2  ;;  %v1404_v16 = vshrl.u32 %v3066_v41, %v1395_v42 }
 0x196   : > { %v3976_v8 = vsub.s32 %v1323_v61, %v1326_v18  ;;  %v1407_v44 = vshrl.u32 %v3067_v43, %v1395_v42  ;;  %v1409_v31 = vshll.u32 %v3067_v43, %v1394_v17  ;;  %v2917_v62 = vadd.s32 4294967169, %v1539_v21 }
 0x197   : > { %v1200_v33 = vadd.f32 0.041655596, %v1199_v28  ;;  %v1207_v22 = vadd.f32 0.008332121, %v1206_v23  ;;  %vm1217_vm8 = vcmp.eq.s32.totalorder %v3955_v36, 0  ;;  %v1350_v46 = vsel %vm1227_vm4, %v1349_v1, %v1325_v7 }
 0x198   : > { %vm1328_vm7 = vcmp.lt.s32.totalorder %v3976_v8, 0  ;;  %v1329_v63 = vsub.s32 0, %v3976_v8  ;;  %v1399_v0 = vor.u32 %v1398_v52, %v1397_v50  ;;  %v1410_v49 = vshrl.u32 %v3068_v51, %v1395_v42 }
 0x199   : > { %v1201_v13 = vmul.f32 %v1200_v33, %v1198_v10  ;;  %v1208_v47 = vmul.f32 %v1207_v22, %v1198_v10  ;;  %vm1216_vm9 = vcmp.lt.s32.totalorder %v3955_v36, 2  ;;  %v3994_v61 = vor.u32 %v1401_v26, %v1400_v5 }
 0x19a   : > { %v1330_v48 = vsel %vm1328_vm7, %v1329_v63, %v3976_v8  ;;  %vm1213_vm10 = vweird.f32 %v3650_v40  ;;  %v1405_v59 = vor.u32 %v1404_v16, %v1403_v34  ;;  %v1408_v55 = vor.u32 %v1407_v44, %v1406_v2 }
 0x19b   : > { %v1202_v25 = vadd.f32 -0.4999988, %v1201_v13  ;;  %v1209_v24 = vadd.f32 -0.16666654, %v1208_v47  ;;  %v1331_v58 = vclz %v1330_v48  ;;  %v1411_v20 = vor.u32 %v1410_v49, %v1409_v31 }
 0x19c   : > { %vm1412_vm11 = vcmp.lt.s32.totalorder %v3962_v9, 1  ;;  %v3998_v28 = vadd.s32 1, %v2917_v62  ;;  %v1396_v23 = vshrl.u32 %v3063_v35, %v1395_v42  ;;  %vm1414_vm12 = vcmp.lt.s32.totalorder %v3962_v9, 3 }
 0x19d   : > { %v1203_v38 = vmul.f32 %v1202_v25, %v1198_v10  ;;  %v1210_v60 = vmul.f32 %v1209_v24, %v1198_v10  ;;  %v2912_v7 = vadd.s32 4294967294, %v1331_v58  ;;  %v1352_v10 = vsel %vm3970_vm5, 0, %v1350_v46 }
 0x19e   : > { %vm1415_vm13 = vcmp.lt.s32.totalorder %v3962_v9, 4  ;;  %v1420_v33 = vsel %vm1412_vm11, %v1399_v0, %v3994_v61  ;;  %v1424_v42 = vsel %vm1412_vm11, %v3994_v61, %v1405_v59  ;;  %vm1413_vm15 = vcmp.lt.s32.totalorder %v3962_v9, 2 }
 0x19f   : > { %v1204_v4 = vadd.f32 1.0, %v1203_v38  ;;  %v1211_v17 = vadd.f32 1.0, %v1210_v60  ;;  %vm2913_vm14 = vcmp.lt.s32.totalorder %v2912_v7, 0  ;;  %v1421_v50 = vsel %vm1415_vm13, %v1408_v55, 920167782 }
 0x1a0   : > { %v1334_v22 = vsel %vm2913_vm14, 0, %v2912_v7  ;;  %v1425_v5 = vsel %vm1415_vm13, %v1411_v20, 1326507024  ;;  %v1422_v47 = vsel %vm1414_vm12, %v1405_v59, %v1421_v50  ;;  %vm1546_vm2 = vcmp.gt.s32.totalorder %v3998_v28, 0 }
 0x1a1   : > { %v1212_v21 = vmul.f32 %v1211_v17, %v3946_v3  ;;  %v1221_v18 = vxor.u32 2147483648, %v1204_v4  ;;  %v1335_v52 = vsub.s32 32, %v1334_v22  ;;  %v1336_v34 = vshll.u32 %v3976_v8, %v1334_v22 }
 0x1a2   : > { %v1339_v13 = vsub.s32 4294967266, %v1334_v22  ;;  %v1426_v26 = vsel %vm1414_vm12, %v1408_v55, %v1425_v5  ;;  %v1423_v16 = vsel %vm1413_vm15, %v1420_v33, %v1422_v47  ;;  %v4039_v58 = vadd.s32 3, %v1352_v10 }
 0x1a3   : > { %v1218_v1 = vxor.u32 2147483648, %v1212_v21  ;;  %v1222_v3 = vsel %vm1220_vm6, %v1221_v18, %v1212_v21  ;;  %v1337_v63 = vshrl.u32 %v3957_v45, %v1335_v52  ;;  %v1427_v44 = vsel %vm1413_vm15, %v1424_v42, %v1426_v26 }
 0x1a4   : > { %v1340_v25 = vadd.s32 127, %v1339_v13  ;;  %v1431_v24 = vand.u32 65535, %v1427_v44  ;;  %v1432_v31 = vshrl.u32 %v1427_v44, 16  ;;  %v1453_v46 = vand.u32 65535, %v1423_v16 }
 0x1a5   : > { %v1219_v2 = vsel %vm1217_vm8, %v1204_v4, %v1218_v1  ;;  %v1338_v48 = vor.u32 %v1337_v63, %v1336_v34  ;;  %v1454_v49 = vshrl.u32 %v1423_v16, 16  ;;  %v1416_v36 = vsel %vm1412_vm11, %v1396_v23, %v1399_v0 }
 0x1a6   : > { %v1223_v8 = vsel %vm1216_vm9, %v1219_v2, %v1222_v3  ;;  %v1341_v38 = vshll.u32 %v1340_v25, 23  ;;  %v1434_v45 = vmul.u32 %v1432_v31, %v3960_v19  ;;  %v1435_v60 = vmul.u32 %v1431_v24, %v3965_v15 }
 0x1a7   : > { %v1224_v62 = vsel %vm1213_vm10, nan, %v1223_v8  ;;  %v1417_v40 = vsel %vm1415_vm13, %v1405_v59, 2102212464  ;;  %v1456_v55 = vmul.u32 %v1454_v49, %v3960_v19  ;;  %v1345_v4 = vcvt.s32.f32 %v1338_v48 }
 0x1a8   : > { %2780 = vst [vmem:[%s3480_s10 + $0x28] sm:$0xff] %v1224_v62  ;;  %v1342_v20 = vor.u32 4788187, %v1341_v38  ;;  %v1433_v17 = vmul.u32 %v1431_v24, %v3960_v19  ;;  %v1437_v7 = vshll.u32 %v1434_v45, 16  ;;  %v1436_v21 = vmul.u32 %v1432_v31, %v3965_v15 }
 0x1a9   : > { %v1455_v18 = vmul.u32 %v1453_v46, %v3960_v19  ;;  %v1457_v10 = vmul.u32 %v1453_v46, %v3965_v15  ;;  %v1459_v33 = vshll.u32 %v1456_v55, 16  ;;  %v1439_v50 = vshll.u32 %v1435_v60, 16 }
 0x1aa   : > { %v1343_v22 = vand.u32 2147483647, %v1342_v20  ;;  %vm1441_vm0 = vc.u32 %v1433_v17, %v1437_v7  ;;  %v1443_v0 = vadd.s32 %v1437_v7, %v1433_v17  ;;  %v1418_v59 = vsel %vm1414_vm12, %v3994_v61, %v1417_v40 }
 0x1ab   : > { %v1442_v23 = vsel %vm1441_vm0, 1, %v3069_v53  ;;  %v1458_v42 = vmul.u32 %v1454_v49, %v3965_v15  ;;  %vm1463_vm1 = vc.u32 %v1455_v18, %v1459_v33  ;;  %v1461_v52 = vshll.u32 %v1457_v10, 16 }
 0x1ac   : > { %v1346_v5 = vmul.f32 %v1345_v4, %v1343_v22  ;;  %v1444_v1 = vadd.s32 %v1442_v23, %v1436_v21  ;;  %vm1445_vm3 = vc.u32 %v1443_v0, %v1439_v50  ;;  %v1464_v19 = vsel %vm1463_vm1, 1, %v3069_v53 }
 0x1ad   : > { %v1446_v3 = vsel %vm1445_vm3, 1, %v3069_v53  ;;  %v1465_v34 = vadd.s32 %v1459_v33, %v1455_v18  ;;  %v1466_v13 = vadd.s32 %v1464_v19, %v1458_v42  ;;  %v1438_v26 = vshrl.u32 %v1434_v45, 16 }
 0x1ae   : > { %v1347_v47 = vxor.u32 2147483648, %v1346_v5  ;;  %v1448_v2 = vadd.s32 %v1446_v3, %v1444_v1  ;;  %v1547_v61 = vsel %vm1546_vm2, %v3998_v28, 0  ;;  %v1419_v15 = vsel %vm1413_vm15, %v1416_v36, %v1418_v59 }
 0x1af   : > { %v1440_v63 = vshrl.u32 %v1435_v60, 16  ;;  %vm1467_vm6 = vc.u32 %v1465_v34, %v1461_v52  ;;  %v1549_v16 = vand.u32 31, %v1547_v61  ;;  %v1460_v25 = vshrl.u32 %v1456_v55, 16 }
 0x1b0   : > { %v1348_v44 = vsel %vm1227_vm4, %v1347_v47, %v1346_v5  ;;  %v1449_v8 = vadd.s32 %v1448_v2, %v1438_v26  ;;  %v1468_v24 = vsel %vm1467_vm6, 1, %v3069_v53  ;;  %v1462_v62 = vshrl.u32 %v1457_v10, 16 }
 0x1b1   : > { %v4068_v31 = vsel %vm3970_vm5, %v3660_v57, %v1348_v44  ;;  %v1470_v28 = vadd.s32 %v1468_v24, %v1466_v13  ;;  %v4070_v48 = vsub.s32 32, %v1549_v16  ;;  %v4076_v49 = vadd.s32 %v1465_v34, %v1461_v52 }
 0x1b2   : > { %v1353_v9 = vmul.f32 %v4068_v31, %v4068_v31  ;;  %v4074_v46 = vadd.s32 %v1449_v8, %v1440_v63  ;;  %v4078_v38 = vshrl.u32 %v1547_v61, 5  ;;  %v1552_v60 = vshll.u32 %v3063_v35, %v1549_v16  ;;  %v283_v63 = vpop.f32.mrf.mxu3 }
 0x1b3   : > { %v1471_v45 = vadd.s32 %v1470_v28, %v1460_v25  ;;  %v1553_v27 = vshrl.u32 %v3064_v37, %v4070_v48  ;;  %v1556_v36 = vshrl.u32 %v3065_v39, %v4070_v48  ;;  %v1555_v20 = vshll.u32 %v3064_v37, %v1549_v16 }
 0x1b4   : > { %v1354_v40 = vmul.f32 -0.001358992, %v1353_v9  ;;  %v1361_v55 = vmul.f32 -0.00019511016, %v1353_v9  ;;  %v1558_v4 = vshll.u32 %v3065_v39, %v1549_v16  ;;  %vm1475_vm4 = vc.u32 %v4074_v46, %v4076_v49 }
 0x1b5   : > { %v1472_v17 = vadd.s32 %v1471_v45, %v1462_v62  ;;  %v4089_v7 = vor.u32 %v1553_v27, %v1552_v60  ;;  %v1559_v21 = vshrl.u32 %v3066_v41, %v4070_v48  ;;  %v1561_v33 = vshll.u32 %v3066_v41, %v1549_v16 }
 0x1b6   : > { %v1355_v18 = vadd.f32 0.041655596, %v1354_v40  ;;  %v1362_v10 = vadd.f32 0.008332121, %v1361_v55  ;;  %v1562_v22 = vshrl.u32 %v3067_v43, %v4070_v48  ;;  %v4096_v0 = vor.u32 %v1556_v36, %v1555_v20 }
 0x1b7   : > { %v1476_v50 = vadd.s32 1, %v1472_v17  ;;  %v1564_v59 = vshll.u32 %v3067_v43, %v1549_v16  ;;  %v1565_v23 = vshrl.u32 %v3068_v51, %v4070_v48  ;;  %v1473_v1 = vmul.u32 %v3940_v32, %v1419_v15  ;;  %v245_v16 = vpop.f32.mrf.mxu2 }
 0x1b8   : > { %v1356_v42 = vmul.f32 %v1355_v18, %v1353_v9  ;;  %v1363_v5 = vmul.f32 %v1362_v10, %v1353_v9  ;;  %v1563_v19 = vor.u32 %v1562_v22, %v1561_v33  ;;  %v1560_v52 = vor.u32 %v1559_v21, %v1558_v4 }
 0x1b9   : > { %v1477_v3 = vsel %vm1475_vm4, %v1476_v50, %v1472_v17  ;;  %v1566_v34 = vor.u32 %v1565_v23, %v1564_v59  ;;  %vm1567_vm5 = vcmp.lt.s32.totalorder %v4078_v38, 1  ;;  %vm1570_vm7 = vcmp.lt.s32.totalorder %v4078_v38, 4 }
 0x1ba   : > { %v1357_v13 = vadd.f32 -0.4999988, %v1356_v42  ;;  %v1364_v47 = vadd.f32 -0.16666654, %v1363_v5  ;;  %v1478_v26 = vadd.s32 %v1477_v3, %v1473_v1  ;;  %v1370_v2 = vand.u32 3, %v4039_v58 }
 0x1bb   : > { %v1575_v61 = vsel %vm1567_vm5, %v4089_v7, %v4096_v0  ;;  %v1576_v32 = vsel %vm1570_vm7, %v1563_v19, 920167782  ;;  %v4113_v15 = vshll.u32 %v1543_v56, 8  ;;  %vm1569_vm8 = vcmp.lt.s32.totalorder %v4078_v38, 3 }
 0x1bc   : > { %v1358_v44 = vmul.f32 %v1357_v13, %v1353_v9  ;;  %v1365_v8 = vmul.f32 %v1364_v47, %v1353_v9  ;;  %v1479_v25 = vadd.s32 536870912, %v1478_v26  ;;  %vm1568_vm9 = vcmp.lt.s32.totalorder %v4078_v38, 2 }
 0x1bd   : > { %v1577_v58 = vsel %vm1569_vm8, %v1560_v52, %v1576_v32  ;;  %v1579_v24 = vsel %vm1567_vm5, %v4096_v0, %v1560_v52  ;;  %v1580_v30 = vsel %vm1570_vm7, %v1566_v34, 1326507024  ;;  %v4129_v45 = vadd.f32 %v283_v63, %v3171_v12 }
 0x1be   : > { %v1359_v56 = vadd.f32 1.0, %v1358_v44  ;;  %v1366_v62 = vadd.f32 1.0, %v1365_v8  ;;  %v4124_v28 = vshrl.u32 %v1479_v25, 30  ;;  %v1578_v9 = vsel %vm1568_vm9, %v1575_v61, %v1577_v58 }
 0x1bf   : > { %v4132_v60 = vadd.f32 %v245_v16, %v3169_v11  ;;  %vm1368_vm10 = vweird.f32 %v3660_v57  ;;  %v1581_v27 = vsel %vm1569_vm8, %v1563_v19, %v1580_v30  ;;  %vm1371_vm11 = vcmp.lt.s32.totalorder %v1370_v2, 2 }
 0x1c0   : > { %v1367_v36 = vmul.f32 %v1366_v62, %v4068_v31  ;;  %v1376_v40 = vxor.u32 2147483648, %v1359_v56  ;;  %v1481_v55 = vshll.u32 %v4124_v28, 30  ;;  %vm1372_vm12 = vcmp.eq.s32.totalorder %v1370_v2, 0 }
 0x1c1   : > { %vm1375_vm13 = vcmp.eq.s32.totalorder %v1370_v2, 2  ;;  %v1582_v20 = vsel %vm1568_vm9, %v1579_v24, %v1581_v27  ;;  %v1609_v4 = vshrl.u32 %v1578_v9, 16  ;;  %v1584_v18 = vand.u32 65535, %v4113_v15 }
 0x1c2   : > { %v1373_v17 = vxor.u32 2147483648, %v1367_v36  ;;  %v1482_v21 = vsub.s32 %v1478_v26, %v1481_v55  ;;  %v1608_v10 = vand.u32 65535, %v1578_v9  ;;  %v1551_v33 = vshrl.u32 %v3063_v35, %v4070_v48 }
 0x1c3   : > { %v1585_v31 = vshrl.u32 %v4113_v15, 16  ;;  %v1586_v22 = vand.u32 65535, %v1582_v20  ;;  %v1587_v50 = vshrl.u32 %v1582_v20, 16  ;;  %v1377_v23 = vsel %vm1375_vm13, %v1376_v40, %v1367_v36 }
 0x1c4   : > { %v1374_v59 = vsel %vm1372_vm12, %v1359_v56, %v1373_v17  ;;  %vm1483_vm14 = vcmp.lt.s32.totalorder %v1482_v21, 0  ;;  %v1484_v42 = vsub.s32 0, %v1482_v21  ;;  %v1611_v3 = vmul.u32 %v1609_v4, %v1584_v18 }
 0x1c5   : > { %v1378_v5 = vsel %vm1371_vm11, %v1374_v59, %v1377_v23  ;;  %v1589_v1 = vmul.u32 %v1587_v50, %v1584_v18  ;;  %v1590_v19 = vmul.u32 %v1586_v22, %v1585_v31  ;;  %v1474_v48 = vadd.s32 %v4076_v49, %v4074_v46 }
 0x1c6   : > { %v1379_v34 = vsel %vm1368_vm10, nan, %v1378_v5  ;;  %v1485_v13 = vsel %vm1483_vm14, %v1484_v42, %v1482_v21  ;;  %v1612_v47 = vmul.u32 %v1608_v10, %v1585_v31  ;;  %v1572_v61 = vsel %vm1570_vm7, %v1560_v52, 2102212464 }
 0x1c7   : > { %v1486_v26 = vclz %v1485_v13  ;;  %v1588_v32 = vmul.u32 %v1586_v22, %v1584_v18  ;;  %v1592_v63 = vshll.u32 %v1589_v1, 16  ;;  %2781 = vst [vmem:[%s3480_s10 + $0x30] sm:$0xff] %v1379_v34  ;;  %v1571_v2 = vsel %vm1567_vm5, %v1551_v33, %v4089_v7 }
 0x1c8   : > { %v1591_v16 = vmul.u32 %v1587_v50, %v1585_v31  ;;  %v1594_v44 = vshll.u32 %v1590_v19, 16  ;;  %v1610_v57 = vmul.u32 %v1608_v10, %v1584_v18  ;;  %v1614_v46 = vshll.u32 %v1611_v3, 16 }
 0x1c9   : > { %v2915_v8 = vadd.s32 4294967294, %v1486_v26  ;;  %vm1596_vm15 = vc.u32 %v1588_v32, %v1592_v63  ;;  %v1598_v25 = vadd.s32 %v1592_v63, %v1588_v32  ;;  %v1573_v49 = vsel %vm1569_vm8, %v4096_v0, %v1572_v61 }
 0x1ca   : > { %v1597_v52 = vsel %vm1596_vm15, 1, %v3069_v53  ;;  %v1613_v58 = vmul.u32 %v1609_v4, %v1585_v31  ;;  %v1616_v24 = vshll.u32 %v1612_v47, 16  ;;  %vm1618_vm1 = vc.u32 %v1610_v57, %v1614_v46 }
 0x1cb   : > { %vm2916_vm2 = vcmp.lt.s32.totalorder %v2915_v8, 0  ;;  %v1599_v30 = vadd.s32 %v1597_v52, %v1591_v16  ;;  %vm1600_vm0 = vc.u32 %v1598_v25, %v1594_v44  ;;  %v1619_v62 = vsel %vm1618_vm1, 1, %v3069_v53 }
 0x1cc   : > { %v1489_v7 = vsel %vm2916_vm2, 0, %v2915_v8  ;;  %v1601_v56 = vsel %vm1600_vm0, 1, %v3069_v53  ;;  %v1620_v9 = vadd.s32 %v1614_v46, %v1610_v57  ;;  %v1593_v40 = vshrl.u32 %v1589_v1, 16 }
 0x1cd   : > { %v1490_v27 = vsub.s32 32, %v1489_v7  ;;  %v1494_v36 = vsub.s32 4294967266, %v1489_v7  ;;  %v1603_v55 = vadd.s32 %v1601_v56, %v1599_v30  ;;  %v1491_v20 = vshll.u32 %v1482_v21, %v1489_v7 }
 0x1ce   : > { %v1595_v0 = vshrl.u32 %v1590_v19, 16  ;;  %v1621_v17 = vadd.s32 %v1619_v62, %v1613_v58  ;;  %vm1622_vm3 = vc.u32 %v1620_v9, %v1616_v24  ;;  %v1504_v31 = vsub.s32 4, %v4124_v28 }
 0x1cf   : > { %v1492_v4 = vshrl.u32 %v1474_v48, %v1490_v27  ;;  %v1495_v18 = vadd.s32 127, %v1494_v36  ;;  %v1604_v10 = vadd.s32 %v1603_v55, %v1593_v40  ;;  %v1623_v33 = vsel %vm1622_vm3, 1, %v3069_v53 }
 0x1d0   : > { %v1615_v22 = vshrl.u32 %v1611_v3, 16  ;;  %v1625_v50 = vadd.s32 %v1623_v33, %v1621_v17  ;;  %v1690_v59 = vand.u32 2147483647, %v4129_v45  ;;  %v1693_v1 = vand.u32 2139095040, %v4129_v45 }
 0x1d1   : > { %v1493_v23 = vor.u32 %v1492_v4, %v1491_v20  ;;  %v1496_v42 = vshll.u32 %v1495_v18, 23  ;;  %v1605_v5 = vadd.s32 %v1604_v10, %v1595_v0  ;;  %v1617_v21 = vshrl.u32 %v1612_v47, 16 }
 0x1d2   : > { %v1626_v19 = vadd.s32 %v1625_v50, %v1615_v22  ;;  %vm1382_vm6 = vcmp.lt.s32.totalorder %v3894_v14, 0  ;;  %v1574_v48 = vsel %vm1568_vm9, %v1571_v2, %v1573_v49  ;;  %v1624_v13 = vadd.s32 %v1620_v9, %v1616_v24 }
 0x1d3   : > { %v1497_v34 = vor.u32 4788187, %v1496_v42  ;;  %v1505_v3 = vsel %vm1382_vm6, %v1504_v31, %v4124_v28  ;;  %v1694_v61 = vshrl.u32 %v1693_v1, 23  ;;  %v1697_v32 = vand.u32 8388607, %v1690_v59 }
 0x1d4   : > { %v1627_v26 = vadd.s32 %v1626_v19, %v1617_v21  ;;  %v1500_v16 = vcvt.s32.f32 %v1493_v23  ;;  %vm1630_vm4 = vc.u32 %v1605_v5, %v1624_v13  ;;  %v1848_v47 = vand.u32 2139095040, %v4132_v60 }
 0x1d5   : > { %v1498_v63 = vand.u32 2147483647, %v1497_v34  ;;  %vm4177_vm5 = vcmp.le.f32.partialorder %v1380_v29, 0.7853982  ;;  %v2920_v44 = vadd.s32 4294967169, %v1694_v61  ;;  %v1628_v8 = vmul.u32 %v4113_v15, %v1574_v48 }
 0x1d6   : > { %v1631_v2 = vadd.s32 1, %v1627_v26  ;;  %v1507_v28 = vsel %vm4177_vm5, 0, %v1505_v3  ;;  %v1698_v46 = vor.u32 8388608, %v1697_v32  ;;  %v1845_v52 = vand.u32 2147483647, %v4132_v60 }
 0x1d7   : > { %v1501_v57 = vmul.f32 %v1500_v16, %v1498_v63  ;;  %v1700_v49 = vadd.s32 1, %v2920_v44  ;;  %v1849_v30 = vshrl.u32 %v1848_v47, 23  ;;  %v1524_v29 = vadd.s32 3, %v1507_v28 }
 0x1d8   : > { %v1632_v25 = vsel %vm1630_vm4, %v1631_v2, %v1627_v26  ;;  %v4192_v27 = vshll.u32 %v1698_v46, 8  ;;  %v4196_v36 = vand.u32 8388607, %v1845_v52  ;;  %vm4204_vm8 = vcmp.le.f32.partialorder %v1535_v54, 0.7853982 }
 0x1d9   : > { %v1502_v58 = vxor.u32 2147483648, %v1501_v57  ;;  %v1633_v24 = vadd.s32 %v1632_v25, %v1628_v8  ;;  %vm1701_vm7 = vcmp.gt.s32.totalorder %v1700_v49, 0  ;;  %v2923_v20 = vadd.s32 4294967169, %v1849_v30 }
 0x1da   : > { %v1702_v62 = vsel %vm1701_vm7, %v1700_v49, 0  ;;  %v4200_v0 = vand.u32 3, %v1524_v29  ;;  %vm1537_vm9 = vcmp.lt.s32.totalorder %v3921_v6, 0  ;;  %v1629_v22 = vadd.s32 %v1624_v13, %v1605_v5 }
 0x1db   : > { %v1503_v7 = vsel %vm1382_vm6, %v1502_v58, %v1501_v57  ;;  %v1634_v56 = vadd.s32 536870912, %v1633_v24  ;;  %v1704_v15 = vand.u32 31, %v1702_v62  ;;  %v4210_v50 = vand.u32 65535, %v4192_v27 }
 0x1dc   : > { %v4190_v9 = vsel %vm4177_vm5, %v3894_v14, %v1503_v7  ;;  %v4213_v23 = vshrl.u32 %v4192_v27, 16  ;;  %v1853_v42 = vor.u32 8388608, %v4196_v36  ;;  %v4218_v19 = vadd.s32 1, %v2923_v20  ;;  %v286_v36 = vpop.f32.mrf.mxu3 }
 0x1dd   : > { %v1508_v40 = vmul.f32 %v4190_v9, %v4190_v9  ;;  %v1635_v55 = vshrl.u32 %v1634_v56, 30  ;;  %v1705_v4 = vsub.s32 32, %v1704_v15  ;;  %v4224_v48 = vshrl.u32 %v1702_v62, 5 }
 0x1de   : > { %v1707_v5 = vshll.u32 %v3063_v35, %v1704_v15  ;;  %v1710_v32 = vshll.u32 %v3064_v37, %v1704_v15  ;;  %v1713_v16 = vshll.u32 %v3065_v39, %v1704_v15  ;;  %vm1527_vm11 = vcmp.eq.s32.totalorder %v4200_v0, 0 }
 0x1df   : > { %v1509_v18 = vmul.f32 -0.001358992, %v1508_v40  ;;  %v1516_v10 = vmul.f32 -0.00019511016, %v1508_v40  ;;  %v1636_v33 = vshll.u32 %v1635_v55, 30  ;;  %v1659_v31 = vsub.s32 4, %v1635_v55 }
 0x1e0   : > { %v1708_v13 = vshrl.u32 %v3064_v37, %v1705_v4  ;;  %v1711_v63 = vshrl.u32 %v3065_v39, %v1705_v4  ;;  %v1714_v47 = vshrl.u32 %v3066_v41, %v1705_v4  ;;  %v1717_v57 = vshrl.u32 %v3067_v43, %v1705_v4 }
 0x1e1   : > { %v1510_v54 = vadd.f32 0.041655596, %v1509_v18  ;;  %v1517_v1 = vadd.f32 0.008332121, %v1516_v10  ;;  %v4216_v21 = vsub.s32 %v1633_v24, %v1636_v33  ;;  %v4222_v34 = vsel %vm1537_vm9, %v1659_v31, %v1635_v55 }
 0x1e2   : > { %vm1530_vm12 = vcmp.eq.s32.totalorder %v4200_v0, 2  ;;  %v1662_v8 = vsel %vm4204_vm8, 0, %v4222_v34  ;;  %v1706_v25 = vshrl.u32 %v3063_v35, %v1705_v4  ;;  %v1720_v46 = vshrl.u32 %v3068_v51, %v1705_v4 }
 0x1e3   : > { %v1511_v3 = vmul.f32 %v1510_v54, %v1508_v40  ;;  %v1518_v26 = vmul.f32 %v1517_v1, %v1508_v40  ;;  %vm1638_vm10 = vcmp.lt.s32.totalorder %v4216_v21, 0  ;;  %v1639_v61 = vsub.s32 0, %v4216_v21 }
 0x1e4   : > { %vm1526_vm13 = vcmp.lt.s32.totalorder %v4200_v0, 2  ;;  %v1709_v24 = vor.u32 %v1708_v13, %v1707_v5  ;;  %v1716_v30 = vshll.u32 %v3066_v41, %v1704_v15  ;;  %vm1523_vm14 = vweird.f32 %v3894_v14 }
 0x1e5   : > { %v1512_v38 = vadd.f32 -0.4999988, %v1511_v3  ;;  %v1519_v2 = vadd.f32 -0.16666654, %v1518_v26  ;;  %v1640_v44 = vsel %vm1638_vm10, %v1639_v61, %v4216_v21  ;;  %v1712_v7 = vor.u32 %v1711_v63, %v1710_v32 }
 0x1e6   : > { %v1641_v28 = vclz %v1640_v44  ;;  %v1715_v56 = vor.u32 %v1714_v47, %v1713_v16  ;;  %v1719_v62 = vshll.u32 %v3067_v43, %v1704_v15  ;;  %v1718_v18 = vor.u32 %v1717_v57, %v1716_v30 }
 0x1e7   : > { %v1513_v49 = vmul.f32 %v1512_v38, %v1508_v40  ;;  %v1520_v58 = vmul.f32 %v1519_v2, %v1508_v40  ;;  %vm1722_vm15 = vcmp.lt.s32.totalorder %v4224_v48, 1  ;;  %vm1723_vm0 = vcmp.lt.s32.totalorder %v4224_v48, 2 }
 0x1e8   : > { %v2918_v29 = vadd.s32 4294967294, %v1641_v28  ;;  %v1721_v4 = vor.u32 %v1720_v46, %v1719_v62  ;;  %vm1724_vm1 = vcmp.lt.s32.totalorder %v4224_v48, 3  ;;  %vm1725_vm3 = vcmp.lt.s32.totalorder %v4224_v48, 4 }
 0x1e9   : > { %v1514_v55 = vadd.f32 1.0, %v1513_v49  ;;  %v1521_v20 = vadd.f32 1.0, %v1520_v58  ;;  %v1727_v15 = vsel %vm1725_vm3, %v1715_v56, 2102212464  ;;  %v1730_v1 = vsel %vm1722_vm15, %v1709_v24, %v1712_v7 }
 0x1ea   : > { %vm2919_vm2 = vcmp.lt.s32.totalorder %v2918_v29, 0  ;;  %v1731_v13 = vsel %vm1725_vm3, %v1718_v18, 920167782  ;;  %v1734_v3 = vsel %vm1722_vm15, %v1712_v7, %v1715_v56  ;;  %v1735_v32 = vsel %vm1725_vm3, %v1721_v4, 1326507024 }
 0x1eb   : > { %v1522_v40 = vmul.f32 %v1521_v20, %v4190_v9  ;;  %v1531_v10 = vxor.u32 2147483648, %v1514_v55  ;;  %v1644_v33 = vsel %vm2919_vm2, 0, %v2918_v29  ;;  %v1732_v9 = vsel %vm1724_vm1, %v1715_v56, %v1731_v13 }
 0x1ec   : > { %v1645_v31 = vsub.s32 32, %v1644_v33  ;;  %v1649_v54 = vsub.s32 4294967266, %v1644_v33  ;;  %v1646_v5 = vshll.u32 %v4216_v21, %v1644_v33  ;;  %v1733_v21 = vsel %vm1723_vm0, %v1730_v1, %v1732_v9 }
 0x1ed   : > { %v1528_v34 = vxor.u32 2147483648, %v1522_v40  ;;  %v1532_v16 = vsel %vm1530_vm12, %v1531_v10, %v1522_v40  ;;  %v1736_v47 = vsel %vm1724_vm1, %v1718_v18, %v1735_v32  ;;  %v1763_v49 = vand.u32 65535, %v1733_v21 }
 0x1ee   : > { %v1647_v26 = vshrl.u32 %v1629_v22, %v1645_v31  ;;  %v1650_v61 = vadd.s32 127, %v1649_v54  ;;  %v1737_v44 = vsel %vm1723_vm0, %v1734_v3, %v1736_v47  ;;  %v1726_v30 = vsel %vm1722_vm15, %v1706_v25, %v1709_v24 }
 0x1ef   : > { %v1529_v63 = vsel %vm1527_vm11, %v1514_v55, %v1528_v34  ;;  %v1741_v28 = vand.u32 65535, %v1737_v44  ;;  %v1742_v46 = vshrl.u32 %v1737_v44, 16  ;;  %v1728_v29 = vsel %vm1724_vm1, %v1712_v7, %v1727_v15 }
 0x1f0   : > { %v1533_v22 = vsel %vm1526_vm13, %v1529_v63, %v1532_v16  ;;  %v1648_v38 = vor.u32 %v1647_v26, %v1646_v5  ;;  %v1651_v2 = vshll.u32 %v1650_v61, 23  ;;  %v1764_v0 = vshrl.u32 %v1733_v21, 16 }
 0x1f1   : > { %v1534_v57 = vsel %vm1523_vm14, nan, %v1533_v22  ;;  %v4278_v56 = vadd.s32 3, %v1662_v8  ;;  %v1744_v62 = vmul.u32 %v1742_v46, %v4210_v50  ;;  %v1745_v55 = vmul.u32 %v1741_v28, %v4213_v23 }
 0x1f2   : > { %v1652_v58 = vor.u32 4788187, %v1651_v2  ;;  %2782 = vst [vmem:[%s3480_s10 + $0x38] sm:$0xff] %v1534_v57  ;;  %vm1856_vm6 = vcmp.gt.s32.totalorder %v4218_v19, 0  ;;  %v1655_v20 = vcvt.s32.f32 %v1648_v38  ;;  %v1766_v18 = vmul.u32 %v1764_v0, %v4210_v50 }
 0x1f3   : > { %v1767_v4 = vmul.u32 %v1763_v49, %v4213_v23  ;;  %v4287_v25 = vsel %vm1723_vm0, %v1726_v30, %v1728_v29  ;;  %v1743_v24 = vmul.u32 %v1741_v28, %v4210_v50  ;;  %v1746_v8 = vmul.u32 %v1742_v46, %v4213_v23 }
 0x1f4   : > { %v1653_v14 = vand.u32 2147483647, %v1652_v58  ;;  %v1747_v7 = vshll.u32 %v1744_v62, 16  ;;  %v1749_v10 = vshll.u32 %v1745_v55, 16  ;;  %v1765_v33 = vmul.u32 %v1763_v49, %v4210_v50 }
 0x1f5   : > { %v1769_v31 = vshll.u32 %v1766_v18, 16  ;;  %v1768_v15 = vmul.u32 %v1764_v0, %v4213_v23  ;;  %v1771_v1 = vshll.u32 %v1767_v4, 16  ;;  %v1857_v26 = vsel %vm1856_vm6, %v4218_v19, 0 }
 0x1f6   : > { %v1656_v40 = vmul.f32 %v1655_v20, %v1653_v14  ;;  %vm1751_vm4 = vc.u32 %v1743_v24, %v1747_v7  ;;  %v1753_v54 = vadd.s32 %v1747_v7, %v1743_v24  ;;  %v1748_v32 = vshrl.u32 %v1744_v62, 16 }
 0x1f7   : > { %v1752_v48 = vsel %vm1751_vm4, 1, %v3069_v53  ;;  %vm1773_vm5 = vc.u32 %v1765_v33, %v1769_v31  ;;  %v1775_v5 = vadd.s32 %v1769_v31, %v1765_v33  ;;  %v1770_v47 = vshrl.u32 %v1766_v18, 16 }
 0x1f8   : > { %v1657_v34 = vxor.u32 2147483648, %v1656_v40  ;;  %v1754_v13 = vadd.s32 %v1752_v48, %v1746_v8  ;;  %vm1755_vm7 = vc.u32 %v1753_v54, %v1749_v10  ;;  %v1774_v3 = vsel %vm1773_vm5, 1, %v3069_v53 }
 0x1f9   : > { %v1756_v61 = vsel %vm1755_vm7, 1, %v3069_v53  ;;  %v1776_v23 = vadd.s32 %v1774_v3, %v1768_v15  ;;  %vm1777_vm10 = vc.u32 %v1775_v5, %v1771_v1  ;;  %v1859_v38 = vand.u32 31, %v1857_v26 }
 0x1fa   : > { %v1658_v50 = vsel %vm1537_vm9, %v1657_v34, %v1656_v40  ;;  %v1758_v63 = vadd.s32 %v1756_v61, %v1754_v13  ;;  %v1778_v16 = vsel %vm1777_vm10, 1, %v3069_v53  ;;  %v1750_v19 = vshrl.u32 %v1745_v55, 16 }
 0x1fb   : > { %v1661_v9 = vsel %vm4204_vm8, %v3921_v6, %v1658_v50  ;;  %v1780_v22 = vadd.s32 %v1778_v16, %v1776_v23  ;;  %v1772_v44 = vshrl.u32 %v1767_v4, 16  ;;  %v1783_v57 = vmul.u32 %v4192_v27, %v4287_v25 }
 0x1fc   : > { %v1663_v21 = vmul.f32 %v1661_v9, %v1661_v9  ;;  %v1759_v2 = vadd.s32 %v1758_v63, %v1748_v32  ;;  %v4307_v58 = vsub.s32 32, %v1859_v38  ;;  %v4311_v30 = vadd.s32 %v1775_v5, %v1771_v1 }
 0x1fd   : > { %v1781_v49 = vadd.s32 %v1780_v22, %v1770_v47  ;;  %v4313_v29 = vshrl.u32 %v1857_v26, 5  ;;  %v1862_v0 = vshll.u32 %v3063_v35, %v1859_v38  ;;  %v1865_v20 = vshll.u32 %v3064_v37, %v1859_v38 }
 0x1fe   : > { %v1664_v28 = vmul.f32 -0.001358992, %v1663_v21  ;;  %v1671_v46 = vmul.f32 -0.00019511016, %v1663_v21  ;;  %v4309_v17 = vadd.s32 %v1759_v2, %v1750_v19  ;;  %v1863_v27 = vshrl.u32 %v3064_v37, %v4307_v58 }
 0x1ff   : > { %v1782_v14 = vadd.s32 %v1781_v49, %v1772_v44  ;;  %v1866_v18 = vshrl.u32 %v3065_v39, %v4307_v58  ;;  %v1868_v4 = vshll.u32 %v3065_v39, %v1859_v38  ;;  %v1869_v7 = vshrl.u32 %v3066_v41, %v4307_v58 }
 0x200   : > { %v1665_v62 = vadd.f32 0.041655596, %v1664_v28  ;;  %v1672_v55 = vadd.f32 0.008332121, %v1671_v46  ;;  %vm1785_vm8 = vc.u32 %v4309_v17, %v4311_v30  ;;  %v4326_v40 = vor.u32 %v1863_v27, %v1862_v0 }
 0x201   : > { %v1786_v8 = vadd.s32 1, %v1782_v14  ;;  %v4328_v10 = vor.u32 %v1866_v18, %v1865_v20  ;;  %v1871_v33 = vshll.u32 %v3066_v41, %v1859_v38  ;;  %v1872_v31 = vshrl.u32 %v3067_v43, %v4307_v58 }
 0x202   : > { %v1666_v25 = vmul.f32 %v1665_v62, %v1663_v21  ;;  %v1673_v24 = vmul.f32 %v1672_v55, %v1663_v21  ;;  %v4333_v34 = vor.u32 %v1869_v7, %v1868_v4  ;;  %v1874_v13 = vshll.u32 %v3067_v43, %v1859_v38 }
 0x203   : > { %v1787_v1 = vsel %vm1785_vm8, %v1786_v8, %v1782_v14  ;;  %v1873_v5 = vor.u32 %v1872_v31, %v1871_v33  ;;  %v1875_v3 = vshrl.u32 %v3068_v51, %v4307_v58  ;;  %v1680_v61 = vand.u32 3, %v4278_v56 }
 0x204   : > { %v1667_v54 = vadd.f32 -0.4999988, %v1666_v25  ;;  %v1674_v15 = vadd.f32 -0.16666654, %v1673_v24  ;;  %v1788_v48 = vadd.s32 %v1787_v1, %v1783_v57  ;;  %vm1877_vm9 = vcmp.lt.s32.totalorder %v4313_v29, 1  ;;  %v248_v24 = vpop.f32.mrf.mxu2 }
 0x205   : > { %v1876_v32 = vor.u32 %v1875_v3, %v1874_v13  ;;  %vm1878_vm11 = vcmp.lt.s32.totalorder %v4313_v29, 2  ;;  %vm1880_vm12 = vcmp.lt.s32.totalorder %v4313_v29, 4  ;;  %vm1879_vm13 = vcmp.lt.s32.totalorder %v4313_v29, 3 }
 0x206   : > { %v1668_v26 = vmul.f32 %v1667_v54, %v1663_v21  ;;  %v1675_v50 = vmul.f32 %v1674_v15, %v1663_v21  ;;  %v1789_v23 = vadd.s32 536870912, %v1788_v48  ;;  %v1886_v47 = vsel %vm1880_vm12, %v1873_v5, 920167782 }
 0x207   : > { %v1885_v56 = vsel %vm1877_vm9, %v4326_v40, %v4328_v10  ;;  %v1889_v21 = vsel %vm1877_vm9, %v4328_v10, %v4333_v34  ;;  %v1890_v38 = vsel %vm1880_vm12, %v1876_v32, 1326507024  ;;  %v1887_v44 = vsel %vm1879_vm13, %v4333_v34, %v1886_v47 }
 0x208   : > { %v1669_v63 = vadd.f32 1.0, %v1668_v26  ;;  %v1676_v16 = vadd.f32 1.0, %v1675_v50  ;;  %v4345_v22 = vshrl.u32 %v1789_v23, 30  ;;  %v1891_v57 = vsel %vm1879_vm13, %v1873_v5, %v1890_v38 }
 0x209   : > { %v1892_v46 = vsel %vm1878_vm11, %v1889_v21, %v1891_v57  ;;  %v4367_v49 = vshll.u32 %v1853_v42, 8  ;;  %vm1681_vm14 = vcmp.lt.s32.totalorder %v1680_v61, 2  ;;  %vm1682_vm15 = vcmp.eq.s32.totalorder %v1680_v61, 0 }
 0x20a   : > { %v1677_v19 = vmul.f32 %v1676_v16, %v1661_v9  ;;  %v1686_v2 = vxor.u32 2147483648, %v1669_v63  ;;  %v1791_v28 = vshll.u32 %v4345_v22, 30  ;;  %v1896_v9 = vand.u32 65535, %v1892_v46 }
 0x20b   : > { %v1897_v62 = vshrl.u32 %v1892_v46, 16  ;;  %vm1685_vm2 = vcmp.eq.s32.totalorder %v1680_v61, 2  ;;  %v1888_v14 = vsel %vm1878_vm11, %v1885_v56, %v1887_v44  ;;  %v1894_v18 = vand.u32 65535, %v4367_v49 }
 0x20c   : > { %v1683_v0 = vxor.u32 2147483648, %v1677_v19  ;;  %v1792_v55 = vsub.s32 %v1788_v48, %v1791_v28  ;;  %v1687_v27 = vsel %vm1685_vm2, %v1686_v2, %v1677_v19  ;;  %v1895_v4 = vshrl.u32 %v4367_v49, 16 }
 0x20d   : > { %vm1678_vm0 = vweird.f32 %v3921_v6  ;;  %v1899_v7 = vmul.u32 %v1897_v62, %v1894_v18  ;;  %v1919_v31 = vshrl.u32 %v1888_v14, 16  ;;  %v1918_v15 = vand.u32 65535, %v1888_v14 }
 0x20e   : > { %v1684_v20 = vsel %vm1682_vm15, %v1669_v63, %v1683_v0  ;;  %vm1793_vm1 = vcmp.lt.s32.totalorder %v1792_v55, 0  ;;  %v1794_v25 = vsub.s32 0, %v1792_v55  ;;  %v1900_v33 = vmul.u32 %v1896_v9, %v1895_v4 }
 0x20f   : > { %v1688_v42 = vsel %vm1681_vm14, %v1684_v20, %v1687_v27  ;;  %v4376_v1 = vadd.f32 %v286_v36, %v3171_v12  ;;  %v1898_v5 = vmul.u32 %v1896_v9, %v1894_v18  ;;  %v1902_v13 = vshll.u32 %v1899_v7, 16 }
 0x210   : > { %v1689_v8 = vsel %vm1678_vm0, nan, %v1688_v42  ;;  %v1795_v54 = vsel %vm1793_vm1, %v1794_v25, %v1792_v55  ;;  %v4379_v3 = vadd.f32 %v248_v24, %v3169_v11  ;;  %v1861_v6 = vshrl.u32 %v3063_v35, %v4307_v58 }
 0x211   : > { %2783 = vst [vmem:[%s3480_s10 + $0x40] sm:$0xff] %v1689_v8  ;;  %v1796_v48 = vclz %v1795_v54  ;;  %v1901_v26 = vmul.u32 %v1897_v62, %v1895_v4  ;;  %v1904_v50 = vshll.u32 %v1900_v33, 16  ;;  %vm1906_vm3 = vc.u32 %v1898_v5, %v1902_v13 }
 0x212   : > { %v1908_v23 = vadd.s32 %v1902_v13, %v1898_v5  ;;  %v1921_v32 = vmul.u32 %v1919_v31, %v1894_v18  ;;  %vm1692_vm6 = vcmp.lt.s32.totalorder %v4129_v45, 0  ;;  %v1784_v63 = vadd.s32 %v4311_v30, %v4309_v17 }
 0x213   : > { %v2921_v61 = vadd.s32 4294967294, %v1796_v48  ;;  %v1814_v16 = vsub.s32 4, %v4345_v22  ;;  %v1907_v47 = vsel %vm1906_vm3, 1, %v3069_v53  ;;  %v1922_v56 = vmul.u32 %v1918_v15, %v1895_v4 }
 0x214   : > { %v1909_v21 = vadd.s32 %v1907_v47, %v1901_v26  ;;  %vm1910_vm5 = vc.u32 %v1908_v23, %v1904_v50  ;;  %v1924_v58 = vshll.u32 %v1921_v32, 16  ;;  %v1903_v19 = vshrl.u32 %v1899_v7, 16 }
 0x215   : > { %vm2922_vm4 = vcmp.lt.s32.totalorder %v2921_v61, 0  ;;  %v1911_v2 = vsel %vm1910_vm5, 1, %v3069_v53  ;;  %v1920_v44 = vmul.u32 %v1918_v15, %v1894_v18  ;;  %v1923_v0 = vmul.u32 %v1919_v31, %v1895_v4 }
 0x216   : > { %v1799_v38 = vsel %vm2922_vm4, 0, %v2921_v61  ;;  %v1913_v46 = vadd.s32 %v1911_v2, %v1909_v21  ;;  %v1926_v17 = vshll.u32 %v1922_v56, 16  ;;  %v1882_v36 = vsel %vm1880_vm12, %v4333_v34, 2102212464 }
 0x217   : > { %v1800_v57 = vsub.s32 32, %v1799_v38  ;;  %v1804_v28 = vsub.s32 4294967266, %v1799_v38  ;;  %v1801_v9 = vshll.u32 %v1792_v55, %v1799_v38  ;;  %vm1928_vm7 = vc.u32 %v1920_v44, %v1924_v58 }
 0x218   : > { %v1930_v30 = vadd.s32 %v1924_v58, %v1920_v44  ;;  %v1914_v20 = vadd.s32 %v1913_v46, %v1903_v19  ;;  %v1929_v27 = vsel %vm1928_vm7, 1, %v3069_v53  ;;  %v2000_v18 = vand.u32 2147483647, %v4376_v1 }
 0x219   : > { %v1802_v62 = vshrl.u32 %v1784_v63, %v1800_v57  ;;  %v1805_v14 = vadd.s32 127, %v1804_v28  ;;  %v1931_v42 = vadd.s32 %v1929_v27, %v1923_v0  ;;  %v1905_v4 = vshrl.u32 %v1900_v33, 16 }
 0x21a   : > { %vm1932_vm10 = vc.u32 %v1930_v30, %v1926_v17  ;;  %v1881_v8 = vsel %vm1877_vm9, %v1861_v6, %v4326_v40  ;;  %v1925_v7 = vshrl.u32 %v1921_v32, 16  ;;  %v2003_v54 = vand.u32 2139095040, %v4376_v1 }
 0x21b   : > { %v1803_v25 = vor.u32 %v1802_v62, %v1801_v9  ;;  %v1806_v24 = vshll.u32 %v1805_v14, 23  ;;  %v1933_v55 = vsel %vm1932_vm10, 1, %v3069_v53  ;;  %v1815_v34 = vsel %vm1692_vm6, %v1814_v16, %v4345_v22 }
 0x21c   : > { %v1935_v31 = vadd.s32 %v1933_v55, %v1931_v42  ;;  %v1883_v48 = vsel %vm1879_vm13, %v4328_v10, %v1882_v36  ;;  %v1915_v33 = vadd.s32 %v1914_v20, %v1905_v4  ;;  %v1927_v5 = vshrl.u32 %v1922_v56, 16 }
 0x21d   : > { %v1807_v15 = vor.u32 4788187, %v1806_v24  ;;  %v2004_v26 = vshrl.u32 %v2003_v54, 23  ;;  %v2007_v40 = vand.u32 8388607, %v2000_v18  ;;  %v1810_v50 = vcvt.s32.f32 %v1803_v25 }
 0x21e   : > { %v1936_v13 = vadd.s32 %v1935_v31, %v1925_v7  ;;  %v1934_v61 = vadd.s32 %v1930_v30, %v1926_v17  ;;  %vm4409_vm8 = vcmp.le.f32.partialorder %v1690_v59, 0.7853982  ;;  %v1884_v22 = vsel %vm1878_vm11, %v1881_v8, %v1883_v48 }
 0x21f   : > { %v1808_v6 = vand.u32 2147483647, %v1807_v15  ;;  %v2926_v32 = vadd.s32 4294967169, %v2004_v26  ;;  %v1817_v16 = vsel %vm4409_vm8, 0, %v1815_v34  ;;  %v2008_v56 = vor.u32 8388608, %v2007_v40 }
 0x220   : > { %v1937_v10 = vadd.s32 %v1936_v13, %v1927_v5  ;;  %vm1940_vm9 = vc.u32 %v1915_v33, %v1934_v61  ;;  %v2158_v58 = vand.u32 2139095040, %v4379_v3  ;;  %v1938_v59 = vmul.u32 %v4367_v49, %v1884_v22 }
 0x221   : > { %v1811_v63 = vmul.f32 %v1810_v50, %v1808_v6  ;;  %v2010_v21 = vadd.s32 1, %v2926_v32  ;;  %v1834_v2 = vadd.s32 3, %v1817_v16  ;;  %v4424_v0 = vshll.u32 %v2008_v56, 8 }
 0x222   : > { %v1941_v47 = vadd.s32 1, %v1937_v10  ;;  %v2159_v9 = vshrl.u32 %v2158_v58, 23  ;;  %vm1847_vm11 = vcmp.lt.s32.totalorder %v4132_v60, 0  ;;  %v4431_v36 = vadd.s32 %v1934_v61, %v1915_v33 }
 0x223   : > { %v1812_v38 = vxor.u32 2147483648, %v1811_v63  ;;  %vm2011_vm12 = vcmp.gt.s32.totalorder %v2010_v21, 0  ;;  %v4428_v20 = vand.u32 3, %v1834_v2  ;;  %v4434_v42 = vand.u32 65535, %v4424_v0 }
 0x224   : > { %v1942_v19 = vsel %vm1940_vm9, %v1941_v47, %v1937_v10  ;;  %v2012_v57 = vsel %vm2011_vm12, %v2010_v21, 0  ;;  %v2155_v25 = vand.u32 2147483647, %v4379_v3  ;;  %v2929_v24 = vadd.s32 4294967169, %v2159_v9 }
 0x225   : > { %v1813_v29 = vsel %vm1692_vm6, %v1812_v38, %v1811_v63  ;;  %v1943_v44 = vadd.s32 %v1942_v19, %v1938_v59  ;;  %v2014_v46 = vand.u32 31, %v2012_v57  ;;  %v4438_v7 = vshrl.u32 %v4424_v0, 16 }
 0x226   : > { %v1816_v28 = vsel %vm4409_vm8, %v4129_v45, %v1813_v29  ;;  %v4440_v31 = vshrl.u32 %v2012_v57, 5  ;;  %vm1840_vm13 = vcmp.eq.s32.totalorder %v4428_v20, 2  ;;  %vm1837_vm15 = vcmp.eq.s32.totalorder %v4428_v20, 0 }
 0x227   : > { %v1818_v17 = vmul.f32 %v1816_v28, %v1816_v28  ;;  %v1944_v30 = vadd.s32 536870912, %v1943_v44  ;;  %v4426_v62 = vsub.s32 32, %v2014_v46  ;;  %v2017_v54 = vshll.u32 %v3063_v35, %v2014_v46 }
 0x228   : > { %v2020_v40 = vshll.u32 %v3064_v37, %v2014_v46  ;;  %v2026_v50 = vshll.u32 %v3066_v41, %v2014_v46  ;;  %v2023_v63 = vshll.u32 %v3065_v39, %v2014_v46  ;;  %vm1836_vm2 = vcmp.lt.s32.totalorder %v4428_v20, 2 }
 0x229   : > { %v1819_v49 = vmul.f32 -0.001358992, %v1818_v17  ;;  %v1826_v14 = vmul.f32 -0.00019511016, %v1818_v17  ;;  %v1945_v27 = vshrl.u32 %v1944_v30, 30  ;;  %v2018_v15 = vshrl.u32 %v3064_v37, %v4426_v62 }
 0x22a   : > { %v2021_v34 = vshrl.u32 %v3065_v39, %v4426_v62  ;;  %v2027_v13 = vshrl.u32 %v3067_v43, %v4426_v62  ;;  %v2024_v6 = vshrl.u32 %v3066_v41, %v4426_v62  ;;  %v2030_v16 = vshrl.u32 %v3068_v51, %v4426_v62 }
 0x22b   : > { %v1820_v4 = vadd.f32 0.041655596, %v1819_v49  ;;  %v1827_v55 = vadd.f32 0.008332121, %v1826_v14  ;;  %v1946_v8 = vshll.u32 %v1945_v27, 30  ;;  %v1969_v26 = vsub.s32 4, %v1945_v27 }
 0x22c   : > { %v2019_v10 = vor.u32 %v2018_v15, %v2017_v54  ;;  %v4459_v32 = vor.u32 %v2021_v34, %v2020_v40  ;;  %v2028_v58 = vor.u32 %v2027_v13, %v2026_v50  ;;  %vm1833_vm0 = vweird.f32 %v4129_v45 }
 0x22d   : > { %v1821_v48 = vmul.f32 %v1820_v4, %v1818_v17  ;;  %v1828_v33 = vmul.f32 %v1827_v55, %v1818_v17  ;;  %v4447_v5 = vsub.s32 %v1943_v44, %v1946_v8  ;;  %v2025_v59 = vor.u32 %v2024_v6, %v2023_v63 }
 0x22e   : > { %v2029_v19 = vshll.u32 %v3067_v43, %v2014_v46  ;;  %v4468_v29 = vadd.s32 1, %v2929_v24  ;;  %v4472_v57 = vsel %vm1847_vm11, %v1969_v26, %v1945_v27  ;;  %vm2032_vm1 = vcmp.lt.s32.totalorder %v4440_v31, 1 }
 0x22f   : > { %v1822_v61 = vadd.f32 -0.4999988, %v1821_v48  ;;  %v1829_v23 = vadd.f32 -0.16666654, %v1828_v33  ;;  %vm1948_vm14 = vcmp.lt.s32.totalorder %v4447_v5, 0  ;;  %v1949_v22 = vsub.s32 0, %v4447_v5 }
 0x230   : > { %vm4477_vm3 = vcmp.le.f32.partialorder %v1845_v52, 0.7853982  ;;  %v2031_v30 = vor.u32 %v2030_v16, %v2029_v19  ;;  %vm2035_vm6 = vcmp.lt.s32.totalorder %v4440_v31, 4  ;;  %v2040_v46 = vsel %vm2032_vm1, %v2019_v10, %v4459_v32 }
 0x231   : > { %v1823_v47 = vmul.f32 %v1822_v61, %v1818_v17  ;;  %v1830_v56 = vmul.f32 %v1829_v23, %v1818_v17  ;;  %v1950_v21 = vsel %vm1948_vm14, %v1949_v22, %v4447_v5  ;;  %vm2034_vm4 = vcmp.lt.s32.totalorder %v4440_v31, 3 }
 0x232   : > { %v1951_v38 = vclz %v1950_v21  ;;  %v2041_v27 = vsel %vm2035_vm6, %v2028_v58, 920167782  ;;  %vm2033_vm7 = vcmp.lt.s32.totalorder %v4440_v31, 2  ;;  %v2044_v24 = vsel %vm2032_vm1, %v4459_v32, %v2025_v59 }
 0x233   : > { %v1824_v2 = vadd.f32 1.0, %v1823_v47  ;;  %v1831_v44 = vadd.f32 1.0, %v1830_v56  ;;  %v2042_v52 = vsel %vm2034_vm4, %v2025_v59, %v2041_v27  ;;  %v2045_v48 = vsel %vm2035_vm6, %v2031_v30, 1326507024 }
 0x234   : > { %v2924_v17 = vadd.s32 4294967294, %v1951_v38  ;;  %v2043_v8 = vsel %vm2033_vm7, %v2040_v46, %v2042_v52  ;;  %v2046_v13 = vsel %vm2034_vm4, %v2028_v58, %v2045_v48  ;;  %vm2166_vm10 = vcmp.gt.s32.totalorder %v4468_v29, 0 }
 0x235   : > { %v1832_v49 = vmul.f32 %v1831_v44, %v1816_v28  ;;  %v1841_v14 = vxor.u32 2147483648, %v1824_v2  ;;  %v2073_v26 = vand.u32 65535, %v2043_v8  ;;  %v2074_v40 = vshrl.u32 %v2043_v8, 16 }
 0x236   : > { %vm2925_vm5 = vcmp.lt.s32.totalorder %v2924_v17, 0  ;;  %v2016_v22 = vshrl.u32 %v3063_v35, %v4426_v62  ;;  %v1972_v21 = vsel %vm4477_vm3, 0, %v4472_v57  ;;  %v2037_v19 = vsel %vm2035_vm6, %v2025_v59, 2102212464 }
 0x237   : > { %v1838_v4 = vxor.u32 2147483648, %v1832_v49  ;;  %v1842_v28 = vsel %vm1840_vm13, %v1841_v14, %v1832_v49  ;;  %v1954_v55 = vsel %vm2925_vm5, 0, %v2924_v17  ;;  %v2076_v20 = vmul.u32 %v2074_v40, %v4434_v42 }
 0x238   : > { %v1955_v54 = vsub.s32 32, %v1954_v55  ;;  %v1956_v15 = vshll.u32 %v4447_v5, %v1954_v55  ;;  %v1959_v34 = vsub.s32 4294967266, %v1954_v55  ;;  %v2047_v5 = vsel %vm2033_vm7, %v2044_v24, %v2046_v13 }
 0x239   : > { %v1839_v33 = vsel %vm1837_vm15, %v1824_v2, %v1838_v4  ;;  %v2051_v63 = vand.u32 65535, %v2047_v5  ;;  %v2052_v16 = vshrl.u32 %v2047_v5, 16  ;;  %v2036_v45 = vsel %vm2032_vm1, %v2016_v22, %v2019_v10 }
 0x23a   : > { %v1843_v6 = vsel %vm1836_vm2, %v1839_v33, %v1842_v28  ;;  %v1957_v50 = vshrl.u32 %v4431_v36, %v1955_v54  ;;  %v1960_v61 = vadd.s32 127, %v1959_v34  ;;  %v2077_v36 = vmul.u32 %v2073_v26, %v4438_v7 }
 0x23b   : > { %v1844_v23 = vsel %vm1833_vm0, nan, %v1843_v6  ;;  %v2054_v58 = vmul.u32 %v2052_v16, %v4434_v42  ;;  %v2055_v62 = vmul.u32 %v2051_v63, %v4438_v7  ;;  %v2075_v2 = vmul.u32 %v2073_v26, %v4434_v42 }
 0x23c   : > { %v1958_v47 = vor.u32 %v1957_v50, %v1956_v15  ;;  %v1961_v56 = vshll.u32 %v1960_v61, 23  ;;  %2784 = vst [vmem:[%s3480_s10 + $0x48] sm:$0xff] %v1844_v23  ;;  %v2079_v44 = vshll.u32 %v2076_v20, 16  ;;  %v2053_v30 = vmul.u32 %v2051_v63, %v4434_v42 }
 0x23d   : > { %v2056_v46 = vmul.u32 %v2052_v16, %v4438_v7  ;;  %v2057_v57 = vshll.u32 %v2054_v58, 16  ;;  %v2059_v14 = vshll.u32 %v2055_v62, 16  ;;  %v2078_v10 = vmul.u32 %v2074_v40, %v4438_v7 }
 0x23e   : > { %v1962_v38 = vor.u32 4788187, %v1961_v56  ;;  %v1965_v17 = vcvt.s32.f32 %v1958_v47  ;;  %v2081_v27 = vshll.u32 %v2077_v36, 16  ;;  %vm2083_vm9 = vc.u32 %v2075_v2, %v2079_v44 }
 0x23f   : > { %vm2061_vm8 = vc.u32 %v2053_v30, %v2057_v57  ;;  %v2063_v52 = vadd.s32 %v2057_v57, %v2053_v30  ;;  %v2085_v24 = vadd.s32 %v2079_v44, %v2075_v2  ;;  %v2038_v59 = vsel %vm2034_vm4, %v4459_v32, %v2037_v19 }
 0x240   : > { %v1963_v49 = vand.u32 2147483647, %v1962_v38  ;;  %v2062_v28 = vsel %vm2061_vm8, 1, %v3069_v53  ;;  %v2084_v42 = vsel %vm2083_vm9, 1, %v3069_v53  ;;  %v2058_v7 = vshrl.u32 %v2054_v58, 16 }
 0x241   : > { %v2064_v55 = vadd.s32 %v2062_v28, %v2056_v46  ;;  %vm2065_vm12 = vc.u32 %v2063_v52, %v2059_v14  ;;  %v2086_v8 = vadd.s32 %v2084_v42, %v2078_v10  ;;  %vm2087_vm13 = vc.u32 %v2085_v24, %v2081_v27 }
 0x242   : > { %v1966_v4 = vmul.f32 %v1965_v17, %v1963_v49  ;;  %v2066_v15 = vsel %vm2065_vm12, 1, %v3069_v53  ;;  %v2088_v34 = vsel %vm2087_vm13, 1, %v3069_v53  ;;  %v2080_v33 = vshrl.u32 %v2076_v20, 16 }
 0x243   : > { %v2068_v48 = vadd.s32 %v2066_v15, %v2064_v55  ;;  %v2090_v13 = vadd.s32 %v2088_v34, %v2086_v8  ;;  %v2167_v32 = vsel %vm2166_vm10, %v4468_v29, 0  ;;  %v2039_v40 = vsel %vm2033_vm7, %v2036_v45, %v2038_v59 }
 0x244   : > { %v1967_v54 = vxor.u32 2147483648, %v1966_v4  ;;  %v2060_v6 = vshrl.u32 %v2055_v62, 16  ;;  %v2169_v50 = vand.u32 31, %v2167_v32  ;;  %v2082_v23 = vshrl.u32 %v2077_v36, 16 }
 0x245   : > { %v2069_v5 = vadd.s32 %v2068_v48, %v2058_v7  ;;  %v2091_v22 = vadd.s32 %v2090_v13, %v2080_v33  ;;  %v2162_v16 = vand.u32 8388607, %v2155_v25  ;;  %v1989_v47 = vadd.s32 3, %v1972_v21 }
 0x246   : > { %v1968_v26 = vsel %vm1847_vm11, %v1967_v54, %v1966_v4  ;;  %v4550_v29 = vsub.s32 32, %v2169_v50  ;;  %v4554_v31 = vadd.s32 %v2085_v24, %v2081_v27  ;;  %v2093_v9 = vmul.u32 %v4424_v0, %v2039_v40 }
 0x247   : > { %v1971_v61 = vsel %vm4477_vm3, %v4132_v60, %v1968_v26  ;;  %v4552_v56 = vadd.s32 %v2069_v5, %v2060_v6  ;;  %v2092_v20 = vadd.s32 %v2091_v22, %v2082_v23  ;;  %v4557_v62 = vshrl.u32 %v2167_v32, 5 }
 0x248   : > { %v1973_v63 = vmul.f32 %v1971_v61, %v1971_v61  ;;  %v2172_v38 = vshll.u32 %v3063_v35, %v2169_v50  ;;  %v2176_v21 = vshrl.u32 %v3065_v39, %v4550_v29  ;;  %v2175_v44 = vshll.u32 %v3064_v37, %v2169_v50 }
 0x249   : > { %vm2095_vm11 = vc.u32 %v4552_v56, %v4554_v31  ;;  %v2096_v36 = vadd.s32 1, %v2092_v20  ;;  %v2179_v17 = vshrl.u32 %v3066_v41, %v4550_v29  ;;  %v2173_v0 = vshrl.u32 %v3064_v37, %v4550_v29 }
 0x24a   : > { %v1974_v45 = vmul.f32 -0.001358992, %v1973_v63  ;;  %v1981_v58 = vmul.f32 -0.00019511016, %v1973_v63  ;;  %v2181_v46 = vshll.u32 %v3066_v41, %v2169_v50  ;;  %v2182_v57 = vshrl.u32 %v3067_v43, %v4550_v29 }
 0x24b   : > { %v2097_v30 = vsel %vm2095_vm11, %v2096_v36, %v2092_v20  ;;  %v2178_v27 = vshll.u32 %v3065_v39, %v2169_v50  ;;  %v4573_v52 = vor.u32 %v2176_v21, %v2175_v44  ;;  %v2184_v4 = vshll.u32 %v3067_v43, %v2169_v50 }
 0x24c   : > { %v1975_v19 = vadd.f32 0.041655596, %v1974_v45  ;;  %v1982_v2 = vadd.f32 0.008332121, %v1981_v58  ;;  %v2098_v10 = vadd.s32 %v2097_v30, %v2093_v9  ;;  %v2183_v24 = vor.u32 %v2182_v57, %v2181_v46 }
 0x24d   : > { %v2185_v59 = vshrl.u32 %v3068_v51, %v4550_v29  ;;  %v4578_v8 = vor.u32 %v2179_v17, %v2178_v27  ;;  %v1990_v54 = vand.u32 3, %v1989_v47  ;;  %v2163_v7 = vor.u32 8388608, %v2162_v16 }
 0x24e   : > { %v1976_v49 = vmul.f32 %v1975_v19, %v1973_v63  ;;  %v1983_v14 = vmul.f32 %v1982_v2, %v1973_v63  ;;  %v2099_v55 = vadd.s32 536870912, %v2098_v10  ;;  %v4580_v15 = vor.u32 %v2173_v0, %v2172_v38  ;;  %v289_v2 = vpop.f32.mrf.mxu3 }
 0x24f   : > { %v2186_v34 = vor.u32 %v2185_v59, %v2184_v4  ;;  %vm2190_vm14 = vcmp.lt.s32.totalorder %v4557_v62, 4  ;;  %vm2187_vm15 = vcmp.lt.s32.totalorder %v4557_v62, 1  ;;  %vm2189_vm2 = vcmp.lt.s32.totalorder %v4557_v62, 3 }
 0x250   : > { %v1977_v28 = vadd.f32 -0.4999988, %v1976_v49  ;;  %v1984_v42 = vadd.f32 -0.16666654, %v1983_v14  ;;  %v4582_v13 = vshrl.u32 %v2099_v55, 30  ;;  %v2199_v5 = vsel %vm2187_vm15, %v4573_v52, %v4578_v8 }
 0x251   : > { %v2196_v32 = vsel %vm2190_vm14, %v2183_v24, 920167782  ;;  %v2200_v26 = vsel %vm2190_vm14, %v2186_v34, 1326507024  ;;  %v2195_v23 = vsel %vm2187_vm15, %v4580_v15, %v4573_v52  ;;  %v4605_v16 = vshll.u32 %v2163_v7, 8 }
 0x252   : > { %v1978_v48 = vmul.f32 %v1977_v28, %v1973_v63  ;;  %v1985_v33 = vmul.f32 %v1984_v42, %v1973_v63  ;;  %v2101_v50 = vshll.u32 %v4582_v13, 30  ;;  %v2197_v22 = vsel %vm2189_vm2, %v4578_v8, %v2196_v32 }
 0x253   : > { %v2201_v63 = vsel %vm2189_vm2, %v2183_v24, %v2200_v26  ;;  %vm2188_vm0 = vcmp.lt.s32.totalorder %v4557_v62, 2  ;;  %vm1991_vm1 = vcmp.lt.s32.totalorder %v1990_v54, 2  ;;  %vm1992_vm3 = vcmp.eq.s32.totalorder %v1990_v54, 0 }
 0x254   : > { %v1979_v40 = vadd.f32 1.0, %v1978_v48  ;;  %v1986_v6 = vadd.f32 1.0, %v1985_v33  ;;  %v2102_v45 = vsub.s32 %v2098_v10, %v2101_v50  ;;  %v2202_v58 = vsel %vm2188_vm0, %v2199_v5, %v2201_v63 }
 0x255   : > { %v2198_v38 = vsel %vm2188_vm0, %v2195_v23, %v2197_v22  ;;  %vm1995_vm4 = vcmp.eq.s32.totalorder %v1990_v54, 2  ;;  %v2204_v21 = vand.u32 65535, %v4605_v16  ;;  %v2206_v19 = vand.u32 65535, %v2202_v58 }
 0x256   : > { %v1987_v47 = vmul.f32 %v1986_v6, %v1971_v61  ;;  %v1996_v20 = vxor.u32 2147483648, %v1979_v40  ;;  %vm2103_vm6 = vcmp.lt.s32.totalorder %v2102_v45, 0  ;;  %v2104_v36 = vsub.s32 0, %v2102_v45 }
 0x257   : > { %v2207_v61 = vshrl.u32 %v2202_v58, 16  ;;  %v2205_v0 = vshrl.u32 %v4605_v16, 16  ;;  %vm1988_vm5 = vweird.f32 %v4132_v60  ;;  %v2229_v49 = vshrl.u32 %v2198_v38, 16 }
 0x258   : > { %v1993_v9 = vxor.u32 2147483648, %v1987_v47  ;;  %v1997_v17 = vsel %vm1995_vm4, %v1996_v20, %v1987_v47  ;;  %v2105_v30 = vsel %vm2103_vm6, %v2104_v36, %v2102_v45  ;;  %v2228_v24 = vand.u32 65535, %v2198_v38 }
 0x259   : > { %v2106_v57 = vclz %v2105_v30  ;;  %v2209_v10 = vmul.u32 %v2207_v61, %v2204_v21  ;;  %v2210_v27 = vmul.u32 %v2206_v19, %v2205_v0  ;;  %v4617_v4 = vadd.f32 %v289_v2, %v3171_v12 }
 0x25a   : > { %v1994_v44 = vsel %vm1992_vm3, %v1979_v40, %v1993_v9  ;;  %v2171_v28 = vshrl.u32 %v3063_v35, %v4550_v29  ;;  %v2094_v42 = vadd.s32 %v4554_v31, %v4552_v56  ;;  %v2208_v60 = vmul.u32 %v2206_v19, %v2204_v21 }
 0x25b   : > { %v1998_v46 = vsel %vm1991_vm1, %v1994_v44, %v1997_v17  ;;  %v2927_v59 = vadd.s32 4294967294, %v2106_v57  ;;  %v2211_v55 = vmul.u32 %v2207_v61, %v2205_v0  ;;  %v2212_v54 = vshll.u32 %v2209_v10, 16 }
 0x25c   : > { %v1999_v14 = vsel %vm1988_vm5, nan, %v1998_v46  ;;  %v2213_v7 = vshrl.u32 %v2209_v10, 16  ;;  %v2214_v34 = vshll.u32 %v2210_v27, 16  ;;  %v2231_v48 = vmul.u32 %v2229_v49, %v2204_v21  ;;  %v251_v46 = vpop.f32.mrf.mxu2 }
 0x25d   : > { %2785 = vst [vmem:[%s3480_s10 + $0x50] sm:$0xff] %v1999_v14  ;;  %vm2928_vm7 = vcmp.lt.s32.totalorder %v2927_v59, 0  ;;  %vm2216_vm10 = vc.u32 %v2208_v60, %v2212_v54  ;;  %v2218_v32 = vadd.s32 %v2212_v54, %v2208_v60  ;;  %v2232_v26 = vmul.u32 %v2228_v24, %v2205_v0 }
 0x25e   : > { %v2109_v33 = vsel %vm2928_vm7, 0, %v2927_v59  ;;  %v2217_v50 = vsel %vm2216_vm10, 1, %v3069_v53  ;;  %v2230_v29 = vmul.u32 %v2228_v24, %v2204_v21  ;;  %vm2002_vm8 = vcmp.lt.s32.totalorder %v4376_v1, 0 }
 0x25f   : > { %v2110_v40 = vsub.s32 32, %v2109_v33  ;;  %v2114_v6 = vsub.s32 4294967266, %v2109_v33  ;;  %v2219_v5 = vadd.s32 %v2217_v50, %v2211_v55  ;;  %vm2220_vm9 = vc.u32 %v2218_v32, %v2214_v34 }
 0x260   : > { %v2233_v56 = vmul.u32 %v2229_v49, %v2205_v0  ;;  %v2234_v31 = vshll.u32 %v2231_v48, 16  ;;  %v2111_v23 = vshll.u32 %v2102_v45, %v2109_v33  ;;  %v2221_v47 = vsel %vm2220_vm9, 1, %v3069_v53 }
 0x261   : > { %v2112_v22 = vshrl.u32 %v2094_v42, %v2110_v40  ;;  %v2115_v63 = vadd.s32 127, %v2114_v6  ;;  %v2223_v20 = vadd.s32 %v2221_v47, %v2219_v5  ;;  %v2236_v58 = vshll.u32 %v2232_v26, 16 }
 0x262   : > { %vm2238_vm12 = vc.u32 %v2230_v29, %v2234_v31  ;;  %v2240_v9 = vadd.s32 %v2234_v31, %v2230_v29  ;;  %v2192_v21 = vsel %vm2190_vm14, %v4578_v8, 2102212464  ;;  %v2310_v45 = vand.u32 2147483647, %v4617_v4 }
 0x263   : > { %v2113_v36 = vor.u32 %v2112_v22, %v2111_v23  ;;  %v2116_v38 = vshll.u32 %v2115_v63, 23  ;;  %v2239_v19 = vsel %vm2238_vm12, 1, %v3069_v53  ;;  %v2224_v61 = vadd.s32 %v2223_v20, %v2213_v7 }
 0x264   : > { %v2241_v2 = vadd.s32 %v2239_v19, %v2233_v56  ;;  %vm2242_vm13 = vc.u32 %v2240_v9, %v2236_v58  ;;  %v2124_v17 = vsub.s32 4, %v4582_v13  ;;  %v2215_v30 = vshrl.u32 %v2210_v27, 16 }
 0x265   : > { %v2117_v44 = vor.u32 4788187, %v2116_v38  ;;  %v2243_v0 = vsel %vm2242_vm13, 1, %v3069_v53  ;;  %v2191_v57 = vsel %vm2187_vm15, %v2171_v28, %v4580_v15  ;;  %v2235_v49 = vshrl.u32 %v2231_v48, 16 }
 0x266   : > { %v2245_v8 = vadd.s32 %v2243_v0, %v2241_v2  ;;  %v2313_v14 = vand.u32 2139095040, %v4617_v4  ;;  %v2120_v24 = vcvt.s32.f32 %v2113_v36  ;;  %v2193_v59 = vsel %vm2189_vm2, %v4573_v52, %v2192_v21 }
 0x267   : > { %v2118_v10 = vand.u32 2147483647, %v2117_v44  ;;  %v2225_v42 = vadd.s32 %v2224_v61, %v2215_v30  ;;  %v2237_v60 = vshrl.u32 %v2232_v26, 16  ;;  %v2317_v54 = vand.u32 8388607, %v2310_v45 }
 0x268   : > { %v2246_v27 = vadd.s32 %v2245_v8, %v2235_v49  ;;  %v2314_v55 = vshrl.u32 %v2313_v14, 23  ;;  %v4644_v7 = vadd.f32 %v251_v46, %v3169_v11  ;;  %v2125_v28 = vsel %vm2002_vm8, %v2124_v17, %v4582_v13 }
 0x269   : > { %v2121_v15 = vmul.f32 %v2120_v24, %v2118_v10  ;;  %v2244_v34 = vadd.s32 %v2240_v9, %v2236_v58  ;;  %v2194_v48 = vsel %vm2188_vm0, %v2191_v57, %v2193_v59  ;;  %vm2001_vm11 = vcmp.le.f32.partialorder %v2000_v18, 0.7853982 }
 0x26a   : > { %v2247_v52 = vadd.s32 %v2246_v27, %v2237_v60  ;;  %v2932_v33 = vadd.s32 4294967169, %v2314_v55  ;;  %v2127_v26 = vsel %vm2001_vm11, 0, %v2125_v28  ;;  %v2318_v11 = vor.u32 8388608, %v2317_v54 }
 0x26b   : > { %v2122_v32 = vxor.u32 2147483648, %v2121_v15  ;;  %vm2250_vm14 = vc.u32 %v2225_v42, %v2244_v34  ;;  %v2248_v13 = vmul.u32 %v4605_v16, %v2194_v48  ;;  %v2468_v29 = vand.u32 2139095040, %v4644_v7 }
 0x26c   : > { %v2251_v40 = vadd.s32 1, %v2247_v52  ;;  %v2320_v6 = vadd.s32 1, %v2932_v33  ;;  %v2144_v31 = vadd.s32 3, %v2127_v26  ;;  %v4658_v63 = vshll.u32 %v2318_v11, 8 }
 0x26d   : > { %v2123_v50 = vsel %vm2002_vm8, %v2122_v32, %v2121_v15  ;;  %v2465_v47 = vand.u32 2147483647, %v4644_v7  ;;  %v2469_v36 = vshrl.u32 %v2468_v29, 23  ;;  %v4667_v2 = vadd.s32 %v2244_v34, %v2225_v42 }
 0x26e   : > { %v2126_v62 = vsel %vm2001_vm11, %v4376_v1, %v2123_v50  ;;  %v2252_v5 = vsel %vm2250_vm14, %v2251_v40, %v2247_v52  ;;  %vm2321_vm15 = vcmp.gt.s32.totalorder %v2320_v6, 0  ;;  %v4663_v19 = vand.u32 3, %v2144_v31 }
 0x26f   : > { %v2128_v56 = vmul.f32 %v2126_v62, %v2126_v62  ;;  %v2253_v18 = vadd.s32 %v2252_v5, %v2248_v13  ;;  %v2322_v23 = vsel %vm2321_vm15, %v2320_v6, 0  ;;  %v4670_v44 = vand.u32 65535, %v4658_v63 }
 0x270   : > { %v2324_v22 = vand.u32 31, %v2322_v23  ;;  %v4674_v17 = vand.u32 8388607, %v2465_v47  ;;  %v2935_v57 = vadd.s32 4294967169, %v2469_v36  ;;  %v4677_v49 = vshrl.u32 %v2322_v23, 5 }
 0x271   : > { %v2129_v20 = vmul.f32 -0.001358992, %v2128_v56  ;;  %v2136_v58 = vmul.f32 -0.00019511016, %v2128_v56  ;;  %v2254_v9 = vadd.s32 536870912, %v2253_v18  ;;  %vm2150_vm2 = vcmp.eq.s32.totalorder %v4663_v19, 2 }
 0x272   : > { %v4661_v16 = vsub.s32 32, %v2324_v22  ;;  %v2327_v60 = vshll.u32 %v3063_v35, %v2324_v22  ;;  %vm2147_vm0 = vcmp.eq.s32.totalorder %v4663_v19, 0  ;;  %v2330_v27 = vshll.u32 %v3064_v37, %v2324_v22 }
 0x273   : > { %v2130_v38 = vadd.f32 0.041655596, %v2129_v20  ;;  %v2137_v21 = vadd.f32 0.008332121, %v2136_v58  ;;  %v4665_v61 = vshrl.u32 %v2254_v9, 30  ;;  %v2336_v54 = vshll.u32 %v3066_v41, %v2324_v22 }
 0x274   : > { %v2328_v8 = vshrl.u32 %v3064_v37, %v4661_v16  ;;  %v2331_v14 = vshrl.u32 %v3065_v39, %v4661_v16  ;;  %v2337_v10 = vshrl.u32 %v3067_v43, %v4661_v16  ;;  %v2334_v55 = vshrl.u32 %v3066_v41, %v4661_v16 }
 0x275   : > { %v2131_v30 = vmul.f32 %v2130_v38, %v2128_v56  ;;  %v2138_v0 = vmul.f32 %v2137_v21, %v2128_v56  ;;  %v2256_v46 = vshll.u32 %v4665_v61, 30  ;;  %v2340_v15 = vshrl.u32 %v3068_v51, %v4661_v16 }
 0x276   : > { %vm2146_vm1 = vcmp.lt.s32.totalorder %v4663_v19, 2  ;;  %vm2143_vm6 = vweird.f32 %v4376_v1  ;;  %v2329_v52 = vor.u32 %v2328_v8, %v2327_v60  ;;  %v2332_v33 = vor.u32 %v2331_v14, %v2330_v27 }
 0x277   : > { %v2132_v24 = vadd.f32 -0.4999988, %v2131_v30  ;;  %v2139_v59 = vadd.f32 -0.16666654, %v2138_v0  ;;  %v4686_v42 = vsub.s32 %v2253_v18, %v2256_v46  ;;  %v2333_v32 = vshll.u32 %v3065_v39, %v2324_v22 }
 0x278   : > { %v2338_v26 = vor.u32 %v2337_v10, %v2336_v54  ;;  %v2339_v50 = vshll.u32 %v3067_v43, %v2324_v22  ;;  %v2360_v5 = vshrl.u32 %v4658_v63, 16  ;;  %vm2157_vm4 = vcmp.lt.s32.totalorder %v4379_v3, 0 }
 0x279   : > { %v2133_v28 = vmul.f32 %v2132_v24, %v2128_v56  ;;  %v2140_v34 = vmul.f32 %v2139_v59, %v2128_v56  ;;  %vm2258_vm3 = vcmp.lt.s32.totalorder %v4686_v42, 0  ;;  %v2259_v48 = vsub.s32 0, %v4686_v42 }
 0x27a   : > { %v2335_v29 = vor.u32 %v2334_v55, %v2333_v32  ;;  %v4704_v56 = vadd.s32 1, %v2935_v57  ;;  %v2341_v23 = vor.u32 %v2340_v15, %v2339_v50  ;;  %vm2342_vm5 = vcmp.lt.s32.totalorder %v4677_v49, 1 }
 0x27b   : > { %v2134_v40 = vadd.f32 1.0, %v2133_v28  ;;  %v2141_v11 = vadd.f32 1.0, %v2140_v34  ;;  %v2260_v6 = vsel %vm2258_vm3, %v2259_v48, %v4686_v42  ;;  %v2279_v58 = vsub.s32 4, %v4665_v61 }
 0x27c   : > { %v2261_v13 = vclz %v2260_v6  ;;  %vm2345_vm7 = vcmp.lt.s32.totalorder %v4677_v49, 4  ;;  %v2350_v22 = vsel %vm2342_vm5, %v2329_v52, %v2332_v33  ;;  %vm2343_vm10 = vcmp.lt.s32.totalorder %v4677_v49, 2 }
 0x27d   : > { %v2142_v31 = vmul.f32 %v2141_v11, %v2126_v62  ;;  %v2151_v18 = vxor.u32 2147483648, %v2134_v40  ;;  %vm2344_vm8 = vcmp.lt.s32.totalorder %v4677_v49, 3  ;;  %v2351_v62 = vsel %vm2345_vm7, %v2338_v26, 920167782 }
 0x27e   : > { %v2930_v20 = vadd.s32 4294967294, %v2261_v13  ;;  %v2352_v38 = vsel %vm2344_vm8, %v2335_v29, %v2351_v62  ;;  %v2354_v21 = vsel %vm2342_vm5, %v2332_v33, %v2335_v29  ;;  %v2355_v57 = vsel %vm2345_vm7, %v2341_v23, 1326507024 }
 0x27f   : > { %v2148_v9 = vxor.u32 2147483648, %v2142_v31  ;;  %v2152_v36 = vsel %vm2150_vm2, %v2151_v18, %v2142_v31  ;;  %v2353_v46 = vsel %vm2343_vm10, %v2350_v22, %v2352_v38  ;;  %vm2476_vm12 = vcmp.gt.s32.totalorder %v4704_v56, 0 }
 0x280   : > { %vm2931_vm9 = vcmp.lt.s32.totalorder %v2930_v20, 0  ;;  %v2347_v24 = vsel %vm2345_vm7, %v2335_v29, 2102212464  ;;  %v2356_v60 = vsel %vm2344_vm8, %v2338_v26, %v2355_v57  ;;  %v2383_v27 = vand.u32 65535, %v2353_v46 }
 0x281   : > { %v2149_v30 = vsel %vm2147_vm0, %v2134_v40, %v2148_v9  ;;  %v2264_v0 = vsel %vm2931_vm9, 0, %v2930_v20  ;;  %v2384_v55 = vshrl.u32 %v2353_v46, 16  ;;  %v2357_v19 = vsel %vm2343_vm10, %v2354_v21, %v2356_v60 }
 0x282   : > { %v2153_v8 = vsel %vm2146_vm1, %v2149_v30, %v2152_v36  ;;  %v2265_v14 = vsub.s32 32, %v2264_v0  ;;  %v2269_v10 = vsub.s32 4294967266, %v2264_v0  ;;  %v2266_v54 = vshll.u32 %v4686_v42, %v2264_v0 }
 0x283   : > { %v2154_v59 = vsel %vm2143_vm6, nan, %v2153_v8  ;;  %v2326_v34 = vshrl.u32 %v3063_v35, %v4661_v16  ;;  %v2361_v48 = vand.u32 65535, %v2357_v19  ;;  %v2362_v1 = vshrl.u32 %v2357_v19, 16 }
 0x284   : > { %v2267_v15 = vshrl.u32 %v4667_v2, %v2265_v14  ;;  %v2270_v28 = vadd.s32 127, %v2269_v10  ;;  %2786 = vst [vmem:[%s3480_s10 + $0x58] sm:$0xff] %v2154_v59  ;;  %v2386_v32 = vmul.u32 %v2384_v55, %v4670_v44  ;;  %v4748_v42 = vsel %vm2157_vm4, %v2279_v58, %v4665_v61 }
 0x285   : > { %v2387_v2 = vmul.u32 %v2383_v27, %v2360_v5  ;;  %vm4752_vm13 = vcmp.le.f32.partialorder %v2155_v25, 0.7853982  ;;  %v2346_v16 = vsel %vm2342_vm5, %v2326_v34, %v2329_v52  ;;  %v2348_v6 = vsel %vm2344_vm8, %v2332_v33, %v2347_v24 }
 0x286   : > { %v2268_v40 = vor.u32 %v2267_v15, %v2266_v54  ;;  %v2271_v26 = vshll.u32 %v2270_v28, 23  ;;  %v2364_v50 = vmul.u32 %v2362_v1, %v4670_v44  ;;  %v2365_v13 = vmul.u32 %v2361_v48, %v2360_v5 }
 0x287   : > { %v2385_v61 = vmul.u32 %v2383_v27, %v4670_v44  ;;  %v2388_v31 = vmul.u32 %v2384_v55, %v2360_v5  ;;  %v2389_v18 = vshll.u32 %v2386_v32, 16  ;;  %v2363_v25 = vmul.u32 %v2361_v48, %v4670_v44 }
 0x288   : > { %v2272_v29 = vor.u32 4788187, %v2271_v26  ;;  %v2275_v23 = vcvt.s32.f32 %v2268_v40  ;;  %v2366_v20 = vmul.u32 %v2362_v1, %v2360_v5  ;;  %v2367_v58 = vshll.u32 %v2364_v50, 16 }
 0x289   : > { %v2369_v9 = vshll.u32 %v2365_v13, 16  ;;  %v2391_v62 = vshll.u32 %v2387_v2, 16  ;;  %vm2393_vm11 = vc.u32 %v2385_v61, %v2389_v18  ;;  %v2395_v36 = vadd.s32 %v2389_v18, %v2385_v61 }
 0x28a   : > { %v2273_v22 = vand.u32 2147483647, %v2272_v29  ;;  %vm2371_vm14 = vc.u32 %v2363_v25, %v2367_v58  ;;  %v2373_v52 = vadd.s32 %v2367_v58, %v2363_v25  ;;  %v2394_v33 = vsel %vm2393_vm11, 1, %v3069_v53 }
 0x28b   : > { %v2372_v21 = vsel %vm2371_vm14, 1, %v3069_v53  ;;  %v2396_v30 = vadd.s32 %v2394_v33, %v2388_v31  ;;  %v2477_v0 = vsel %vm2476_vm12, %v4704_v56, 0  ;;  %v2349_v44 = vsel %vm2343_vm10, %v2346_v16, %v2348_v6 }
 0x28c   : > { %v2276_v38 = vmul.f32 %v2275_v23, %v2273_v22  ;;  %v2374_v5 = vadd.s32 %v2372_v21, %v2366_v20  ;;  %vm2375_vm15 = vc.u32 %v2373_v52, %v2369_v9  ;;  %vm2397_vm2 = vc.u32 %v2395_v36, %v2391_v62 }
 0x28d   : > { %v2376_v57 = vsel %vm2375_vm15, 1, %v3069_v53  ;;  %v2390_v8 = vshrl.u32 %v2386_v32, 16  ;;  %v2398_v14 = vsel %vm2397_vm2, 1, %v3069_v53  ;;  %v2368_v10 = vshrl.u32 %v2364_v50, 16 }
 0x28e   : > { %v2277_v46 = vxor.u32 2147483648, %v2276_v38  ;;  %v2378_v24 = vadd.s32 %v2376_v57, %v2374_v5  ;;  %v2400_v59 = vadd.s32 %v2398_v14, %v2396_v30  ;;  %v2479_v60 = vand.u32 31, %v2477_v0 }
 0x28f   : > { %v2282_v49 = vsel %vm4752_vm13, 0, %v4748_v42  ;;  %v2370_v56 = vshrl.u32 %v2365_v13, 16  ;;  %v2392_v55 = vshrl.u32 %v2387_v2, 16  ;;  %v4782_v48 = vadd.s32 %v2395_v36, %v2391_v62 }
 0x290   : > { %v2278_v27 = vsel %vm2157_vm4, %v2277_v46, %v2276_v38  ;;  %v2379_v15 = vadd.s32 %v2378_v24, %v2368_v10  ;;  %v2401_v28 = vadd.s32 %v2400_v59, %v2390_v8  ;;  %v4780_v19 = vsub.s32 32, %v2479_v60 }
 0x291   : > { %v2281_v54 = vsel %vm4752_vm13, %v4379_v3, %v2278_v27  ;;  %v2403_v1 = vmul.u32 %v4658_v63, %v2349_v44  ;;  %v4785_v32 = vshrl.u32 %v2477_v0, 5  ;;  %v2482_v42 = vshll.u32 %v3063_v35, %v2479_v60 }
 0x292   : > { %v2283_v34 = vmul.f32 %v2281_v54, %v2281_v54  ;;  %v4787_v40 = vadd.s32 %v2379_v15, %v2370_v56  ;;  %v2402_v26 = vadd.s32 %v2401_v28, %v2392_v55  ;;  %v2483_v2 = vshrl.u32 %v3064_v37, %v4780_v19 }
 0x293   : > { %v2485_v6 = vshll.u32 %v3064_v37, %v2479_v60  ;;  %v2486_v50 = vshrl.u32 %v3065_v39, %v4780_v19  ;;  %v2488_v13 = vshll.u32 %v3065_v39, %v2479_v60  ;;  %v2489_v29 = vshrl.u32 %v3066_v41, %v4780_v19 }
 0x294   : > { %v2284_v11 = vmul.f32 -0.001358992, %v2283_v34  ;;  %v2291_v16 = vmul.f32 -0.00019511016, %v2283_v34  ;;  %vm2405_vm0 = vc.u32 %v4787_v40, %v4782_v48  ;;  %v2406_v63 = vadd.s32 1, %v2402_v26 }
 0x295   : > { %v4800_v18 = vor.u32 %v2483_v2, %v2482_v42  ;;  %v4802_v23 = vor.u32 %v2486_v50, %v2485_v6  ;;  %v2491_v20 = vshll.u32 %v3066_v41, %v2479_v60  ;;  %v2492_v58 = vshrl.u32 %v3067_v43, %v4780_v19 }
 0x296   : > { %v2285_v61 = vadd.f32 0.041655596, %v2284_v11  ;;  %v2292_v31 = vadd.f32 0.008332121, %v2291_v16  ;;  %v2407_v25 = vsel %vm2405_vm0, %v2406_v63, %v2402_v26  ;;  %v2494_v22 = vshll.u32 %v3067_v43, %v2479_v60 }
 0x297   : > { %v2408_v52 = vadd.s32 %v2407_v25, %v2403_v1  ;;  %v2495_v33 = vshrl.u32 %v3068_v51, %v4780_v19  ;;  %v2299_v36 = vadd.s32 3, %v2282_v49  ;;  %v4810_v38 = vor.u32 %v2489_v29, %v2488_v13 }
 0x298   : > { %v2286_v9 = vmul.f32 %v2285_v61, %v2283_v34  ;;  %v2293_v62 = vmul.f32 %v2292_v31, %v2283_v34  ;;  %v2493_v21 = vor.u32 %v2492_v58, %v2491_v20  ;;  %vm2500_vm1 = vcmp.lt.s32.totalorder %v4785_v32, 4 }
 0x299   : > { %v2409_v44 = vadd.s32 536870912, %v2408_v52  ;;  %v2496_v5 = vor.u32 %v2495_v33, %v2494_v22  ;;  %v2473_v46 = vor.u32 8388608, %v4674_v17  ;;  %vm2497_vm3 = vcmp.lt.s32.totalorder %v4785_v32, 1 }
 0x29a   : > { %v2287_v30 = vadd.f32 -0.4999988, %v2286_v9  ;;  %v2294_v0 = vadd.f32 -0.16666654, %v2293_v62  ;;  %vm2499_vm6 = vcmp.lt.s32.totalorder %v4785_v32, 3  ;;  %v2505_v24 = vsel %vm2497_vm3, %v4800_v18, %v4802_v23 }
 0x29b   : > { %v2506_v57 = vsel %vm2500_vm1, %v2493_v21, 920167782  ;;  %v4818_v10 = vshrl.u32 %v2409_v44, 30  ;;  %v2300_v59 = vand.u32 3, %v2299_v36  ;;  %vm2498_vm4 = vcmp.lt.s32.totalorder %v4785_v32, 2 }
 0x29c   : > { %v2288_v8 = vmul.f32 %v2287_v30, %v2283_v34  ;;  %v2295_v14 = vmul.f32 %v2294_v0, %v2283_v34  ;;  %v2507_v17 = vsel %vm2499_vm6, %v4810_v38, %v2506_v57  ;;  %v2510_v60 = vsel %vm2500_vm1, %v2496_v5, 1326507024 }
 0x29d   : > { %v2411_v56 = vshll.u32 %v4818_v10, 30  ;;  %v2509_v55 = vsel %vm2497_vm3, %v4802_v23, %v4810_v38  ;;  %v2508_v15 = vsel %vm2498_vm4, %v2505_v24, %v2507_v17  ;;  %v2511_v28 = vsel %vm2499_vm6, %v2493_v21, %v2510_v60 }
 0x29e   : > { %v2289_v27 = vadd.f32 1.0, %v2288_v8  ;;  %v2296_v49 = vadd.f32 1.0, %v2295_v14  ;;  %v4839_v34 = vshll.u32 %v2473_v46, 8  ;;  %vm2301_vm5 = vcmp.lt.s32.totalorder %v2300_v59, 2 }
 0x29f   : > { %v2412_v42 = vsub.s32 %v2408_v52, %v2411_v56  ;;  %vm2302_vm7 = vcmp.eq.s32.totalorder %v2300_v59, 0  ;;  %v2512_v2 = vsel %vm2498_vm4, %v2509_v55, %v2511_v28  ;;  %v2539_v11 = vshrl.u32 %v2508_v15, 16 }
 0x2a0   : > { %v2297_v1 = vmul.f32 %v2296_v49, %v2281_v54  ;;  %v2306_v26 = vxor.u32 2147483648, %v2289_v27  ;;  %vm2305_vm10 = vcmp.eq.s32.totalorder %v2300_v59, 2  ;;  %v2514_v50 = vand.u32 65535, %v4839_v34  ;;  %v292_v54 = vpop.f32.mrf.mxu3 }
 0x2a1   : > { %vm2413_vm8 = vcmp.lt.s32.totalorder %v2412_v42, 0  ;;  %v2414_v6 = vsub.s32 0, %v2412_v42  ;;  %v2515_v63 = vshrl.u32 %v4839_v34, 16  ;;  %v2516_v13 = vand.u32 65535, %v2512_v2 }
 0x2a2   : > { %v2303_v16 = vxor.u32 2147483648, %v2297_v1  ;;  %v2517_v29 = vshrl.u32 %v2512_v2, 16  ;;  %v2307_v31 = vsel %vm2305_vm10, %v2306_v26, %v2297_v1  ;;  %v2538_v20 = vand.u32 65535, %v2508_v15 }
 0x2a3   : > { %v2415_v25 = vsel %vm2413_vm8, %v2414_v6, %v2412_v42  ;;  %vm2298_vm9 = vweird.f32 %v4379_v3  ;;  %v2541_v9 = vmul.u32 %v2539_v11, %v2514_v50  ;;  %v2520_v33 = vmul.u32 %v2516_v13, %v2515_v63 }
 0x2a4   : > { %v2304_v61 = vsel %vm2302_vm7, %v2289_v27, %v2303_v16  ;;  %v2416_v22 = vclz %v2415_v25  ;;  %v2519_v52 = vmul.u32 %v2517_v29, %v2514_v50  ;;  %v4848_v36 = vadd.f32 %v292_v54, %v3171_v12 }
 0x2a5   : > { %v2308_v58 = vsel %vm2301_vm5, %v2304_v61, %v2307_v31  ;;  %v2404_v21 = vadd.s32 %v4782_v48, %v4787_v40  ;;  %v2518_v0 = vmul.u32 %v2516_v13, %v2514_v50  ;;  %v2540_v5 = vmul.u32 %v2538_v20, %v2514_v50 }
 0x2a6   : > { %v2309_v62 = vsel %vm2298_vm9, nan, %v2308_v58  ;;  %v2933_v30 = vadd.s32 4294967294, %v2416_v22  ;;  %v2522_v44 = vshll.u32 %v2519_v52, 16  ;;  %v2542_v46 = vmul.u32 %v2538_v20, %v2515_v63 }
 0x2a7   : > { %2787 = vst [vmem:[%s3480_s10 + $0x60] sm:$0xff] %v2309_v62  ;;  %v2521_v3 = vmul.u32 %v2517_v29, %v2515_v63  ;;  %v2523_v57 = vshrl.u32 %v2519_v52, 16  ;;  %v2544_v8 = vshll.u32 %v2541_v9, 16  ;;  %v2524_v24 = vshll.u32 %v2520_v33, 16 }
 0x2a8   : > { %vm2934_vm12 = vcmp.lt.s32.totalorder %v2933_v30, 0  ;;  %vm2526_vm13 = vc.u32 %v2518_v0, %v2522_v44  ;;  %v2528_v59 = vadd.s32 %v2522_v44, %v2518_v0  ;;  %vm2312_vm11 = vcmp.lt.s32.totalorder %v4617_v4, 0 }
 0x2a9   : > { %v2419_v14 = vsel %vm2934_vm12, 0, %v2933_v30  ;;  %v2527_v48 = vsel %vm2526_vm13, 1, %v3069_v53  ;;  %v2543_v40 = vmul.u32 %v2539_v11, %v2515_v63  ;;  %vm2548_vm15 = vc.u32 %v2540_v5, %v2544_v8 }
 0x2aa   : > { %v2420_v12 = vsub.s32 32, %v2419_v14  ;;  %v2424_v17 = vsub.s32 4294967266, %v2419_v14  ;;  %v2421_v60 = vshll.u32 %v2412_v42, %v2419_v14  ;;  %v2529_v27 = vadd.s32 %v2527_v48, %v2521_v3 }
 0x2ab   : > { %vm2530_vm14 = vc.u32 %v2528_v59, %v2524_v24  ;;  %v2549_v15 = vsel %vm2548_vm15, 1, %v3069_v53  ;;  %v2546_v1 = vshll.u32 %v2542_v46, 16  ;;  %v2550_v26 = vadd.s32 %v2544_v8, %v2540_v5 }
 0x2ac   : > { %v2422_v49 = vshrl.u32 %v2404_v21, %v2420_v12  ;;  %v2425_v56 = vadd.s32 127, %v2424_v17  ;;  %v2531_v55 = vsel %vm2530_vm14, 1, %v3069_v53  ;;  %v2551_v2 = vadd.s32 %v2549_v15, %v2543_v40 }
 0x2ad   : > { %v2533_v28 = vadd.s32 %v2531_v55, %v2529_v27  ;;  %v2502_v11 = vsel %vm2500_vm1, %v4810_v38, 2102212464  ;;  %v2623_v42 = vand.u32 2139095040, %v4848_v36  ;;  %v2434_v50 = vsub.s32 4, %v4818_v10 }
 0x2ae   : > { %v2423_v16 = vor.u32 %v2422_v49, %v2421_v60  ;;  %v2426_v6 = vshll.u32 %v2425_v56, 23  ;;  %v2481_v63 = vshrl.u32 %v3063_v35, %v4780_v19  ;;  %vm2552_vm2 = vc.u32 %v2550_v26, %v2546_v1 }
 0x2af   : > { %v2534_v13 = vadd.s32 %v2533_v28, %v2523_v57  ;;  %v2525_v54 = vshrl.u32 %v2520_v33, 16  ;;  %v2553_v61 = vsel %vm2552_vm2, 1, %v3069_v53  ;;  %v2624_v31 = vshrl.u32 %v2623_v42, 23 }
 0x2b0   : > { %v2427_v29 = vor.u32 4788187, %v2426_v6  ;;  %v2501_v25 = vsel %vm2497_vm3, %v2481_v63, %v4800_v18  ;;  %v2503_v38 = vsel %vm2499_vm6, %v4802_v23, %v2502_v11  ;;  %v2545_v20 = vshrl.u32 %v2541_v9, 16 }
 0x2b1   : > { %v2555_v58 = vadd.s32 %v2553_v61, %v2551_v2  ;;  %v2430_v62 = vcvt.s32.f32 %v2423_v16  ;;  %v4871_v19 = vadd.s32 %v2534_v13, %v2525_v54  ;;  %v2938_v52 = vadd.s32 4294967169, %v2624_v31 }
 0x2b2   : > { %v2428_v22 = vand.u32 2147483647, %v2427_v29  ;;  %v2435_v33 = vsel %vm2312_vm11, %v2434_v50, %v4818_v10  ;;  %v2547_v21 = vshrl.u32 %v2542_v46, 16  ;;  %v4876_v44 = vadd.s32 %v2550_v26, %v2546_v1 }
 0x2b3   : > { %v2556_v30 = vadd.s32 %v2555_v58, %v2545_v20  ;;  %v2630_v18 = vadd.s32 1, %v2938_v52  ;;  %vm2311_vm0 = vcmp.le.f32.partialorder %v2310_v45, 0.7853982  ;;  %v2504_v23 = vsel %vm2498_vm4, %v2501_v25, %v2503_v38 }
 0x2b4   : > { %v2431_v0 = vmul.f32 %v2430_v62, %v2428_v22  ;;  %v2620_v5 = vand.u32 2147483647, %v4848_v36  ;;  %v2437_v57 = vsel %vm2311_vm0, 0, %v2435_v33  ;;  %vm2560_vm1 = vc.u32 %v4871_v19, %v4876_v44 }
 0x2b5   : > { %v2557_v9 = vadd.s32 %v2556_v30, %v2547_v21  ;;  %vm2631_vm3 = vcmp.gt.s32.totalorder %v2630_v18, 0  ;;  %v2558_v14 = vmul.u32 %v4839_v34, %v2504_v23  ;;  %v2454_v24 = vadd.s32 3, %v2437_v57 }
 0x2b6   : > { %v2432_v3 = vxor.u32 2147483648, %v2431_v0  ;;  %v2632_v46 = vsel %vm2631_vm3, %v2630_v18, 0  ;;  %v2627_v12 = vand.u32 8388607, %v2620_v5  ;;  %vm2453_vm5 = vweird.f32 %v4617_v4 }
 0x2b7   : > { %v2561_v10 = vadd.s32 1, %v2557_v9  ;;  %v2634_v45 = vand.u32 31, %v2632_v46  ;;  %v4893_v56 = vand.u32 3, %v2454_v24  ;;  %v4895_v15 = vshrl.u32 %v2632_v46, 5 }
 0x2b8   : > { %v2433_v8 = vsel %vm2312_vm11, %v2432_v3, %v2431_v0  ;;  %v2628_v55 = vor.u32 8388608, %v2627_v12  ;;  %vm2467_vm3 = vcmp.lt.s32.totalorder %v4644_v7, 0 }
 0x2b9   : > { %v2436_v32 = vsel %vm2311_vm0, %v4617_v4, %v2433_v8  ;;  %v2562_v59 = vsel %vm2560_vm1, %v2561_v10, %v2557_v9  ;;  %v4891_v40 = vsub.s32 32, %v2634_v45  ;;  %v2646_v11 = vshll.u32 %v3066_v41, %v2634_v45 }
 0x2ba   : > { %v2438_v17 = vmul.f32 %v2436_v32, %v2436_v32  ;;  %v2563_v48 = vadd.s32 %v2562_v59, %v2558_v14  ;;  %v2637_v29 = vshll.u32 %v3063_v35, %v2634_v45  ;;  %v2640_v54 = vshll.u32 %v3064_v37, %v2634_v45 }
 0x2bb   : > { %v2647_v34 = vshrl.u32 %v3067_v43, %v4891_v40  ;;  %v2638_v2 = vshrl.u32 %v3064_v37, %v4891_v40  ;;  %v2641_v16 = vshrl.u32 %v3065_v39, %v4891_v40  ;;  %v2644_v6 = vshrl.u32 %v3066_v41, %v4891_v40 }
 0x2bc   : > { %v2439_v60 = vmul.f32 -0.001358992, %v2438_v17  ;;  %v2446_v27 = vmul.f32 -0.00019511016, %v2438_v17  ;;  %v2564_v49 = vadd.s32 536870912, %v2563_v48  ;;  %v2650_v42 = vshrl.u32 %v3068_v51, %v4891_v40 }
 0x2bd   : > { %v2643_v61 = vshll.u32 %v3065_v39, %v2634_v45  ;;  %v2648_v31 = vor.u32 %v2647_v34, %v2646_v11  ;;  %v2649_v25 = vshll.u32 %v3067_v43, %v2634_v45  ;;  %v4915_v41 = vor.u32 %v2638_v2, %v2637_v29 }
 0x2be   : > { %v2440_v28 = vadd.f32 0.041655596, %v2439_v60  ;;  %v2447_v1 = vadd.f32 0.008332121, %v2446_v27  ;;  %v4899_v26 = vshrl.u32 %v2564_v49, 30  ;;  %v4917_v22 = vor.u32 %v2641_v16, %v2640_v54 }
 0x2bf   : > { %v4919_v51 = vor.u32 %v2644_v6, %v2643_v61  ;;  %v2651_v62 = vor.u32 %v2650_v42, %v2649_v25  ;;  %vm2655_vm6 = vcmp.lt.s32.totalorder %v4895_v15, 4  ;;  %vm2456_vm7 = vcmp.lt.s32.totalorder %v4893_v56, 2 }
 0x2c0   : > { %v2441_v50 = vmul.f32 %v2440_v28, %v2438_v17  ;;  %v2448_v63 = vmul.f32 %v2447_v1, %v2438_v17  ;;  %v2566_v13 = vshll.u32 %v4899_v26, 30  ;;  %vm2652_vm10 = vcmp.lt.s32.totalorder %v4895_v15, 1 }
 0x2c1   : > { %v2661_v39 = vsel %vm2655_vm6, %v2648_v31, 920167782  ;;  %v4927_v43 = vshll.u32 %v2628_v55, 8  ;;  %vm2654_vm8 = vcmp.lt.s32.totalorder %v4895_v15, 3  ;;  %vm2457_vm9 = vcmp.eq.s32.totalorder %v4893_v56, 0 }
 0x2c2   : > { %v2442_v38 = vadd.f32 -0.4999988, %v2441_v50  ;;  %v2449_v20 = vadd.f32 -0.16666654, %v2448_v63  ;;  %v2567_v58 = vsub.s32 %v2563_v48, %v2566_v13  ;;  %v2660_v23 = vsel %vm2652_vm10, %v4915_v41, %v4917_v22 }
 0x2c3   : > { %v2662_v9 = vsel %vm2654_vm8, %v4919_v51, %v2661_v39  ;;  %v2664_v10 = vsel %vm2652_vm10, %v4917_v22, %v4919_v51  ;;  %v2665_v46 = vsel %vm2655_vm6, %v2651_v62, 1326507024  ;;  %vm2460_vm12 = vcmp.eq.s32.totalorder %v4893_v56, 2 }
 0x2c4   : > { %v2443_v52 = vmul.f32 %v2442_v38, %v2438_v17  ;;  %v2450_v33 = vmul.f32 %v2449_v20, %v2438_v17  ;;  %vm2568_vm4 = vcmp.lt.s32.totalorder %v2567_v58, 0  ;;  %v2569_v37 = vsub.s32 0, %v2567_v58 }
 0x2c5   : > { %v2559_v8 = vadd.s32 %v4876_v44, %v4871_v19  ;;  %vm2653_vm13 = vcmp.lt.s32.totalorder %v4895_v15, 2  ;;  %v2666_v24 = vsel %vm2654_vm8, %v2648_v31, %v2665_v46  ;;  %v2669_v59 = vand.u32 65535, %v4927_v43 }
 0x2c6   : > { %v2444_v21 = vadd.f32 1.0, %v2443_v52  ;;  %v2451_v30 = vadd.f32 1.0, %v2450_v33  ;;  %v2570_v0 = vsel %vm2568_vm4, %v2569_v37, %v2567_v58  ;;  %v2667_v17 = vsel %vm2653_vm13, %v2664_v10, %v2666_v24 }
 0x2c7   : > { %v2571_v18 = vclz %v2570_v0  ;;  %v2670_v48 = vshrl.u32 %v4927_v43, 16  ;;  %v2671_v60 = vand.u32 65535, %v2667_v17  ;;  %v2672_v27 = vshrl.u32 %v2667_v17, 16 }
 0x2c8   : > { %v2452_v3 = vmul.f32 %v2451_v30, %v2436_v32  ;;  %v2461_v57 = vxor.u32 2147483648, %v2444_v21  ;;  %v2663_v32 = vsel %vm2653_vm13, %v2660_v23, %v2662_v9  ;;  %v2657_v10 = vsel %vm2655_vm6, %v4919_v51, 2102212464 }
 0x2c9   : > { %v2936_v14 = vadd.s32 4294967294, %v2571_v18  ;;  %v2694_v28 = vshrl.u32 %v2663_v32, 16  ;;  %v2674_v2 = vmul.u32 %v2672_v27, %v2669_v59  ;;  %v2675_v16 = vmul.u32 %v2671_v60, %v2670_v48 }
 0x2ca   : > { %v2458_v45 = vxor.u32 2147483648, %v2452_v3  ;;  %v2462_v12 = vsel %vm2460_vm12, %v2461_v57, %v2452_v3  ;;  %v2693_v6 = vand.u32 65535, %v2663_v32  ;;  %v2673_v63 = vmul.u32 %v2671_v60, %v2669_v59 }
 0x2cb   : > { %vm2937_vm11 = vcmp.lt.s32.totalorder %v2936_v14, 0  ;;  %v2677_v13 = vshll.u32 %v2674_v2, 16  ;;  %v2676_v61 = vmul.u32 %v2672_v27, %v2670_v48  ;;  %v2696_v56 = vmul.u32 %v2694_v28, %v2669_v59 }
 0x2cc   : > { %v2459_v19 = vsel %vm2457_vm9, %v2444_v21, %v2458_v45  ;;  %v2574_v44 = vsel %vm2937_vm11, 0, %v2936_v14  ;;  %v2679_v31 = vshll.u32 %v2675_v16, 16  ;;  %v2697_v38 = vmul.u32 %v2693_v6, %v2670_v48 }
 0x2cd   : > { %v2463_v49 = vsel %vm2456_vm7, %v2459_v19, %v2462_v12  ;;  %v2575_v55 = vsub.s32 32, %v2574_v44  ;;  %v2579_v34 = vsub.s32 4294967266, %v2574_v44  ;;  %v2576_v11 = vshll.u32 %v2567_v58, %v2574_v44 }
 0x2ce   : > { %v2464_v1 = vsel %vm2453_vm5, nan, %v2463_v49  ;;  %vm2681_vm14 = vc.u32 %v2673_v63, %v2677_v13  ;;  %v2683_v25 = vadd.s32 %v2677_v13, %v2673_v63  ;;  %v2695_v62 = vmul.u32 %v2693_v6, %v2669_v59 }
 0x2cf   : > { %v2577_v42 = vshrl.u32 %v2559_v8, %v2575_v55  ;;  %v2580_v50 = vadd.s32 127, %v2579_v34  ;;  %2788 = vst [vmem:[%s3480_s10 + $0x68] sm:$0xff] %v2464_v1  ;;  %v2682_v4 = vsel %vm2681_vm14, 1, %v3069_v53  ;;  %v2699_v52 = vshll.u32 %v2696_v56, 16 }
 0x2d0   : > { %v2678_v33 = vshrl.u32 %v2674_v2, 16  ;;  %v2684_v58 = vadd.s32 %v2682_v4, %v2676_v61  ;;  %vm2685_vm15 = vc.u32 %v2683_v25, %v2679_v31  ;;  %v2698_v37 = vmul.u32 %v2694_v28, %v2670_v48 }
 0x2d1   : > { %v2578_v29 = vor.u32 %v2577_v42, %v2576_v11  ;;  %v2581_v54 = vshll.u32 %v2580_v50, 23  ;;  %v2686_v30 = vsel %vm2685_vm15, 1, %v3069_v53  ;;  %vm2703_vm2 = vc.u32 %v2695_v62, %v2699_v52 }
 0x2d2   : > { %v2688_v0 = vadd.s32 %v2686_v30, %v2684_v58  ;;  %v2701_v18 = vshll.u32 %v2697_v38, 16  ;;  %v2704_v23 = vsel %vm2703_vm2, 1, %v3069_v53  ;;  %v2705_v9 = vadd.s32 %v2699_v52, %v2695_v62 }
 0x2d3   : > { %v2582_v20 = vor.u32 4788187, %v2581_v54  ;;  %v2585_v21 = vcvt.s32.f32 %v2578_v29  ;;  %v2706_v57 = vadd.s32 %v2704_v23, %v2698_v37  ;;  %v2636_v14 = vshrl.u32 %v3063_v35, %v4891_v40 }
 0x2d4   : > { %v2689_v46 = vadd.s32 %v2688_v0, %v2678_v33  ;;  %vm2707_vm0 = vc.u32 %v2705_v9, %v2701_v18  ;;  %v2680_v45 = vshrl.u32 %v2675_v16, 16  ;;  %vm4974_vm1 = vcmp.le.f32.partialorder %v2465_v47, 0.7853982 }
 0x2d5   : > { %v2583_v39 = vand.u32 2147483647, %v2582_v20  ;;  %v2708_v32 = vsel %vm2707_vm0, 1, %v3069_v53  ;;  %v2700_v59 = vshrl.u32 %v2696_v56, 16  ;;  %v2656_v35 = vsel %vm2652_vm10, %v2636_v14, %v4915_v41 }
 0x2d6   : > { %v2710_v12 = vadd.s32 %v2708_v32, %v2706_v57  ;;  %v2658_v53 = vsel %vm2654_vm8, %v4917_v22, %v2657_v10  ;;  %v2690_v40 = vadd.s32 %v2689_v46, %v2680_v45  ;;  %v2589_v47 = vsub.s32 4, %v4899_v26 }
 0x2d7   : > { %v2586_v3 = vmul.f32 %v2585_v21, %v2583_v39  ;;  %v2702_v48 = vshrl.u32 %v2697_v38, 16  ;;  %v2709_v60 = vadd.s32 %v2705_v9, %v2701_v18  ;;  %v2659_v27 = vsel %vm2653_vm13, %v2656_v35, %v2658_v53 }
 0x2d8   : > { %v2711_v19 = vadd.s32 %v2710_v12, %v2700_v59  ;;  %v2590_v22 = vsel %vm2467_vm3, %v2589_v47, %v4899_v26  ;;  %v2713_v2 = vmul.u32 %v4927_v43, %v2659_v27  ;;  %vm2608_vm8 = vweird.f32 %v4644_v7 }
 0x2d9   : > { %v2587_v8 = vxor.u32 2147483648, %v2586_v3  ;;  %vm2715_vm6 = vc.u32 %v2690_v40, %v2709_v60  ;;  %v2592_v6 = vsel %vm4974_vm1, 0, %v2590_v22  ;;  %v2714_v23 = vadd.s32 %v2709_v60, %v2690_v40 }
 0x2da   : > { %v2712_v49 = vadd.s32 %v2711_v19, %v2702_v48  ;;  %v2609_v29 = vadd.s32 3, %v2592_v6  ;;  %vm2622_vm12 = vcmp.lt.s32.totalorder %v4848_v36, 0  ;;  %vm2621_vm13 = vcmp.le.f32.partialorder %v2620_v5, 0.7853982 }
 0x2db   : > { %v2588_v51 = vsel %vm2467_vm3, %v2587_v8, %v2586_v3  ;;  %vm2763_vm2 = vweird.f32 %v4848_v36 }
 0x2dc   : > { %v2591_v17 = vsel %vm4974_vm1, %v4644_v7, %v2588_v51  ;;  %v2716_v34 = vadd.s32 1, %v2712_v49  ;;  %v2610_v38 = vand.u32 3, %v2609_v29 }
 0x2dd   : > { %v2593_v44 = vmul.f32 %v2591_v17, %v2591_v17 }
 0x2de   : > { %v2717_v16 = vsel %vm2715_vm6, %v2716_v34, %v2712_v49  ;;  %vm2612_vm5 = vcmp.eq.s32.totalorder %v2610_v38, 0  ;;  %vm2615_vm7 = vcmp.eq.s32.totalorder %v2610_v38, 2  ;;  %vm2611_vm10 = vcmp.lt.s32.totalorder %v2610_v38, 2 }
 0x2df   : > { %v2594_v41 = vmul.f32 -0.001358992, %v2593_v44  ;;  %v2601_v55 = vmul.f32 -0.00019511016, %v2593_v44  ;;  %v2718_v42 = vadd.s32 %v2717_v16, %v2713_v2 }
 0x2e1   : > { %v2595_v28 = vadd.f32 0.041655596, %v2594_v41  ;;  %v2602_v1 = vadd.f32 0.008332121, %v2601_v55  ;;  %v2719_v13 = vadd.s32 536870912, %v2718_v42 }
 0x2e3   : > { %v2596_v11 = vmul.f32 %v2595_v28, %v2593_v44  ;;  %v2603_v15 = vmul.f32 %v2602_v1, %v2593_v44  ;;  %v2720_v56 = vshrl.u32 %v2719_v13, 30 }
 0x2e5   : > { %v2597_v50 = vadd.f32 -0.4999988, %v2596_v11  ;;  %v2604_v63 = vadd.f32 -0.16666654, %v2603_v15  ;;  %v2721_v25 = vshll.u32 %v2720_v56, 30  ;;  %v2744_v51 = vsub.s32 4, %v2720_v56 }
 0x2e7   : > { %v2598_v54 = vmul.f32 %v2597_v50, %v2593_v44  ;;  %v2605_v61 = vmul.f32 %v2604_v63, %v2593_v44  ;;  %v2722_v4 = vsub.s32 %v2718_v42, %v2721_v25 }
 0x2e9   : > { %v2599_v26 = vadd.f32 1.0, %v2598_v54  ;;  %v2606_v31 = vadd.f32 1.0, %v2605_v61  ;;  %vm2723_vm4 = vcmp.lt.s32.totalorder %v2722_v4, 0  ;;  %v2724_v52 = vsub.s32 0, %v2722_v4 }
 0x2eb   : > { %v2607_v20 = vmul.f32 %v2606_v31, %v2591_v17  ;;  %v2616_v43 = vxor.u32 2147483648, %v2599_v26  ;;  %v2725_v37 = vsel %vm2723_vm4, %v2724_v52, %v2722_v4  ;;  %v2745_v17 = vsel %vm2622_vm12, %v2744_v51, %v2720_v56 }
 0x2ec   : > { %v2726_v21 = vclz %v2725_v37  ;;  %v2747_v44 = vsel %vm2621_vm13, 0, %v2745_v17 }
 0x2ed   : > { %v2613_v62 = vxor.u32 2147483648, %v2607_v20  ;;  %v2617_v58 = vsel %vm2615_vm7, %v2616_v43, %v2607_v20  ;;  %v2764_v55 = vadd.s32 3, %v2747_v44 }
 0x2ee   : > { %v2939_v0 = vadd.s32 4294967294, %v2726_v21 }
 0x2ef   : > { %v2614_v33 = vsel %vm2612_vm5, %v2599_v26, %v2613_v62  ;;  %v2765_v1 = vand.u32 3, %v2764_v55 }
 0x2f0   : > { %v2618_v39 = vsel %vm2611_vm10, %v2614_v33, %v2617_v58  ;;  %vm2940_vm9 = vcmp.lt.s32.totalorder %v2939_v0, 0 }
 0x2f1   : > { %v2619_v30 = vsel %vm2608_vm8, nan, %v2618_v39  ;;  %v2729_v18 = vsel %vm2940_vm9, 0, %v2939_v0  ;;  %vm2767_vm11 = vcmp.eq.s32.totalorder %v2765_v1, 0  ;;  %vm2770_vm14 = vcmp.eq.s32.totalorder %v2765_v1, 2 }
 0x2f2   : > { %2789 = vst [vmem:[%s3480_s10 + $0x70] sm:$0xff] %v2619_v30  ;;  %v2730_v9 = vsub.s32 32, %v2729_v18  ;;  %v2734_v3 = vsub.s32 4294967266, %v2729_v18  ;;  %v2731_v57 = vshll.u32 %v2722_v4, %v2729_v18  ;;  %vm2766_vm15 = vcmp.lt.s32.totalorder %v2765_v1, 2 }
 0x2f4   : > { %v2732_v10 = vshrl.u32 %v2714_v23, %v2730_v9  ;;  %v2735_v46 = vadd.s32 127, %v2734_v3 }
 0x2f6   : > { %v2733_v8 = vor.u32 %v2732_v10, %v2731_v57  ;;  %v2736_v14 = vshll.u32 %v2735_v46, 23 }
 0x2f8   : > { %v2737_v45 = vor.u32 4788187, %v2736_v14  ;;  %v2740_v24 = vcvt.s32.f32 %v2733_v8 }
 0x2fa   : > { %v2738_v32 = vand.u32 2147483647, %v2737_v45 }
 0x2fc   : > { %v2741_v59 = vmul.f32 %v2740_v24, %v2738_v32 }
 0x2fe   : > { %v2742_v7 = vxor.u32 2147483648, %v2741_v59 }
 0x300   : > { %v2743_v12 = vsel %vm2622_vm12, %v2742_v7, %v2741_v59 }
 0x301   : > { %v2746_v35 = vsel %vm2621_vm13, %v4848_v36, %v2743_v12 }
 0x302   : > { %v2748_v53 = vmul.f32 %v2746_v35, %v2746_v35 }
 0x304   : > { %v2749_v40 = vmul.f32 -0.001358992, %v2748_v53  ;;  %v2756_v47 = vmul.f32 -0.00019511016, %v2748_v53 }
 0x306   : > { %v2750_v48 = vadd.f32 0.041655596, %v2749_v40  ;;  %v2757_v19 = vadd.f32 0.008332121, %v2756_v47 }
 0x308   : > { %v2751_v60 = vmul.f32 %v2750_v48, %v2748_v53  ;;  %v2758_v27 = vmul.f32 %v2757_v19, %v2748_v53 }
 0x30a   : > { %v2752_v49 = vadd.f32 -0.4999988, %v2751_v60  ;;  %v2759_v41 = vadd.f32 -0.16666654, %v2758_v27 }
 0x30c   : > { %v2753_v5 = vmul.f32 %v2752_v49, %v2748_v53  ;;  %v2760_v22 = vmul.f32 %v2759_v41, %v2748_v53 }
 0x30e   : > { %v2754_v34 = vadd.f32 1.0, %v2753_v5  ;;  %v2761_v28 = vadd.f32 1.0, %v2760_v22 }
 0x310   : > { %v2762_v2 = vmul.f32 %v2761_v28, %v2746_v35  ;;  %v2771_v16 = vxor.u32 2147483648, %v2754_v34 }
 0x312   : > { %v2768_v6 = vxor.u32 2147483648, %v2762_v2  ;;  %v2772_v15 = vsel %vm2770_vm14, %v2771_v16, %v2762_v2 }
 0x314   : > { %v2769_v11 = vsel %vm2767_vm11, %v2754_v34, %v2768_v6 }
 0x315   : > { %v2773_v42 = vsel %vm2766_vm15, %v2769_v11, %v2772_v15 }
 0x316   : > { %v2774_v50 = vsel %vm2763_vm2, nan, %v2773_v42 }
 0x317   : > { %2790 = vst [vmem:[%s3480_s10 + $0x78] sm:$0xff] %v2774_v50 }
 0x318   : > { %3026 = shalt.err (!%p3023_p3)
}
 0x319   : > { %s3070_s6 = smov 256   ;;  %s3071_s7 = smov 16  }
 0x31a   : > { %2951 = dma.vmem_to_hbm [thread:$0]  (%p3130_p5), %s2806_s24, 2048, %s2808_s25, %s2792_s16, %s3070_s6, %s3070_s6, %s3071_s7  }
 0x31b PF: > { %p2957_p4 = scmp.ge.s32.totalorder %s3061_s15, 2  ;;  %s2822_s8 = sand.u32 1, %s3049_s12  }
 0x31c   : > { %s2823_s9 = scalar_lea.sflag [#allocation3], %s2822_s8 }
 0x31d   : > { %p2954_p7 = pnand %p2957_p4, %p3134_p6 }
 0x31f   : > { %p2955_p8 = pneg %p2954_p7 }
 0x321   : > { %3044 = dma.done.wait (%p2955_p8), %s2823_s9, 2048  }
 0x322   : > { %3046 = vsyncadd (%p2955_p8), %s2823_s9, 4294965248  ;;  %p13_p9 = scmp.ge.s32.totalorder %s3117_s18, 4   ;;  %s5073_s12 = smov %s3053_s13 }
 0x323   : > { %s5074_s13 = smov %s3057_s14  ;;  %s5075_s14 = smov %s3128_s21 }
 0x324   : > { %s5076_s15 = smov %s3117_s18  ;;  %15 = sbr.rel (!%p13_p9) target bundleno = 3 (0x3), region = 67 }
 0x329   :  { %2829 = vsyncpa [#allocation3], 1 }
 0x32a   :  { %2831 = vsyncpa [#allocation3 + $0x1], 1 }

</bundles_post_ra>
